<compile_context>
chip_gen: v5e
topology: v5e:2x2
jax: 0.10.0
libtpu: 0.0.40
codegen_flags: <defaults>
</compile_context>

<pallas_src>
import functools

import numpy as np
import jax
import jax.numpy as jnp
from jax import lax
from jax.experimental import pallas as pl
from jax.experimental.pallas import tpu as pltpu

PAD = 4  # shared zero padding = max(conv1: dilation-4/pad-4, conv2: dilation-1/pad-1)

# 18 tap (row, col) start offsets into the PAD=4 padded image, in the same order the
# wrapper stacks the conv weights: 9 dilated (conv1) taps then 9 plain (conv2) taps,
# each in (ky, kx) raster order.
_TAPS = tuple(
    [(4 * ky, 4 * kx) for ky in range(3) for kx in range(3)]
    + [(PAD - 1 + ky, PAD - 1 + kx) for ky in range(3) for kx in range(3)]
)

PARAM_ORDER = ("w1", "b1", "w2", "b2", "wm1", "bm1", "wm2", "bm2")


def _gelu_tanh(x):
    # TODO(synk): PyTorch nn.GELU() defaults to the exact erf form; we use the tanh
    # approximation (max abs deviation ~3e-3) since erf has no guaranteed Mosaic
    # lowering.  The in-script reference uses the same formula.
    c = 0.7978845608028654  # sqrt(2/pi)
    return 0.5 * x * (1.0 + jnp.tanh(c * (x + 0.044715 * x * x * x)))


def dual_scale_conv_kernel(
    x_ref,      # (1, H, W, Cin)       f32   one image (NHWC inside the kernel)
    wf_ref,     # (18*Cin, 2*Cout)     bf16  fused: stacked conv taps @ merge-1x1 #1
    bf_ref,     # (1, 2*Cout)          f32   fused bias: (b1 + b2) @ Wm1 + bm1
    wm2_ref,    # (2*Cout, Cout)       bf16  merge 1x1 #2
    bm2_ref,    # (1, Cout)            f32
    o_ref,      # (1, Cout, H*W)       f32   lane-dense output (H*W in the lane dim)
    xp_ref,     # VMEM scratch (H+2*PAD, W+2*PAD, Cin) f32: shared padded image
    *, res: bool,
):
    _, H, W, Cin = x_ref.shape
    HW = H * W
    Cout = o_ref.shape[1]

    x = x_ref[0]                                     # (H, W, Cin) f32, loaded once

    # -- padded image via plain stores into a resident VMEM scratch (no concatenate).
    # The zero frame is rewritten every step (a few KiB of stores) so the kernel stays
    # correct when the batch axis is sharded across TensorCores ("parallel" semantics).
    xp_ref[...] = jnp.zeros_like(xp_ref)
    xp_ref[PAD:PAD + H, PAD:PAD + W, :] = x
    xp = xp_ref[...]                                 # (H+8, W+8, Cin)

    # -- im2col: 18 shifted windows -> one (H*W, 18*Cin) LHS; single bf16 cast.
    cols = [xp[r:r + H, c:c + W, :].reshape(HW, Cin) for (r, c) in _TAPS]
    im = jnp.concatenate(cols, axis=1).astype(jnp.bfloat16)     # (HW, 18*Cin)

    # -- conv1 + conv2 + merge 1x1 #1 in ONE big-K MXU matmul (K = 18*Cin).
    h = jnp.dot(im, wf_ref[...], preferred_element_type=jnp.float32) + bf_ref[...]
    h = _gelu_tanh(h)                                # (HW, 2*Cout) f32

    # -- merge 1x1 #2.
    m = jnp.dot(h.astype(jnp.bfloat16), wm2_ref[...],
                preferred_element_type=jnp.float32) + bm2_ref[...]   # (HW, Cout) f32

    if res:
        m = m + x.reshape(HW, Cin)                   # f32 residual (Cin == Cout)

    # -- lane-dense store: 2-D transpose puts H*W in the lane dimension.
    o_ref[...] = m.T.reshape(1, Cout, HW)


def _vmem_limit_bytes(H, W, Cin, Cout):
    HW, Hid = H * W, 2 * Cout
    per_step = (
        2 * HW * Cin * 4                                  # double-buffered input block
        + 2 * Cout * HW * 4                               # double-buffered output block
        + (H + 2 * PAD) * (W + 2 * PAD) * Cin * 4         # padded scratch
        + HW * 18 * Cin * (4 + 2)                         # im2col (f32 concat + bf16)
        + HW * Hid * 4 + HW * Cout * 4                    # activations
        + (18 * Cin * Hid + Hid * Cout) * 2               # resident weights
    )
    try:
        cap = int(pltpu.get_tpu_info().vmem_capacity_bytes)   # 64 MiB/TC v7x, 128 MiB v5e/v6e
    except Exception:
        cap = 64 << 20
    return int(min(max(4 * per_step, 32 << 20), (cap * 3) // 4))


def dual_scale_conv(x, params, *, res=True):
    """x: (B, Cin, H, W) float32 (PyTorch NCHW) -> (B, Cout, H, W) float32."""
    B, Cin, H, W = x.shape
    Cout = params["b1"].shape[-1]
    Hid = 2 * Cout
    HW = H * W
    if res:
        assert Cin == Cout, "residual branch requires in_channels == outchannel"

    f32, bf16 = jnp.float32, jnp.bfloat16

    # ---- one-time weight prep: stack the 18 conv taps (order == _TAPS) and fold them
    # into merge 1x1 #1.  Exact algebra: im2col @ (W_taps @ Wm1) == (conv1+conv2) @ Wm1.
    w_taps = jnp.concatenate(
        [params["w1"].astype(f32).reshape(9, Cin, Cout),
         params["w2"].astype(f32).reshape(9, Cin, Cout)], axis=0,
    ).reshape(18 * Cin, Cout)
    w_fused = (w_taps @ params["wm1"].astype(f32)).astype(bf16)            # (18*Cin, Hid)
    b_fused = ((params["b1"] + params["b2"]).astype(f32) @ params["wm1"].astype(f32)
               + params["bm1"].astype(f32))                                # (1, Hid)
    wm2 = params["wm2"].astype(bf16)                                       # (Hid, Cout)
    bm2 = params["bm2"].astype(f32)                                        # (1, Cout)

    # The kernel computes in NHWC; transpose the NCHW input once at the XLA level.
    # TODO(synk): a fully channel-major in-kernel im2col would remove this transpose.
    x_nhwc = jnp.transpose(x.astype(f32), (0, 2, 3, 1))

    const2 = lambda b: (0, 0)
    in_specs = [
        pl.BlockSpec((1, H, W, Cin), lambda b: (b, 0, 0, 0)),
        pl.BlockSpec((18 * Cin, Hid), const2),
        pl.BlockSpec((1, Hid), const2),
        pl.BlockSpec((Hid, Cout), const2),
        pl.BlockSpec((1, Cout), const2),
    ]
    out_specs = pl.BlockSpec((1, Cout, HW), lambda b: (b, 0, 0))

    flops = int(2 * B * HW * (18 * Cin * Hid + Hid * Cout))
    bytes_accessed = int(4 * x.size + 4 * B * Cout * HW
                         + 2 * (w_fused.size + wm2.size)
                         + 4 * (b_fused.size + bm2.size))

    out_flat = pl.pallas_call(
        functools.partial(dual_scale_conv_kernel, res=res),
        out_shape=jax.ShapeDtypeStruct((B, Cout, HW), f32),
        grid=(B,),
        in_specs=in_specs,
        out_specs=out_specs,
        scratch_shapes=[pltpu.VMEM((H + 2 * PAD, W + 2 * PAD, Cin), f32)],
        compiler_params=pltpu.CompilerParams(
            dimension_semantics=("parallel",),
            vmem_limit_bytes=_vmem_limit_bytes(H, W, Cin, Cout)),
        cost_estimate=pl.CostEstimate(
            flops=flops,
            transcendentals=int(B * HW * Hid),
            bytes_accessed=bytes_accessed),
    )(x_nhwc, w_fused, b_fused, wm2, bm2)

    # (B, Cout, H*W) -> (B, Cout, H, W): free reshape (channel-major, contiguous).
    return out_flat.reshape(B, Cout, H, W)


def dual_scale_conv_ref(x, p, *, res=True):
    """Pure-JAX f32 HIGHEST-precision reference in NCHW, mirroring the PyTorch module."""
    B, Cin, H, W = x.shape
    Cout = p["b1"].shape[-1]
    hi = lax.Precision.HIGHEST
    dn = ("NCHW", "HWIO", "NCHW")
    y1 = lax.conv_general_dilated(
        x, p["w1"], window_strides=(1, 1), padding=((4, 4), (4, 4)),
        rhs_dilation=(4, 4), dimension_numbers=dn, precision=hi,
    ) + p["b1"].reshape(1, -1, 1, 1)
    y2 = lax.conv_general_dilated(
        x, p["w2"], window_strides=(1, 1), padding=((1, 1), (1, 1)),
        dimension_numbers=dn, precision=hi,
    ) + p["b2"].reshape(1, -1, 1, 1)
    y = (y1 + y2).reshape(B, Cout, H * W)
    h = _gelu_tanh(jnp.einsum("bcp,cd->bdp", y, p["wm1"], precision=hi)
                   + p["bm1"].reshape(1, -1, 1))
    m = (jnp.einsum("bdp,de->bep", h, p["wm2"], precision=hi)
         + p["bm2"].reshape(1, -1, 1)).reshape(B, Cout, H, W)
    return x + m if res else m


def init_params(key, cin, cout):
    ks = dict(zip(PARAM_ORDER, jax.random.split(key, len(PARAM_ORDER))))
    w = lambda k, shape, s=0.1: (s * jax.random.normal(k, shape)).astype(jnp.float32)
    return {
        # 3x3 conv weights in HWIO (PyTorch OIHW -> transpose(2, 3, 1, 0))
        "w1": w(ks["w1"], (3, 3, cin, cout)),   "b1": w(ks["b1"], (1, cout)),
        "w2": w(ks["w2"], (3, 3, cin, cout)),   "b2": w(ks["b2"], (1, cout)),
        # 1x1 conv weights stored (in, out) so the math is x @ W
        "wm1": w(ks["wm1"], (cout, 2 * cout)),  "bm1": w(ks["bm1"], (1, 2 * cout)),
        "wm2": w(ks["wm2"], (2 * cout, cout)),  "bm2": w(ks["bm2"], (1, cout)),
    }


if __name__ == "__main__":
    B, C, H, W = 2, 16, 16, 16          # in_channels == outchannel == 16 (res=True)
    key = jax.random.PRNGKey(0)
    kx, kp = jax.random.split(key)
    x = jax.random.normal(kx, (B, C, H, W), dtype=jnp.float32)   # NCHW, like PyTorch
    params = init_params(kp, C, C)

    out = jax.block_until_ready(dual_scale_conv(x, params, res=True))
    ref = jax.block_until_ready(dual_scale_conv_ref(x, params, res=True))
    assert out.shape == (B, C, H, W)
    # bf16 MXU operands + exact conv/merge-1x1 weight fusion vs f32 HIGHEST reference.
    np.testing.assert_allclose(np.asarray(out), np.asarray(ref), rtol=3e-2, atol=3e-2)
    print("KERNEL_OK")
</pallas_src>

<mosaic_0001>
module attributes {stable_mosaic.version = 11 : i64} {
  func.func @dual_scale_conv_kernel(%arg0: i32, %arg1: memref<1x16x16x16xf32, #tpu.memory_space<vmem>>, %arg2: memref<288x32xbf16, #tpu.memory_space<vmem>>, %arg3: memref<1x32xf32, #tpu.memory_space<vmem>>, %arg4: memref<32x16xbf16, #tpu.memory_space<vmem>>, %arg5: memref<1x16xf32, #tpu.memory_space<vmem>>, %arg6: memref<1x16x256xf32, #tpu.memory_space<vmem>>, %arg7: memref<24x24x16xf32, #tpu.memory_space<vmem>>) attributes {dimension_semantics = [#tpu.dimension_semantics<parallel>], iteration_bounds = array<i64: 2>, scalar_prefetch = 0 : i64, scratch_operands = 1 : i64, tpu.core_type = #tpu.core_type<tc>, window_params = [{transform_indices = @transform_0, window_bounds = array<i64: 1, 16, 16, 16>}, {pipeline_mode = #tpu.pipeline_mode<synchronous>, transform_indices = @transform_1, window_bounds = array<i64: 288, 32>}, {pipeline_mode = #tpu.pipeline_mode<synchronous>, transform_indices = @transform_2, window_bounds = array<i64: 1, 32>}, {pipeline_mode = #tpu.pipeline_mode<synchronous>, transform_indices = @transform_3, window_bounds = array<i64: 32, 16>}, {pipeline_mode = #tpu.pipeline_mode<synchronous>, transform_indices = @transform_4, window_bounds = array<i64: 1, 16>}, {transform_indices = @transform_5, window_bounds = array<i64: 1, 16, 256>}]} {
    %c0 = arith.constant 0 : index
    %c0_0 = arith.constant 0 : index
    %c0_1 = arith.constant 0 : index
    %c0_2 = arith.constant 0 : index
    %0 = vector.load %arg1[%c0, %c0_0, %c0_1, %c0_2] : memref<1x16x16x16xf32, #tpu.memory_space<vmem>>, vector<1x16x16x16xf32>
    %1 = vector.shape_cast %0 : vector<1x16x16x16xf32> to vector<16x16x16xf32>
    %cst = arith.constant 0.000000e+00 : f32
    %2 = vector.broadcast %cst : f32 to vector<24x24x16xf32>
    %c0_3 = arith.constant 0 : index
    %c0_4 = arith.constant 0 : index
    %c0_5 = arith.constant 0 : index
    %3 = vector.load %arg7[%c0_3, %c0_4, %c0_5] : memref<24x24x16xf32, #tpu.memory_space<vmem>>, vector<24x24x16xf32>
    tpu.vector_store %arg7[%c0_3, %c0_4, %c0_5], %2 {strides = array<i32>} : memref<24x24x16xf32, #tpu.memory_space<vmem>>, vector<24x24x16xf32>,
    %c4 = arith.constant 4 : index
    %c4_6 = arith.constant 4 : index
    %c0_7 = arith.constant 0 : index
    %4 = vector.load %arg7[%c4, %c4_6, %c0_7] : memref<24x24x16xf32, #tpu.memory_space<vmem>>, vector<16x16x16xf32>
    tpu.vector_store %arg7[%c4, %c4_6, %c0_7], %1 {strides = array<i32>} : memref<24x24x16xf32, #tpu.memory_space<vmem>>, vector<16x16x16xf32>,
    %c0_8 = arith.constant 0 : index
    %c0_9 = arith.constant 0 : index
    %c0_10 = arith.constant 0 : index
    %5 = vector.load %arg7[%c0_8, %c0_9, %c0_10] : memref<24x24x16xf32, #tpu.memory_space<vmem>>, vector<24x24x16xf32>
    %6 = vector.extract_strided_slice %5 {offsets = [0, 0, 0], sizes = [16, 16, 16], strides = [1, 1, 1]} : vector<24x24x16xf32> to vector<16x16x16xf32>
    %7 = vector.shape_cast %6 : vector<16x16x16xf32> to vector<256x16xf32>
    %8 = vector.extract_strided_slice %5 {offsets = [0, 4, 0], sizes = [16, 16, 16], strides = [1, 1, 1]} : vector<24x24x16xf32> to vector<16x16x16xf32>
    %9 = vector.shape_cast %8 : vector<16x16x16xf32> to vector<256x16xf32>
    %10 = vector.extract_strided_slice %5 {offsets = [0, 8, 0], sizes = [16, 16, 16], strides = [1, 1, 1]} : vector<24x24x16xf32> to vector<16x16x16xf32>
    %11 = vector.shape_cast %10 : vector<16x16x16xf32> to vector<256x16xf32>
    %12 = vector.extract_strided_slice %5 {offsets = [4, 0, 0], sizes = [16, 16, 16], strides = [1, 1, 1]} : vector<24x24x16xf32> to vector<16x16x16xf32>
    %13 = vector.shape_cast %12 : vector<16x16x16xf32> to vector<256x16xf32>
    %14 = vector.extract_strided_slice %5 {offsets = [4, 4, 0], sizes = [16, 16, 16], strides = [1, 1, 1]} : vector<24x24x16xf32> to vector<16x16x16xf32>
    %15 = vector.shape_cast %14 : vector<16x16x16xf32> to vector<256x16xf32>
    %16 = vector.extract_strided_slice %5 {offsets = [4, 8, 0], sizes = [16, 16, 16], strides = [1, 1, 1]} : vector<24x24x16xf32> to vector<16x16x16xf32>
    %17 = vector.shape_cast %16 : vector<16x16x16xf32> to vector<256x16xf32>
    %18 = vector.extract_strided_slice %5 {offsets = [8, 0, 0], sizes = [16, 16, 16], strides = [1, 1, 1]} : vector<24x24x16xf32> to vector<16x16x16xf32>
    %19 = vector.shape_cast %18 : vector<16x16x16xf32> to vector<256x16xf32>
    %20 = vector.extract_strided_slice %5 {offsets = [8, 4, 0], sizes = [16, 16, 16], strides = [1, 1, 1]} : vector<24x24x16xf32> to vector<16x16x16xf32>
    %21 = vector.shape_cast %20 : vector<16x16x16xf32> to vector<256x16xf32>
    %22 = vector.extract_strided_slice %5 {offsets = [8, 8, 0], sizes = [16, 16, 16], strides = [1, 1, 1]} : vector<24x24x16xf32> to vector<16x16x16xf32>
    %23 = vector.shape_cast %22 : vector<16x16x16xf32> to vector<256x16xf32>
    %24 = vector.extract_strided_slice %5 {offsets = [3, 3, 0], sizes = [16, 16, 16], strides = [1, 1, 1]} : vector<24x24x16xf32> to vector<16x16x16xf32>
    %25 = vector.shape_cast %24 : vector<16x16x16xf32> to vector<256x16xf32>
    %26 = vector.extract_strided_slice %5 {offsets = [3, 4, 0], sizes = [16, 16, 16], strides = [1, 1, 1]} : vector<24x24x16xf32> to vector<16x16x16xf32>
    %27 = vector.shape_cast %26 : vector<16x16x16xf32> to vector<256x16xf32>
    %28 = vector.extract_strided_slice %5 {offsets = [3, 5, 0], sizes = [16, 16, 16], strides = [1, 1, 1]} : vector<24x24x16xf32> to vector<16x16x16xf32>
    %29 = vector.shape_cast %28 : vector<16x16x16xf32> to vector<256x16xf32>
    %30 = vector.extract_strided_slice %5 {offsets = [4, 3, 0], sizes = [16, 16, 16], strides = [1, 1, 1]} : vector<24x24x16xf32> to vector<16x16x16xf32>
    %31 = vector.shape_cast %30 : vector<16x16x16xf32> to vector<256x16xf32>
    %32 = vector.extract_strided_slice %5 {offsets = [4, 4, 0], sizes = [16, 16, 16], strides = [1, 1, 1]} : vector<24x24x16xf32> to vector<16x16x16xf32>
    %33 = vector.shape_cast %32 : vector<16x16x16xf32> to vector<256x16xf32>
    %34 = vector.extract_strided_slice %5 {offsets = [4, 5, 0], sizes = [16, 16, 16], strides = [1, 1, 1]} : vector<24x24x16xf32> to vector<16x16x16xf32>
    %35 = vector.shape_cast %34 : vector<16x16x16xf32> to vector<256x16xf32>
    %36 = vector.extract_strided_slice %5 {offsets = [5, 3, 0], sizes = [16, 16, 16], strides = [1, 1, 1]} : vector<24x24x16xf32> to vector<16x16x16xf32>
    %37 = vector.shape_cast %36 : vector<16x16x16xf32> to vector<256x16xf32>
    %38 = vector.extract_strided_slice %5 {offsets = [5, 4, 0], sizes = [16, 16, 16], strides = [1, 1, 1]} : vector<24x24x16xf32> to vector<16x16x16xf32>
    %39 = vector.shape_cast %38 : vector<16x16x16xf32> to vector<256x16xf32>
    %40 = vector.extract_strided_slice %5 {offsets = [5, 5, 0], sizes = [16, 16, 16], strides = [1, 1, 1]} : vector<24x24x16xf32> to vector<16x16x16xf32>
    %41 = vector.shape_cast %40 : vector<16x16x16xf32> to vector<256x16xf32>
    %42 = tpu.concatenate %7, %9, %11, %13, %15, %17, %19, %21, %23, %25, %27, %29, %31, %33, %35, %37 in 1 : vector<256x16xf32>, vector<256x16xf32>, vector<256x16xf32>, vector<256x16xf32>, vector<256x16xf32>, vector<256x16xf32>, vector<256x16xf32>, vector<256x16xf32>, vector<256x16xf32>, vector<256x16xf32>, vector<256x16xf32>, vector<256x16xf32>, vector<256x16xf32>, vector<256x16xf32>, vector<256x16xf32>, vector<256x16xf32> -> vector<256x256xf32>
    %43 = tpu.concatenate %39, %41 in 1 : vector<256x16xf32>, vector<256x16xf32> -> vector<256x32xf32>
    %44 = tpu.concatenate %42, %43 in 1 : vector<256x256xf32>, vector<256x32xf32> -> vector<256x288xf32>
    %45 = arith.truncf %44 : vector<256x288xf32> to vector<256x288xbf16>
    %c0_11 = arith.constant 0 : index
    %c0_12 = arith.constant 0 : index
    %46 = vector.load %arg2[%c0_11, %c0_12] : memref<288x32xbf16, #tpu.memory_space<vmem>>, vector<288x32xbf16>
    %cst_13 = arith.constant dense<0.000000e+00> : vector<256x32xf32>
    %47 = tpu.matmul %45, %46, %cst_13 {dimension_numbers = #tpu.dot_dimension_numbers<[1], [0], [0], [1], [0, 0, 1, 1], [], []>} : vector<256x288xbf16>, vector<288x32xbf16>, vector<256x32xf32> -> vector<256x32xf32>
    %c0_14 = arith.constant 0 : index
    %c0_15 = arith.constant 0 : index
    %48 = vector.load %arg3[%c0_14, %c0_15] : memref<1x32xf32, #tpu.memory_space<vmem>>, vector<1x32xf32>
    %49 = vector.broadcast %48 : vector<1x32xf32> to vector<256x32xf32>
    %50 = arith.addf %47, %49 : vector<256x32xf32>
    %cst_16 = arith.constant 5.000000e-01 : f32
    %51 = vector.broadcast %cst_16 : f32 to vector<256x32xf32>
    %52 = arith.mulf %51, %50 : vector<256x32xf32>
    %cst_17 = arith.constant 4.471500e-02 : f32
    %53 = vector.broadcast %cst_17 : f32 to vector<256x32xf32>
    %54 = arith.mulf %53, %50 : vector<256x32xf32>
    %55 = arith.mulf %54, %50 : vector<256x32xf32>
    %56 = arith.mulf %55, %50 : vector<256x32xf32>
    %57 = arith.addf %50, %56 : vector<256x32xf32>
    %cst_18 = arith.constant 0.797884583 : f32
    %58 = vector.broadcast %cst_18 : f32 to vector<256x32xf32>
    %59 = arith.mulf %58, %57 : vector<256x32xf32>
    %60 = math.tanh %59 : vector<256x32xf32>
    %cst_19 = arith.constant 1.000000e+00 : f32
    %61 = vector.broadcast %cst_19 : f32 to vector<256x32xf32>
    %62 = arith.addf %61, %60 : vector<256x32xf32>
    %63 = arith.mulf %52, %62 : vector<256x32xf32>
    %64 = arith.truncf %63 : vector<256x32xf32> to vector<256x32xbf16>
    %c0_20 = arith.constant 0 : index
    %c0_21 = arith.constant 0 : index
    %65 = vector.load %arg4[%c0_20, %c0_21] : memref<32x16xbf16, #tpu.memory_space<vmem>>, vector<32x16xbf16>
    %cst_22 = arith.constant dense<0.000000e+00> : vector<256x16xf32>
    %66 = tpu.matmul %64, %65, %cst_22 {dimension_numbers = #tpu.dot_dimension_numbers<[1], [0], [0], [1], [0, 0, 1, 1], [], []>} : vector<256x32xbf16>, vector<32x16xbf16>, vector<256x16xf32> -> vector<256x16xf32>
    %c0_23 = arith.constant 0 : index
    %c0_24 = arith.constant 0 : index
    %67 = vector.load %arg5[%c0_23, %c0_24] : memref<1x16xf32, #tpu.memory_space<vmem>>, vector<1x16xf32>
    %68 = vector.broadcast %67 : vector<1x16xf32> to vector<256x16xf32>
    %69 = arith.addf %66, %68 : vector<256x16xf32>
    %70 = vector.shape_cast %1 : vector<16x16x16xf32> to vector<256x16xf32>
    %71 = arith.addf %69, %70 : vector<256x16xf32>
    %72 = tpu.transpose %71, [1, 0] : vector<256x16xf32> -> vector<16x256xf32>
    %73 = vector.shape_cast %72 : vector<16x256xf32> to vector<1x16x256xf32>
    %c0_25 = arith.constant 0 : index
    %c0_26 = arith.constant 0 : index
    %c0_27 = arith.constant 0 : index
    %74 = vector.load %arg6[%c0_25, %c0_26, %c0_27] : memref<1x16x256xf32, #tpu.memory_space<vmem>>, vector<1x16x256xf32>
    tpu.vector_store %arg6[%c0_25, %c0_26, %c0_27], %73 {strides = array<i32>} : memref<1x16x256xf32, #tpu.memory_space<vmem>>, vector<1x16x256xf32>,
    return
  }
  func.func @transform_0(%arg0: i32) -> (i32, i32, i32, i32) {
    %c0_i32 = arith.constant 0 : i32
    %c0_i32_0 = arith.constant 0 : i32
    %c0_i32_1 = arith.constant 0 : i32
    %c0_i32_2 = arith.constant 0 : i32
    return %arg0, %c0_i32, %c0_i32_0, %c0_i32_1 : i32, i32, i32, i32
  }
  func.func @transform_1(%arg0: i32) -> (i32, i32) {
    %c0_i32 = arith.constant 0 : i32
    %c0_i32_0 = arith.constant 0 : i32
    %c0_i32_1 = arith.constant 0 : i32
    return %c0_i32, %c0_i32_0 : i32, i32
  }
  func.func @transform_2(%arg0: i32) -> (i32, i32) {
    %c0_i32 = arith.constant 0 : i32
    %c0_i32_0 = arith.constant 0 : i32
    %c0_i32_1 = arith.constant 0 : i32
    return %c0_i32, %c0_i32_0 : i32, i32
  }
  func.func @transform_3(%arg0: i32) -> (i32, i32) {
    %c0_i32 = arith.constant 0 : i32
    %c0_i32_0 = arith.constant 0 : i32
    %c0_i32_1 = arith.constant 0 : i32
    return %c0_i32, %c0_i32_0 : i32, i32
  }
  func.func @transform_4(%arg0: i32) -> (i32, i32) {
    %c0_i32 = arith.constant 0 : i32
    %c0_i32_0 = arith.constant 0 : i32
    %c0_i32_1 = arith.constant 0 : i32
    return %c0_i32, %c0_i32_0 : i32, i32
  }
  func.func @transform_5(%arg0: i32) -> (i32, i32, i32) {
    %c0_i32 = arith.constant 0 : i32
    %c0_i32_0 = arith.constant 0 : i32
    %c0_i32_1 = arith.constant 0 : i32
    return %arg0, %c0_i32, %c0_i32_0 : i32, i32, i32
  }
}

</mosaic_0001>

<bundles_post_ra>
// kernel: tpu_custom_call.1
= control target key start
LH: loop header
LB: loop body
LE: loop exit
PB: predicated region body
PF: predicated region fallthrough
CT: control target
= control target key end

     0   :  { %10 = vsyncpa [#allocation4], 0  ;;  %s9216_s0 = inlined_call_operand.hbm [shape: f32[2,16,16,16], index: 0, kind: input, shape index: {}]   ;;  %s9217_s1 = inlined_call_operand.vmem [shape: bf16[288,32], index: 1, kind: input, shape index: {}]   ;;  %s9218_s2 = inlined_call_operand.vmem [shape: f32[1,32], index: 2, kind: input, shape index: {}]   ;;  %s9219_s3 = inlined_call_operand.vmem [shape: bf16[32,16], index: 3, kind: input, shape index: {}]   ;;  %s9220_s4 = inlined_call_operand.vmem [shape: f32[1,16], index: 4, kind: input, shape index: {}]   ;;  %s9221_s5 = inlined_call_operand.hbm [shape: f32[2,16,256], index: 5, kind: output, shape index: {}]  }
   0x1   :  { %12 = vsyncpa [#allocation4 + $0x1], 0 }
   0x2   :  { %13 = vsyncpa [#allocation5], 0 }
   0x3   :  { %15 = vsyncpa [#allocation5 + $0x1], 0  ;;  %s5641_s18 = smov 0   ;;  %s5643_s19 = smov 0  }
   0x4   :  { %s5645_s20 = smov 0   ;;  %s5647_s21 = smov 0  }
   0x5 LB: > { %s5662_s22 = sadd.s32 4294967295, %s5598_s21   ;;  %s3950_s23 = sadd.s32 4294967294, %s5598_s21   ;;  %s5598_s21 = sphi %s5647_s21, %s9962_s21   ;;  %s5594_s20 = sphi %s5645_s20, %s9961_s20   ;;  %s5590_s19 = sphi %s5643_s19, %s9960_s19   ;;  %s5586_s18 = sphi %s5641_s18, %s9959_s18  }
   0x6   : > { %s5666_s24 = sadd.s32 1, %s5598_s21   ;;  %s28_s25 = sadd.s32 1, %s5594_s20 }
   0x7   : > { %s25_s26 = ssub.s32 %s5598_s21, %s5666_s24  ;;  %p35_p0 = scmp.ne.s32.totalorder %s5594_s20, %s5590_s19 }
   0x8   : > { %p26_p1 = scmp.eq.s32.totalorder %s25_s26, 0  ;;  %p36_p2 = scmp.eq.s32.totalorder %s5598_s21, 0 }
   0x9   : > { %p41_p3 = scmp.ne.s32.totalorder %s5590_s19, %s5586_s18  ;;  %p42_p4 = scmp.eq.s32.totalorder %s5662_s22, 0 }
   0xa   : > { %s5678_s27 = scalar_select %p26_p1, %s5594_s20, %s28_s25  }
   0xb   : > { %p5680_p5 = por %p36_p2, %p35_p0  ;;  %p5684_p6 = por %p42_p4, %p41_p3 }
   0xc   : > { %p149_p7 = scmp.eq.s32.totalorder %s5662_s22, 1  ;;  %p155_p8 = scmp.eq.s32.totalorder %s3950_s23, 1 }
   0xd   : > { %p4110_p10 = scmp.lt.s32.totalorder %s5598_s21, 2  ;;  %s187_s7 = sand.u32 1, %s5594_s20  }
   0xe   : > { %p5691_p11 = por %p149_p7, %p35_p0  ;;  %p5695_p12 = por %p155_p8, %p41_p3 }
   0xf   : > { %s4076_s8 = sshll.u32 %s5598_s21, 8  ;;  %s3953_s9 = sshll.u32 %s187_s7, 8 }
  0x10   : > { %s196_s12 = scalar_lea.hbm %s9216_s0, %s4076_s8  ;;  %s191_s14 = scalar_lea.vmem [#allocation3], %s3953_s9 }
  0x11   : > { %s197_s13 = sshll.u32 %s196_s12, 4  ;;  %s199_s15 = sshll.u32 %s191_s14, 4  ;;  %s198_s13 = int_to_ptr.hbm [resolvable:$true] %s197_s13  ;;  %s200_s15 = int_to_ptr.vmem [resolvable:$true] %s199_s15 }
  0x12   : > { %p5706_p13 = pnand %p4110_p10, %p5680_p5  ;;  %p3956_p0 = scmp.ge.s32.totalorder %s5598_s21, 1 }
  0x13   : > { %p207_p1 = scmp.lt.s32.totalorder %s5598_s21, 3  ;;  %s188_s17 = scalar_lea.sflag [#allocation4], %s187_s7 }
  0x14   : > { %s5502_s23 = sshra.s32 %s198_s13, 4  ;;  %p5506_p3 = pneg %p5706_p13  ;;  %s5503_s23 = int_to_ptr.hbm [resolvable:$true] %s5502_s23 }
  0x15   : > { %s5504_s25 = scalar_lea.hbm %s5503_s23, 256  ;;  %s5509_s28 = scalar_lea.hbm %s9216_s0, 512 }
  0x16   : > { %p5505_p2 = scmp.ne.s32.totalorder %s5503_s23, %s5504_s25  ;;  %p5510_p5 = scmp.lt.s32.totalorder %s5503_s23, %s9216_s0 }
  0x17   : > { %p5511_p8 = scmp.lt.s32.totalorder %s5509_s28, %s5504_s25 }
  0x18   : > { %p5507_p4 = pnand %p5506_p3, %p5505_p2 }
  0x19   : > { %p5512_p10 = por %p5511_p8, %p5510_p5 }
  0x1a   : > { %p5508_p7 = pneg %p5507_p4 }
  0x1c   : > { %p5513_p9 = pnand %p5512_p10, %p5508_p7 }
  0x1e   : > { %5516 = shalt.err (!%p5513_p9)
}
  0x1f   : > { %s5600_s7 = smov 128   ;;  %s5601_s11 = smov 8  }
  0x20   : > { %4105 = dma.hbm_to_vmem [thread:$0]  (!%p5706_p13), %s198_s13, 4096, %s200_s15, %s188_s17, %s5600_s7, %s5600_s7, %s5601_s11  }
  0x21   : > { %p208_p2 = pnand %p3956_p0, %p207_p1 }
  0x23   : > { %211 = sbr.rel (%p208_p2) target bundleno = 1324 (0x52c), region = 40 }
  0x28   : > { %s5727_s12 = sand.u32 1, %s5590_s19  }
  0x29   : > { %s3957_s14 = sshll.u32 %s5727_s12, 8  ;;  %s214_s23 = scalar_lea.sflag [#allocation4], %s5727_s12 }
  0x2a   : > { %s5731_s25 = scalar_lea.vmem [#allocation3], %s3957_s14 }
  0x2b   : > { %5577 = dma.done.wait (%p5684_p6), %s214_s23, 4096  }
  0x2c   : > { %5579 = vsyncadd (%p5684_p6), %s214_s23, 4294963200  ;;  %vm278_vm0 = vcmask 130048   ;;  %v5602_v0 = vmov 0.0   ;;  %vm504_vm1 = vcmask 1043456   ;;  %s5603_s29 = smov 16   ;;  %v5917_v37 = vld [vmem:[%s5731_s25] sm:$0xff] }
  0x2d   : > { %285 = vst.msk [vmem:[#allocation2 + $0x30] sm:$0xff] %vm278_vm0, %v5602_v0  ;;  %v5922_v38 = vld [vmem:[%s5731_s25 + $0x8] sm:$0xff]  ;;  %v5927_v39 = vld [vmem:[%s5731_s25 + $0x10] sm:$0xff]  ;;  %v5932_v40 = vld [vmem:[%s5731_s25 + $0x18] sm:$0xff]  ;;  %s5604_s13 = smov 32   ;;  %s5605_s15 = smov 48  }
  0x2e   : > { %286 = vst.msk [vmem:[#allocation2 + $0x38] sm:$0xff] %vm278_vm0, %v5602_v0  ;;  %v5937_v41 = vld [vmem:[%s5731_s25 + $0x30] sm:$0xff]  ;;  %v5942_v42 = vld [vmem:[%s5731_s25 + $0x38] sm:$0xff]  ;;  %v5947_v43 = vld [vmem:[%s5731_s25 + $0x20] sm:$0xff]  ;;  %s5606_s16 = smov 64   ;;  %s5607_s17 = smov 80  }
  0x2f   : > { %287 = vst.msk [vmem:[#allocation2 + $0x40] sm:$0xff] %vm278_vm0, %v5602_v0  ;;  %v5952_v44 = vld [vmem:[%s5731_s25 + $0x28] sm:$0xff]  ;;  %v5957_v45 = vld [vmem:[%s5731_s25 + $0x40] sm:$0xff]  ;;  %v5988_v56 = vld [vmem:[%s5731_s25 + $0x50] sm:$0xff]  ;;  %s5608_s26 = smov 96   ;;  %s5609_s8 = smov 112  }
  0x30   : > { %279 = vst.msk [vmem:[#allocation2] sm:$0xff] %vm278_vm0, %v5602_v0  ;;  %v5962_v46 = vld [vmem:[%s5731_s25 + $0x48] sm:$0xff]  ;;  %v5969_v48 = vld [vmem:[%s5731_s25 + $0x60] sm:$0xff]  ;;  %v5998_v60 = vld [vmem:[%s5731_s25 + $0x58] sm:$0xff]  ;;  %vm649_vm2 = vcmask 1044480   ;;  %vm2239_vm3 = vcmask 261120  }
  0x31   : > { %280 = vst.msk [vmem:[#allocation2 + $0x8] sm:$0xff] %vm278_vm0, %v5602_v0  ;;  %v5979_v52 = vld [vmem:[%s5731_s25 + $0x68] sm:$0xff]  ;;  %vm2272_vm4 = vcmask 392192   ;;  %vm2305_vm5 = vcmask 523264   ;;  %vm2338_vm6 = vcmask 654336   ;;  %vm2371_vm7 = vcmask 785408  }
  0x32   : > { %281 = vst.msk [vmem:[#allocation2 + $0x10] sm:$0xff] %vm278_vm0, %v5602_v0  ;;  %vm2404_vm8 = vcmask 916480   ;;  %vm730_vm9 = vcmask 1042432   ;;  %s3958_s23 = sshll.u32 %s5727_s12, 5  ;;  %s5552_s11 = scalar_lea.hbm %s9221_s5, 64 }
  0x33   : > { %282 = vst.msk [vmem:[#allocation2 + $0x18] sm:$0xff] %vm278_vm0, %v5602_v0 }
  0x34   : > { %v390_v1 = vld [vmem:[#allocation2 + $0x30] sm:$0xff]  ;;  %283 = vst.msk [vmem:[#allocation2 + $0x20] sm:$0xff] %vm278_vm0, %v5602_v0 }
  0x35   : > { %v5753_v2 = vld [vmem:[#allocation2 + $0x38] sm:$0xff]  ;;  %v515_v3 = vrot.slane %v390_v1, 4  ;;  %284 = vst.msk [vmem:[#allocation2 + $0x28] sm:$0xff] %vm278_vm0, %v5602_v0 }
  0x36   : > { %v5757_v4 = vld [vmem:[#allocation2 + $0x40] sm:$0xff]  ;;  %v516_v5 = vrot.slane %v5753_v2, 4  ;;  %288 = vst.msk [vmem:[#allocation2 + $0x48] sm:$0xff] %vm278_vm0, %v5602_v0 }
  0x37   : > { %v518_v6 = vrot.slane %v5757_v4, 4  ;;  %289 = vst.msk [vmem:[#allocation2 + $0x50] sm:$0xff] %vm278_vm0, %v5602_v0  ;;  %v384_v7 = vld [vmem:[#allocation2] sm:$0xff] }
  0x38   : > { %v517_v8 = vsel %vm504_vm1, %v515_v3, %v516_v5  ;;  %290 = vst.msk [vmem:[#allocation2 + $0x58] sm:$0xff] %vm278_vm0, %v5602_v0  ;;  %v5768_v9 = vld [vmem:[#allocation2 + $0x8] sm:$0xff]  ;;  %v505_v10 = vrot.slane %v384_v7, 4  ;;  %v6009_v3 = vld [vmem:[%s5731_s25 + $0x70] sm:$0xff] }
  0x39   : > { %v519_v11 = vsel %vm504_vm1, %v516_v5, %v518_v6  ;;  %291 = vst.msk [vmem:[#allocation2 + $0x60] sm:$0xff] %vm278_vm0, %v5602_v0  ;;  %v5773_v12 = vld [vmem:[#allocation2 + $0x10] sm:$0xff]  ;;  %v506_v13 = vrot.slane %v5768_v9, 4 }
  0x3a   : > { %v4165_v14 = vpack.i.bf16 %v519_v11, %v517_v8  ;;  %292 = vst.msk [vmem:[#allocation2 + $0x68] sm:$0xff] %vm278_vm0, %v5602_v0  ;;  %v508_v15 = vrot.slane %v5773_v12, 4  ;;  %v387_v25 = vld [vmem:[#allocation2 + $0x18] sm:$0xff] }
  0x3b   : > { %293 = vst.msk [vmem:[#allocation2 + $0x70] sm:$0xff] %vm278_vm0, %v5602_v0  ;;  %v507_v16 = vsel %vm504_vm1, %v505_v10, %v506_v13  ;;  %v5863_v26 = vld [vmem:[#allocation2 + $0x20] sm:$0xff]  ;;  %v510_v28 = vrot.slane %v387_v25, 4  ;;  %v6021_v10 = vld [vmem:[%s5731_s25 + $0x78] sm:$0xff] }
  0x3c   : > { %4166 = vrot.lane.b32.xlu1 %v4165_v14, %s5603_s29  ;;  %294 = vst.msk [vmem:[#allocation2 + $0x78] sm:$0xff] %vm278_vm0, %v5602_v0  ;;  %v509_v17 = vsel %vm504_vm1, %v506_v13, %v508_v15  ;;  %v5867_v27 = vld [vmem:[#allocation2 + $0x28] sm:$0xff]  ;;  %v511_v29 = vrot.slane %v5863_v26, 4  ;;  %v6030_v15 = vld [vmem:[%s5731_s25 + $0x90] sm:$0xff] }
  0x3d   : > { %295 = vst.msk [vmem:[#allocation2 + $0x80] sm:$0xff] %vm278_vm0, %v5602_v0  ;;  %v4155_v18 = vpack.i.bf16 %v509_v17, %v507_v16  ;;  %v393_v19 = vld [vmem:[#allocation2 + $0x48] sm:$0xff]  ;;  %v513_v32 = vrot.slane %v5867_v27, 4 }
  0x3e   : > { %296 = vst.msk [vmem:[#allocation2 + $0x88] sm:$0xff] %vm278_vm0, %v5602_v0  ;;  %v5855_v20 = vld [vmem:[#allocation2 + $0x50] sm:$0xff]  ;;  %v520_v22 = vrot.slane %v393_v19, 4  ;;  %v512_v34 = vsel %vm504_vm1, %v510_v28, %v511_v29 }
  0x3f   : > { %297 = vst.msk [vmem:[#allocation2 + $0x90] sm:$0xff] %vm278_vm0, %v5602_v0  ;;  %4156 = vrot.lane.b32.xlu0 %v4155_v18, %s5603_s29  ;;  %v5857_v21 = vld [vmem:[#allocation2 + $0x58] sm:$0xff]  ;;  %v521_v23 = vrot.slane %v5855_v20, 4  ;;  %v514_v35 = vsel %vm504_vm1, %v511_v29, %v513_v32 }
  0x40   : > { %298 = vst.msk [vmem:[#allocation2 + $0x98] sm:$0xff] %vm278_vm0, %v5602_v0  ;;  %v523_v24 = vrot.slane %v5857_v21, 4  ;;  %v4160_v36 = vpack.i.bf16 %v514_v35, %v512_v34 }
  0x41   : > { %299 = vst.msk [vmem:[#allocation2 + $0xa0] sm:$0xff] %vm278_vm0, %v5602_v0  ;;  %v522_v30 = vsel %vm504_vm1, %v520_v22, %v521_v23 }
  0x42   : > { %300 = vst.msk [vmem:[#allocation2 + $0xa8] sm:$0xff] %vm278_vm0, %v5602_v0  ;;  %v524_v31 = vsel %vm504_vm1, %v521_v23, %v523_v24  ;;  %v6048_v23 = vld [vmem:[%s5731_s25 + $0x98] sm:$0xff] }
  0x43   : > { %301 = vst.msk [vmem:[#allocation2 + $0xb0] sm:$0xff] %vm278_vm0, %v5602_v0  ;;  %v5877_v33 = vpack.i.bf16 %v524_v31, %v522_v30  ;;  %v6063_v31 = vld [vmem:[%s5731_s25 + $0x80] sm:$0xff] }
  0x44   : > { %302 = vst.msk [vmem:[#allocation2 + $0xb8] sm:$0xff] %vm278_vm0, %v5602_v0 }
  0x45   : > { %303 = vst.msk [vmem:[#allocation2 + $0xc0] sm:$0xff] %vm278_vm0, %v5602_v0  ;;  %4171 = vrot.lane.b32.xlu1 %v5877_v33, %s5603_s29 }
  0x46   : > { %304 = vst.msk [vmem:[#allocation2 + $0xc8] sm:$0xff] %vm278_vm0, %v5602_v0 }
  0x47   : > { %305 = vst.msk [vmem:[#allocation2 + $0xd0] sm:$0xff] %vm278_vm0, %v5602_v0  ;;  %4161 = vrot.lane.b32.xlu0 %v4160_v36, %s5603_s29  ;;  %v6076_v36 = vld [vmem:[%s5731_s25 + $0x88] sm:$0xff] }
  0x48   : > { %306 = vst.msk [vmem:[#allocation2 + $0xd8] sm:$0xff] %vm278_vm0, %v5602_v0 }
  0x49   : > { %307 = vst.msk [vmem:[#allocation2 + $0xe0] sm:$0xff] %vm278_vm0, %v5602_v0 }
  0x4a   : > { %308 = vst.msk [vmem:[#allocation2 + $0xe8] sm:$0xff] %vm278_vm0, %v5602_v0 }
  0x4b   : > { %309 = vst.msk [vmem:[#allocation2 + $0xf0] sm:$0xff] %vm278_vm0, %v5602_v0 }
  0x4c   : > { %310 = vst.msk [vmem:[#allocation2 + $0xf8] sm:$0xff] %vm278_vm0, %v5602_v0 }
  0x4d   : > { %311 = vst.msk [vmem:[#allocation2 + $0x100] sm:$0xff] %vm278_vm0, %v5602_v0 }
  0x4e   : > { %312 = vst.msk [vmem:[#allocation2 + $0x108] sm:$0xff] %vm278_vm0, %v5602_v0 }
  0x4f   : > { %313 = vst.msk [vmem:[#allocation2 + $0x110] sm:$0xff] %vm278_vm0, %v5602_v0 }
  0x50   : > { %314 = vst.msk [vmem:[#allocation2 + $0x118] sm:$0xff] %vm278_vm0, %v5602_v0 }
  0x51   : > { %315 = vst.msk [vmem:[#allocation2 + $0x120] sm:$0xff] %vm278_vm0, %v5602_v0 }
  0x52   : > { %316 = vst.msk [vmem:[#allocation2 + $0x128] sm:$0xff] %vm278_vm0, %v5602_v0 }
  0x53   : > { %317 = vst.msk [vmem:[#allocation2 + $0x130] sm:$0xff] %vm278_vm0, %v5602_v0 }
  0x54   : > { %318 = vst.msk [vmem:[#allocation2 + $0x138] sm:$0xff] %vm278_vm0, %v5602_v0 }
  0x55   : > { %319 = vst.msk [vmem:[#allocation2 + $0x140] sm:$0xff] %vm278_vm0, %v5602_v0 }
  0x56   : > { %320 = vst.msk [vmem:[#allocation2 + $0x148] sm:$0xff] %vm278_vm0, %v5602_v0 }
  0x57   : > { %321 = vst.msk [vmem:[#allocation2 + $0x150] sm:$0xff] %vm278_vm0, %v5602_v0 }
  0x58   : > { %322 = vst.msk [vmem:[#allocation2 + $0x158] sm:$0xff] %vm278_vm0, %v5602_v0 }
  0x59   : > { %323 = vst.msk [vmem:[#allocation2 + $0x160] sm:$0xff] %vm278_vm0, %v5602_v0 }
  0x5a   : > { %324 = vst.msk [vmem:[#allocation2 + $0x168] sm:$0xff] %vm278_vm0, %v5602_v0 }
  0x5b   : > { %325 = vst.msk [vmem:[#allocation2 + $0x170] sm:$0xff] %vm278_vm0, %v5602_v0 }
  0x5c   : > { %326 = vst.msk [vmem:[#allocation2 + $0x178] sm:$0xff] %vm278_vm0, %v5602_v0 }
  0x5d   : > { %327 = vst.msk [vmem:[#allocation2 + $0x180] sm:$0xff] %vm278_vm0, %v5602_v0 }
  0x5e   : > { %328 = vst.msk [vmem:[#allocation2 + $0x188] sm:$0xff] %vm278_vm0, %v5602_v0 }
  0x5f   : > { %329 = vst.msk [vmem:[#allocation2 + $0x190] sm:$0xff] %vm278_vm0, %v5602_v0 }
  0x60   : > { %330 = vst.msk [vmem:[#allocation2 + $0x198] sm:$0xff] %vm278_vm0, %v5602_v0 }
  0x61   : > { %331 = vst.msk [vmem:[#allocation2 + $0x1a0] sm:$0xff] %vm278_vm0, %v5602_v0 }
  0x62   : > { %332 = vst.msk [vmem:[#allocation2 + $0x1a8] sm:$0xff] %vm278_vm0, %v5602_v0 }
  0x63   : > { %9471 = vst [vmem:[#allocation9_spill] sm:$0xff] %v5877_v33 }
  0x64   : > { %333 = vst.msk [vmem:[#allocation2 + $0x1b0] sm:$0xff] %vm278_vm0, %v5602_v0 }
  0x65   : > { %334 = vst.msk [vmem:[#allocation2 + $0x1b8] sm:$0xff] %vm278_vm0, %v5602_v0 }
  0x66   : > { %335 = vst.msk [vmem:[#allocation2 + $0x1c0] sm:$0xff] %vm278_vm0, %v5602_v0 }
  0x67   : > { %336 = vst.msk [vmem:[#allocation2 + $0x1c8] sm:$0xff] %vm278_vm0, %v5602_v0 }
  0x68   : > { %337 = vst.msk [vmem:[#allocation2 + $0x1d0] sm:$0xff] %vm278_vm0, %v5602_v0 }
  0x69   : > { %338 = vst.msk [vmem:[#allocation2 + $0x1d8] sm:$0xff] %vm278_vm0, %v5602_v0 }
  0x6a   : > { %339 = vst.msk [vmem:[#allocation2 + $0x1e0] sm:$0xff] %vm278_vm0, %v5602_v0 }
  0x6b   : > { %340 = vst.msk [vmem:[#allocation2 + $0x1e8] sm:$0xff] %vm278_vm0, %v5602_v0 }
  0x6c   : > { %341 = vst.msk [vmem:[#allocation2 + $0x1f0] sm:$0xff] %vm278_vm0, %v5602_v0 }
  0x6d   : > { %342 = vst.msk [vmem:[#allocation2 + $0x1f8] sm:$0xff] %vm278_vm0, %v5602_v0 }
  0x6e   : > { %343 = vst.msk [vmem:[#allocation2 + $0x200] sm:$0xff] %vm278_vm0, %v5602_v0 }
  0x6f   : > { %344 = vst.msk [vmem:[#allocation2 + $0x208] sm:$0xff] %vm278_vm0, %v5602_v0 }
  0x70   : > { %345 = vst.msk [vmem:[#allocation2 + $0x210] sm:$0xff] %vm278_vm0, %v5602_v0 }
  0x71   : > { %346 = vst.msk [vmem:[#allocation2 + $0x218] sm:$0xff] %vm278_vm0, %v5602_v0 }
  0x72   : > { %347 = vst.msk [vmem:[#allocation2 + $0x220] sm:$0xff] %vm278_vm0, %v5602_v0 }
  0x73   : > { %348 = vst.msk [vmem:[#allocation2 + $0x228] sm:$0xff] %vm278_vm0, %v5602_v0 }
  0x74   : > { %9472 = vst [vmem:[#allocation10_spill] sm:$0xff] %v5917_v37 }
  0x75   : > { %349 = vst.msk [vmem:[#allocation2 + $0x230] sm:$0xff] %vm278_vm0, %v5602_v0 }
  0x76   : > { %9473 = vst [vmem:[#allocation11_spill] sm:$0xff] %v5922_v38 }
  0x77   : > { %350 = vst.msk [vmem:[#allocation2 + $0x238] sm:$0xff] %vm278_vm0, %v5602_v0 }
  0x78   : > { %9474 = vst [vmem:[#allocation12_spill] sm:$0xff] %v5927_v39 }
  0x79   : > { %352 = vst.msk [vmem:[#allocation2 + $0x64] sm:$0xff] %vm278_vm0, %v5917_v37 }
  0x7a   : > { %9475 = vst [vmem:[#allocation13_spill] sm:$0xff] %v5932_v40 }
  0x7b   : > { %353 = vst.msk [vmem:[#allocation2 + $0x6c] sm:$0xff] %vm278_vm0, %v5922_v38 }
  0x7c   : > { %9476 = vst [vmem:[#allocation14_spill] sm:$0xff] %v5937_v41 }
  0x7d   : > { %354 = vst.msk [vmem:[#allocation2 + $0x7c] sm:$0xff] %vm278_vm0, %v5927_v39 }
  0x7e   : > { %9477 = vst [vmem:[#allocation15_spill] sm:$0xff] %v5942_v42 }
  0x7f   : > { %355 = vst.msk [vmem:[#allocation2 + $0x84] sm:$0xff] %vm278_vm0, %v5932_v40 }
  0x80   : > { %9478 = vst [vmem:[#allocation16_spill] sm:$0xff] %v5947_v43  ;;  %v5964_v47 = vld [vmem:[#allocation2 + $0x60] sm:$0xff] }
  0x81   : > { %358 = vst.msk [vmem:[#allocation2 + $0xac] sm:$0xff] %vm278_vm0, %v5937_v41  ;;  %v525_v51 = vrot.slane %v5964_v47, 4 }
  0x82   : > { %9479 = vst [vmem:[#allocation17_spill] sm:$0xff] %v5952_v44  ;;  %v5971_v49 = vld [vmem:[#allocation2 + $0x68] sm:$0xff]  ;;  %v5973_v50 = vld [vmem:[#allocation2 + $0x70] sm:$0xff] }
  0x83   : > { %359 = vst.msk [vmem:[#allocation2 + $0xb4] sm:$0xff] %vm278_vm0, %v5942_v42  ;;  %v526_v53 = vrot.slane %v5971_v49, 4  ;;  %v528_v54 = vrot.slane %v5973_v50, 4 }
  0x84   : > { %9480 = vst [vmem:[#allocation18_spill] sm:$0xff] %v5957_v45  ;;  %v5983_v55 = vld [vmem:[#allocation2 + $0x78] sm:$0xff] }
  0x85   : > { %356 = vst.msk [vmem:[#allocation2 + $0x94] sm:$0xff] %vm278_vm0, %v5947_v43  ;;  %v530_v59 = vrot.slane %v5983_v55, 4  ;;  %v527_v61 = vsel %vm504_vm1, %v525_v51, %v526_v53  ;;  %v529_v62 = vsel %vm504_vm1, %v526_v53, %v528_v54 }
  0x86   : > { %9481 = vst [vmem:[#allocation19_spill] sm:$0xff] %v5962_v46  ;;  %v5990_v57 = vld [vmem:[#allocation2 + $0x80] sm:$0xff]  ;;  %v5992_v58 = vld [vmem:[#allocation2 + $0x88] sm:$0xff]  ;;  %v6011_v5 = vpack.i.bf16 %v529_v62, %v527_v61 }
  0x87   : > { %357 = vst.msk [vmem:[#allocation2 + $0x9c] sm:$0xff] %vm278_vm0, %v5952_v44  ;;  %v531_v63 = vrot.slane %v5990_v57, 4  ;;  %v533_v0 = vrot.slane %v5992_v58, 4  ;;  %v6094_v62 = vld [vmem:[%s5731_s25 + $0xa0] sm:$0xff] }
  0x88   : > { %9482 = vst [vmem:[#allocation20_spill] sm:$0xff] %v5969_v48  ;;  %v6004_v1 = vld [vmem:[#allocation2 + $0xa8] sm:$0xff]  ;;  %4176 = vrot.lane.b32.xlu2 %v6011_v5, %s5603_s29 }
  0x89   : > { %360 = vst.msk [vmem:[#allocation2 + $0xc4] sm:$0xff] %vm278_vm0, %v5957_v45  ;;  %v540_v8 = vrot.slane %v6004_v1, 4  ;;  %v6035_v16 = vsel %vm504_vm1, %v530_v59, %v531_v63  ;;  %v6038_v17 = vsel %vm504_vm1, %v531_v63, %v533_v0  ;;  %v6097_v63 = vld [vmem:[%s5731_s25 + $0xa8] sm:$0xff] }
  0x8a   : > { %9483 = vst [vmem:[#allocation21_spill] sm:$0xff] %v5979_v52  ;;  %v6013_v6 = vld [vmem:[#allocation2 + $0xb0] sm:$0xff]  ;;  %v6015_v7 = vld [vmem:[#allocation2 + $0xb8] sm:$0xff]  ;;  %v6080_v51 = vpack.i.bf16 %v6038_v17, %v6035_v16 }
  0x8b   : > { %361 = vst.msk [vmem:[#allocation2 + $0xcc] sm:$0xff] %vm278_vm0, %v5962_v46  ;;  %v541_v11 = vrot.slane %v6013_v6, 4  ;;  %v543_v13 = vrot.slane %v6015_v7, 4 }
  0x8c   : > { %9484 = vst [vmem:[#allocation22_spill] sm:$0xff] %v5988_v56  ;;  %v6025_v14 = vld [vmem:[#allocation2 + $0x90] sm:$0xff] }
  0x8d   : > { %364 = vst.msk [vmem:[#allocation2 + $0xf4] sm:$0xff] %vm278_vm0, %v5969_v48  ;;  %v535_v22 = vrot.slane %v6025_v14, 4  ;;  %v6051_v24 = vsel %vm504_vm1, %v540_v8, %v541_v11  ;;  %v6054_v25 = vsel %vm504_vm1, %v541_v11, %v543_v13  ;;  %v6133_v48 = vld [vmem:[%s5731_s25 + $0xb8] sm:$0xff] }
  0x8e   : > { %9485 = vst [vmem:[#allocation23_spill] sm:$0xff] %v5998_v60  ;;  %v6040_v18 = vld [vmem:[#allocation2 + $0x98] sm:$0xff]  ;;  %v6042_v19 = vld [vmem:[#allocation2 + $0xa0] sm:$0xff]  ;;  %v6067_v32 = vpack.i.bf16 %v6054_v25, %v6051_v24 }
  0x8f   : > { %365 = vst.msk [vmem:[#allocation2 + $0xfc] sm:$0xff] %vm278_vm0, %v5979_v52  ;;  %v536_v28 = vrot.slane %v6040_v18, 4  ;;  %v538_v29 = vrot.slane %v6042_v19, 4 }
  0x90   : > { %9486 = vst [vmem:[#allocation24_spill] sm:$0xff] %v6009_v3  ;;  %v6058_v30 = vld [vmem:[#allocation2 + $0xc0] sm:$0xff]  ;;  %4191 = vrot.lane.b32.xlu1 %v6067_v32, %s5603_s29  ;;  %4181 = vrot.lane.b32.xlu2 %v6080_v51, %s5603_s29 }
  0x91   : > { %9487 = vst [vmem:[#allocation25_spill] sm:$0xff] %v6011_v5  ;;  %v6083_v53 = vsel %vm504_vm1, %v535_v22, %v536_v28  ;;  %v6086_v54 = vsel %vm504_vm1, %v536_v28, %v538_v29  ;;  %v545_v59 = vrot.slane %v6058_v30, 4 }
  0x92   : > { %362 = vst.msk [vmem:[#allocation2 + $0xdc] sm:$0xff] %vm278_vm0, %v5988_v56  ;;  %v6069_v34 = vld [vmem:[#allocation2 + $0xc8] sm:$0xff]  ;;  %v6071_v35 = vld [vmem:[#allocation2 + $0xd0] sm:$0xff]  ;;  %v6103_v0 = vpack.i.bf16 %v6086_v54, %v6083_v53 }
  0x93   : > { %9488 = vst [vmem:[#allocation26_spill] sm:$0xff] %v6021_v10  ;;  %v546_v8 = vrot.slane %v6069_v34, 4  ;;  %v548_v11 = vrot.slane %v6071_v35, 4 }
  0x94   : > { %363 = vst.msk [vmem:[#allocation2 + $0xe4] sm:$0xff] %vm278_vm0, %v5998_v60  ;;  %v6089_v61 = vld [vmem:[#allocation2 + $0xf0] sm:$0xff]  ;;  %4186 = vrot.lane.b32.xlu0 %v6103_v0, %s5603_s29 }
  0x95   : > { %9489 = vst [vmem:[#allocation27_spill] sm:$0xff] %v6030_v15  ;;  %v555_v28 = vrot.slane %v6089_v61, 4  ;;  %v6151_v45 = vsel %vm504_vm1, %v546_v8, %v548_v11 }
  0x96   : > { %9490 = vst [vmem:[#allocation28_spill] sm:$0xff] %v6035_v16  ;;  %v6107_v13 = vld [vmem:[#allocation2 + $0xf8] sm:$0xff]  ;;  %v6109_v22 = vld [vmem:[#allocation2 + $0x100] sm:$0xff] }
  0x97   : > { %9491 = vst [vmem:[#allocation29_spill] sm:$0xff] %v6038_v17  ;;  %v556_v29 = vrot.slane %v6107_v13, 4 }
  0x98   : > { %366 = vst.msk [vmem:[#allocation2 + $0x10c] sm:$0xff] %vm278_vm0, %v6009_v3 }
  0x99   : > { %9492 = vst [vmem:[#allocation30_spill] sm:$0xff] %v6048_v23  ;;  %v6136_v60 = vsel %vm504_vm1, %v555_v28, %v556_v29 }
  0x9a   : > { %9493 = vst [vmem:[#allocation31_spill] sm:$0xff] %v6051_v24 }
  0x9b   : > { %9494 = vst [vmem:[#allocation32_spill] sm:$0xff] %v6054_v25  ;;  %v6125_v3 = vld [vmem:[#allocation2 + $0xe0] sm:$0xff]  ;;  %v6127_v52 = vld [vmem:[#allocation2 + $0xe8] sm:$0xff] }
  0x9c   : > { %9495 = vst [vmem:[#allocation33_spill] sm:$0xff] %v6058_v30  ;;  %v551_v56 = vrot.slane %v6125_v3, 4  ;;  %v553_v46 = vrot.slane %v6127_v52, 4 }
  0x9d   : > { %367 = vst.msk [vmem:[#allocation2 + $0x114] sm:$0xff] %vm278_vm0, %v6021_v10  ;;  %v6121_v10 = vld [vmem:[%s5731_s25 + $0xb0] sm:$0xff] }
  0x9e   : > { %9496 = vst [vmem:[#allocation34_spill] sm:$0xff] %v6063_v31 }
  0x9f   : > { %9497 = vst [vmem:[#allocation35_spill] sm:$0xff] %v6067_v32  ;;  %v6157_v28 = vld [vmem:[#allocation2 + $0x108] sm:$0xff] }
  0xa0   : > { %9498 = vst [vmem:[#allocation36_spill] sm:$0xff] %v6069_v34 }
  0xa1   : > { %9499 = vst [vmem:[#allocation37_spill] sm:$0xff] %v6071_v35 }
  0xa2   : > { %370 = vst.msk [vmem:[#allocation2 + $0x13c] sm:$0xff] %vm278_vm0, %v6030_v15  ;;  %v6116_v15 = vld [vmem:[#allocation2 + $0xd8] sm:$0xff] }
  0xa3   : > { %9500 = vst [vmem:[#allocation38_spill] sm:$0xff] %v6076_v36 }
  0xa4   : > { %9501 = vst [vmem:[#allocation39_spill] sm:$0xff] %v6080_v51  ;;  %v6169_v42 = vld [vmem:[#allocation2 + $0x118] sm:$0xff] }
  0xa5   : > { %9502 = vst [vmem:[#allocation40_spill] sm:$0xff] %v6083_v53  ;;  %v563_v39 = vrot.slane %v6169_v42, 4 }
  0xa6   : > { %9503 = vst [vmem:[#allocation41_spill] sm:$0xff] %v6086_v54 }
  0xa7   : > { %9504 = vst [vmem:[#allocation42_spill] sm:$0xff] %v6089_v61 }
  0xa8   : > { %371 = vst.msk [vmem:[#allocation2 + $0x144] sm:$0xff] %vm278_vm0, %v6048_v23  ;;  %v558_v23 = vrot.slane %v6109_v22, 4 }
  0xa9   : > { %9505 = vst [vmem:[#allocation43_spill] sm:$0xff] %v6094_v62 }
  0xaa   : > { %9506 = vst [vmem:[#allocation44_spill] sm:$0xff] %v6097_v63 }
  0xab   : > { %9507 = vst [vmem:[#allocation45_spill] sm:$0xff] %v6103_v0 }
  0xac   : > { %9508 = vst [vmem:[#allocation46_spill] sm:$0xff] %v6107_v13 }
  0xad   : > { %9509 = vst [vmem:[#allocation47_spill] sm:$0xff] %v6109_v22 }
  0xae   : > { %368 = vst.msk [vmem:[#allocation2 + $0x124] sm:$0xff] %vm278_vm0, %v6063_v31  ;;  %v550_v31 = vrot.slane %v6116_v15, 4 }
  0xaf   : > { %9510 = vst [vmem:[#allocation48_spill] sm:$0xff] %v6116_v15 }
  0xb0   : > { %369 = vst.msk [vmem:[#allocation2 + $0x12c] sm:$0xff] %vm278_vm0, %v6076_v36  ;;  %v6139_v36 = vsel %vm504_vm1, %v556_v29, %v558_v23  ;;  %v6162_v29 = vsel %vm504_vm1, %v550_v31, %v551_v56  ;;  %v6181_v31 = vld [vmem:[#allocation2 + $0x148] sm:$0xff] }
  0xb1   : > { %9511 = vst [vmem:[#allocation49_spill] sm:$0xff] %v6121_v10  ;;  %v6155_v23 = vpack.i.bf16 %v6139_v36, %v6136_v60  ;;  %v573_v44 = vrot.slane %v6181_v31, 4 }
  0xb2   : > { %9512 = vst [vmem:[#allocation50_spill] sm:$0xff] %v6125_v3 }
  0xb3   : > { %9513 = vst [vmem:[#allocation51_spill] sm:$0xff] %v6127_v52  ;;  %4206 = vrot.lane.b32.xlu1 %v6155_v23, %s5603_s29 }
  0xb4   : > { %372 = vst.msk [vmem:[#allocation2 + $0x154] sm:$0xff] %vm278_vm0, %v6094_v62  ;;  %v6148_v62 = vsel %vm504_vm1, %v545_v59, %v546_v8  ;;  %v6167_v59 = vld [vmem:[#allocation2 + $0x110] sm:$0xff]  ;;  %v6171_v8 = vld [vmem:[#allocation2 + $0x138] sm:$0xff] }
  0xb5   : > { %9514 = vst [vmem:[#allocation52_spill] sm:$0xff] %v6133_v48  ;;  %v6190_v43 = vld [vmem:[#allocation2 + $0x120] sm:$0xff]  ;;  %v561_v40 = vrot.slane %v6167_v59, 4 }
  0xb6   : > { %9515 = vst [vmem:[#allocation53_spill] sm:$0xff] %v6136_v60 }
  0xb7   : > { %9516 = vst [vmem:[#allocation54_spill] sm:$0xff] %v6139_v36  ;;  %v6197_v38 = vld [vmem:[#allocation2 + $0x128] sm:$0xff]  ;;  %v6199_v37 = vld [vmem:[#allocation2 + $0x130] sm:$0xff]  ;;  %v565_v36 = vrot.slane %v6190_v43, 4 }
  0xb8   : > { %373 = vst.msk [vmem:[#allocation2 + $0x15c] sm:$0xff] %vm278_vm0, %v6097_v63  ;;  %v6165_v63 = vsel %vm504_vm1, %v551_v56, %v553_v46  ;;  %v570_v46 = vrot.slane %v6171_v8, 4  ;;  %v6186_v56 = vpack.i.bf16 %v6151_v45, %v6148_v62 }
  0xb9   : > { %9517 = vst [vmem:[#allocation55_spill] sm:$0xff] %v6148_v62  ;;  %v6177_v11 = vpack.i.bf16 %v6165_v63, %v6162_v29 }
  0xba   : > { %9518 = vst [vmem:[#allocation56_spill] sm:$0xff] %v6151_v45  ;;  %v568_v45 = vrot.slane %v6199_v37, 4  ;;  %4196 = vrot.lane.b32.xlu2 %v6186_v56, %s5603_s29 }
  0xbb   : > { %9519 = vst [vmem:[#allocation57_spill] sm:$0xff] %v6155_v23  ;;  %4201 = vrot.lane.b32.xlu0 %v6177_v11, %s5603_s29 }
  0xbc   : > { %9520 = vst [vmem:[#allocation58_spill] sm:$0xff] %v6157_v28 }
  0xbd   : > { %374 = vst.msk [vmem:[#allocation2 + $0x16c] sm:$0xff] %vm278_vm0, %v6121_v10  ;;  %v6179_v10 = vld [vmem:[#allocation2 + $0x140] sm:$0xff] }
  0xbe   : > { %9521 = vst [vmem:[#allocation59_spill] sm:$0xff] %v6162_v29  ;;  %v571_v41 = vrot.slane %v6179_v10, 4  ;;  %v566_v29 = vrot.slane %v6197_v38, 4 }
  0xbf   : > { %9522 = vst [vmem:[#allocation60_spill] sm:$0xff] %v6165_v63 }
  0xc0   : > { %9523 = vst [vmem:[#allocation61_spill] sm:$0xff] %v6167_v59  ;;  %v6203_v60 = vsel %vm504_vm1, %v570_v46, %v571_v41  ;;  %v6206_v63 = vsel %vm504_vm1, %v571_v41, %v573_v44  ;;  %v6213_v62 = vsel %vm504_vm1, %v565_v36, %v566_v29  ;;  %v6216_v25 = vsel %vm504_vm1, %v566_v29, %v568_v45  ;;  %v6240_v29 = vld [vmem:[#allocation2 + $0x150] sm:$0xff] }
  0xc1   : > { %9524 = vst [vmem:[#allocation62_spill] sm:$0xff] %v6169_v42  ;;  %v6222_v41 = vpack.i.bf16 %v6206_v63, %v6203_v60  ;;  %v6234_v36 = vsel %vm504_vm1, %v561_v40, %v563_v39  ;;  %v6238_v45 = vpack.i.bf16 %v6216_v25, %v6213_v62 }
  0xc2   : > { %9525 = vst [vmem:[#allocation63_spill] sm:$0xff] %v6171_v8 }
  0xc3   : > { %375 = vst.msk [vmem:[#allocation2 + $0x174] sm:$0xff] %vm278_vm0, %v6133_v48  ;;  %v560_v48 = vrot.slane %v6157_v28, 4  ;;  %4221 = vrot.lane.b32.xlu1 %v6222_v41, %s5603_s29  ;;  %4216 = vrot.lane.b32.xlu0 %v6238_v45, %s5603_s29 }
  0xc4   : > { %9526 = vst [vmem:[#allocation64_spill] sm:$0xff] %v6177_v11  ;;  %v6224_v44 = vld [vmem:[#allocation2 + $0x168] sm:$0xff] }
  0xc5   : > { %9527 = vst [vmem:[#allocation65_spill] sm:$0xff] %v6179_v10  ;;  %v6231_v54 = vsel %vm504_vm1, %v560_v48, %v561_v40  ;;  %v580_v53 = vrot.slane %v6224_v44, 4  ;;  %v575_v40 = vrot.slane %v6240_v29, 4 }
  0xc6   : > { %9528 = vst [vmem:[#allocation66_spill] sm:$0xff] %v6181_v31  ;;  %v6251_v39 = vpack.i.bf16 %v6234_v36, %v6231_v54 }
  0xc7   : > { %9529 = vst [vmem:[#allocation67_spill] sm:$0xff] %v6186_v56 }
  0xc8   : > { %9530 = vst [vmem:[#allocation68_spill] sm:$0xff] %v6190_v43  ;;  %4211 = vrot.lane.b32.xlu2 %v6251_v39, %s5603_s29 }
  0xc9   : > { %9531 = vst [vmem:[#allocation69_spill] sm:$0xff] %v6197_v38 }
  0xca   : > { %9532 = vst [vmem:[#allocation70_spill] sm:$0xff] %v6199_v37  ;;  %v6226_v46 = vld [vmem:[#allocation2 + $0x170] sm:$0xff]  ;;  %v6228_v24 = vld [vmem:[#allocation2 + $0x178] sm:$0xff] }
  0xcb   : > { %9533 = vst [vmem:[#allocation71_spill] sm:$0xff] %v6203_v60  ;;  %v6244_v60 = vld [vmem:[#allocation2 + $0x160] sm:$0xff]  ;;  %v581_v17 = vrot.slane %v6226_v46, 4  ;;  %v583_v48 = vrot.slane %v6228_v24, 4 }
  0xcc   : > { %9534 = vst [vmem:[#allocation72_spill] sm:$0xff] %v6206_v63  ;;  %v6242_v63 = vld [vmem:[#allocation2 + $0x158] sm:$0xff] }
  0xcd   : > { %9535 = vst [vmem:[#allocation73_spill] sm:$0xff] %v6213_v62  ;;  %v578_v62 = vrot.slane %v6244_v60, 4  ;;  %v6261_v16 = vsel %vm504_vm1, %v580_v53, %v581_v17  ;;  %v6264_v33 = vsel %vm504_vm1, %v581_v17, %v583_v48  ;;  %v6300_v53 = vpack.i.bf16 %v6042_v19, %v6040_v18 }
  0xce   : > { %9536 = vst [vmem:[#allocation74_spill] sm:$0xff] %v6216_v25  ;;  %v576_v25 = vrot.slane %v6242_v63, 4  ;;  %v6358_v48 = vpack.i.bf16 %v6244_v60, %v6242_v63 }
  0xcf   : > { %9537 = vst [vmem:[#allocation75_spill] sm:$0xff] %v6222_v41 }
  0xd0   : > { %9538 = vst [vmem:[#allocation76_spill] sm:$0xff] %v6224_v44  ;;  %v6274_v41 = vsel %vm504_vm1, %v576_v25, %v578_v62  ;;  %v6304_v62 = vpack.i.bf16 %v5992_v58, %v5990_v57 }
  0xd1   : > { %9539 = vst [vmem:[#allocation77_spill] sm:$0xff] %v6226_v46 }
  0xd2   : > { %9540 = vst [vmem:[#allocation78_spill] sm:$0xff] %v6228_v24 }
  0xd3   : > { %9541 = vst [vmem:[#allocation79_spill] sm:$0xff] %v6231_v54  ;;  %v6271_v54 = vsel %vm504_vm1, %v575_v40, %v576_v25  ;;  %v4240_v25 = vpack.i.bf16 %v5867_v27, %v5863_v26  ;;  %v6336_v26 = vpack.i.bf16 %v6199_v37, %v6197_v38  ;;  %v6340_v27 = vpack.i.bf16 %v6169_v42, %v6167_v59 }
  0xd4   : > { %9542 = vst [vmem:[#allocation80_spill] sm:$0xff] %v6234_v36  ;;  %v4235_v36 = vpack.i.bf16 %v5773_v12, %v5768_v9  ;;  %v6282_v17 = vpack.i.bf16 %v6274_v41, %v6271_v54  ;;  %v4250_v9 = vpack.i.bf16 %v5857_v21, %v5855_v20  ;;  %v4245_v12 = vpack.i.bf16 %v5757_v4, %v5753_v2 }
  0xd5   : > { %9543 = vst [vmem:[#allocation81_spill] sm:$0xff] %v6238_v45  ;;  %v6278_v45 = vpack.i.bf16 %v6264_v33, %v6261_v16  ;;  %v6308_v2 = vpack.i.bf16 %v5973_v50, %v5971_v49  ;;  %v6318_v4 = vpack.i.bf16 %v6127_v52, %v6125_v3  ;;  %v6322_v20 = vpack.i.bf16 %v6071_v35, %v6069_v34 }
  0xd6   : > { %9544 = vst [vmem:[#allocation82_spill] sm:$0xff] %v6240_v29  ;;  %4236 = vrot.lane.b32.xlu1 %v4235_v36, %s5604_s13  ;;  %4226 = vrot.lane.b32.xlu2 %v6282_v17, %s5603_s29  ;;  %v6326_v21 = vpack.i.bf16 %v6015_v7, %v6013_v6  ;;  %v6344_v7 = vpack.i.bf16 %v6109_v22, %v6107_v13 }
  0xd7   : > { %9545 = vst [vmem:[#allocation83_spill] sm:$0xff] %v6242_v63  ;;  %4231 = vrot.lane.b32.xlu0 %v6278_v45, %s5603_s29  ;;  %v6354_v36 = vpack.i.bf16 %v6228_v24, %v6226_v46  ;;  %v6362_v40 = vpack.i.bf16 %v6181_v31, %v6179_v10  ;;  %v6411_v31 = vld [vmem:[%s5731_s25 + $0xf8] sm:$0xff] }
  0xd8   : > { %9546 = vst [vmem:[#allocation84_spill] sm:$0xff] %v6244_v60  ;;  %v6472_v60 = vpop.permute.xlu0 %4156 }
  0xd9   : > { %9547 = vst [vmem:[#allocation85_spill] sm:$0xff] %v6251_v39 }
  0xda   : > { %9548 = vst [vmem:[#allocation86_spill] sm:$0xff] %v6261_v16  ;;  %v6385_v16 = vld [vmem:[%s5731_s25 + $0xd0] sm:$0xff] }
  0xdb   : > { %9549 = vst [vmem:[#allocation87_spill] sm:$0xff] %v6264_v33  ;;  %v6380_v33 = vld [vmem:[%s5731_s25 + $0xe8] sm:$0xff] }
  0xdc   : > { %9550 = vst [vmem:[#allocation88_spill] sm:$0xff] %v6271_v54  ;;  %v4320_v54 = vpack.i.bf16 %v5990_v57, %v5983_v55 }
  0xdd   : > { %9551 = vst [vmem:[#allocation89_spill] sm:$0xff] %v6274_v41  ;;  %v4325_v41 = vpack.i.bf16 %v6040_v18, %v6025_v14 }
  0xde   : > { %9552 = vst [vmem:[#allocation90_spill] sm:$0xff] %v6278_v45  ;;  %4251 = vrot.lane.b32.xlu1 %v4250_v9, %s5604_s13  ;;  %4241 = vrot.lane.b32.xlu2 %v4240_v25, %s5604_s13  ;;  %v6367_v9 = vld [vmem:[%s5731_s25 + $0xc0] sm:$0xff] }
  0xdf   : > { %9553 = vst [vmem:[#allocation91_spill] sm:$0xff] %v6282_v17  ;;  %4246 = vrot.lane.b32.xlu0 %v4245_v12, %s5604_s13  ;;  %v6370_v12 = vld [vmem:[%s5731_s25 + $0xc8] sm:$0xff]  ;;  %v6377_v25 = vld [vmem:[%s5731_s25 + $0xe0] sm:$0xff] }
  0xe0   : > { %9554 = vst [vmem:[#allocation92_spill] sm:$0xff] %v6367_v9 }
  0xe1   : > { %9555 = vst [vmem:[#allocation93_spill] sm:$0xff] %v6370_v12 }
  0xe2   : > { %376 = vst.msk [vmem:[#allocation2 + $0x184] sm:$0xff] %vm278_vm0, %v6367_v9  ;;  %v6394_v9 = vld [vmem:[%s5731_s25 + $0xd8] sm:$0xff] }
  0xe3   : > { %9556 = vst [vmem:[#allocation94_spill] sm:$0xff] %v6377_v25 }
  0xe4   : > { %9557 = vst [vmem:[#allocation95_spill] sm:$0xff] %v6380_v33 }
  0xe5   : > { %377 = vst.msk [vmem:[#allocation2 + $0x18c] sm:$0xff] %vm278_vm0, %v6370_v12  ;;  %v4315_v12 = vpack.i.bf16 %v5971_v49, %v5964_v47 }
  0xe6   : > { %4266 = vrot.lane.b32.xlu1 %v6300_v53, %s5604_s13  ;;  %4256 = vrot.lane.b32.xlu2 %v6308_v2, %s5604_s13  ;;  %9558 = vst [vmem:[#allocation96_spill] sm:$0xff] %v6385_v16 }
  0xe7   : > { %4261 = vrot.lane.b32.xlu0 %v6304_v62, %s5604_s13  ;;  %380 = vst.msk [vmem:[#allocation2 + $0x1b4] sm:$0xff] %vm278_vm0, %v6377_v25  ;;  %v6408_v25 = vld [vmem:[%s5731_s25 + $0xf0] sm:$0xff]  ;;  %s244_s25 = scalar_lea.vmem [#allocation6], %s3958_s23 }
  0xe8   : > { %9559 = vst [vmem:[#allocation97_spill] sm:$0xff] %v6394_v9 }
  0xe9   : > { %381 = vst.msk [vmem:[#allocation2 + $0x1bc] sm:$0xff] %vm278_vm0, %v6380_v33  ;;  %v6421_v33 = vpack.i.bf16 %v6125_v3, %v6116_v15 }
  0xea   : > { %378 = vst.msk [vmem:[#allocation2 + $0x19c] sm:$0xff] %vm278_vm0, %v6385_v16  ;;  %v6464_v16 = vpop.permute.xlu1 %4166 }
  0xeb   : > { %379 = vst.msk [vmem:[#allocation2 + $0x1a4] sm:$0xff] %vm278_vm0, %v6394_v9  ;;  %v4330_v9 = vpack.i.bf16 %v6013_v6, %v6004_v1  ;;  %v6446_v1 = vpack.i.bf16 %v6107_v13, %v6089_v61  ;;  %v6456_v6 = vpack.i.bf16 %v6226_v46, %v6224_v44  ;;  %v6510_v13 = vpop.permute.xlu0 %4161 }
  0xec   : > { %9560 = vst [vmem:[#allocation98_spill] sm:$0xff] %v6408_v25 }
  0xed   : > { %9561 = vst [vmem:[#allocation99_spill] sm:$0xff] %v6411_v31 }
  0xee   : > { %4281 = vrot.lane.b32.xlu1 %v6318_v4, %s5604_s13  ;;  %4271 = vrot.lane.b32.xlu2 %v6326_v21, %s5604_s13  ;;  %382 = vst.msk [vmem:[#allocation2 + $0x1cc] sm:$0xff] %vm278_vm0, %v6408_v25  ;;  %v6462_v25 = vpack.i.bf16 %v6242_v63, %v6240_v29  ;;  %v6474_v24 = vld [vmem:[#allocation2 + $0x1b0] sm:$0xff] }
  0xef   : > { %4276 = vrot.lane.b32.xlu0 %v6322_v20, %s5604_s13  ;;  %383 = vst.msk [vmem:[#allocation2 + $0x1d4] sm:$0xff] %vm278_vm0, %v6411_v31  ;;  %v6442_v31 = vpack.i.bf16 %v6167_v59, %v6157_v28 }
  0xf0   : > { %9564 = vst [vmem:[#allocation102_spill] sm:$0xff] %v6464_v16  ;;  %v6476_v46 = vld [vmem:[#allocation2 + $0x1b8] sm:$0xff] }
  0xf1   : > { %9565 = vst [vmem:[#allocation103_spill] sm:$0xff] %v6472_v60  ;;  %v6488_v16 = vpack.i.bf16 %v6476_v46, %v6474_v24  ;;  %v6492_v60 = vld [vmem:[#allocation2 + $0x188] sm:$0xff] }
  0xf2   : > { %9566 = vst [vmem:[#allocation104_spill] sm:$0xff] %v6474_v24  ;;  %v6482_v63 = vld [vmem:[#allocation2 + $0x1a0] sm:$0xff]  ;;  %v6506_v22 = vpop.permute.xlu1 %4171 }
  0xf3   : > { %9570 = vst [vmem:[#allocation108_spill] sm:$0xff] %v6506_v22 }
  0xf4   : > { %9571 = vst [vmem:[#allocation109_spill] sm:$0xff] %v6510_v13 }
  0xf6   : > { %4296 = vrot.lane.b32.xlu1 %v6336_v26, %s5604_s13  ;;  %4286 = vrot.lane.b32.xlu2 %v6344_v7, %s5604_s13  ;;  %v6514_v61 = vld [vmem:[#allocation2 + $0x1d0] sm:$0xff] }
  0xf7   : > { %4291 = vrot.lane.b32.xlu0 %v6340_v27, %s5604_s13 }
  0xfe   : > { %4311 = vrot.lane.b32.xlu1 %v6354_v36, %s5604_s13  ;;  %4301 = vrot.lane.b32.xlu2 %v6362_v40, %s5604_s13 }
  0xff   : > { %4306 = vrot.lane.b32.xlu0 %v6358_v48, %s5604_s13 }
 0x102   : > { %v6525_v22 = vpop.permute.xlu1 %4191 }
 0x103   : > { %9573 = vst [vmem:[#allocation111_spill] sm:$0xff] %v6525_v22 }
 0x106   : > { %4326 = vrot.lane.b32.xlu1 %v4325_v41, %s5605_s15  ;;  %4316 = vrot.lane.b32.xlu2 %v4315_v12, %s5605_s15  ;;  %v6425_v41 = vpack.i.bf16 %v6069_v34, %v6058_v30  ;;  %v6438_v12 = vpop.permute.xlu2 %4176  ;;  %v6529_v13 = vpop.permute.xlu0 %4186  ;;  %v9588_v34 = vld [vmem:[#allocation81_spill] sm:$0xff] }
 0x107   : > { %4321 = vrot.lane.b32.xlu0 %v4320_v54, %s5605_s15  ;;  %v6436_v54 = vpack.i.bf16 %v6197_v38, %v6190_v43  ;;  %9562 = vst [vmem:[#allocation100_spill] sm:$0xff] %v6438_v12  ;;  %v6468_v12 = vpack.i.bf16 %v6179_v10, %v6171_v8  ;;  %v6490_v10 = vld [vmem:[#allocation2 + $0x180] sm:$0xff]  ;;  %v9584_v43 = vld [vmem:[#allocation75_spill] sm:$0xff] }
 0x108   : > { %9568 = vst [vmem:[#allocation106_spill] sm:$0xff] %v6490_v10  ;;  %v6502_v44 = vpack.i.bf16 %v6492_v60, %v6490_v10  ;;  %v597_v37 = vrot.slane %v6490_v10, 4 }
 0x109   : > { %9574 = vst [vmem:[#allocation112_spill] sm:$0xff] %v6529_v13 }
 0x10e   : > { %4341 = vrot.lane.b32.xlu1 %v6421_v33, %s5605_s15  ;;  %4331 = vrot.lane.b32.xlu2 %v4330_v9, %s5605_s15  ;;  %v6458_v9 = vpop.permute.xlu2 %4181 }
 0x10f   : > { %4336 = vrot.lane.b32.xlu0 %v6425_v41, %s5605_s15  ;;  %9563 = vst [vmem:[#allocation101_spill] sm:$0xff] %v6458_v9  ;;  %v6480_v9 = vld [vmem:[#allocation2 + $0x198] sm:$0xff] }
 0x110   : > { %9567 = vst [vmem:[#allocation105_spill] sm:$0xff] %v6480_v9  ;;  %v6498_v29 = vpack.i.bf16 %v6482_v63, %v6480_v9 }
 0x116   : > { %4356 = vrot.lane.b32.xlu1 %v6436_v54, %s5605_s15  ;;  %4346 = vrot.lane.b32.xlu2 %v6446_v1, %s5605_s15  ;;  %v6494_v8 = vpop.permute.xlu2 %4196 }
 0x117   : > { %4351 = vrot.lane.b32.xlu0 %v6442_v31, %s5605_s15  ;;  %9569 = vst [vmem:[#allocation107_spill] sm:$0xff] %v6494_v8  ;;  %v441_v8 = vld [vmem:[#allocation2 + $0x1c8] sm:$0xff] }
 0x118   : > { %v6519_v59 = vpack.i.bf16 %v6514_v61, %v441_v8 }
 0x11e   : > { %4371 = vrot.lane.b32.xlu1 %v6456_v6, %s5605_s15  ;;  %4361 = vrot.lane.b32.xlu2 %v6468_v12, %s5605_s15 }
 0x11f   : > { %4366 = vrot.lane.b32.xlu0 %v6462_v25, %s5605_s15 }
 0x122   : > { %v6516_v42 = vpop.permute.xlu2 %4211 }
 0x123   : > { %9572 = vst [vmem:[#allocation110_spill] sm:$0xff] %v6516_v42 }
 0x125   : > { %v6537_v42 = vpop.permute.xlu1 %4206 }
 0x126   : > { %4386 = vrot.lane.b32.xlu1 %v6488_v16, %s5605_s15  ;;  %4376 = vrot.lane.b32.xlu2 %v6502_v44, %s5605_s15  ;;  %9576 = vst [vmem:[#allocation114_spill] sm:$0xff] %v6537_v42 }
 0x127   : > { %4381 = vrot.lane.b32.xlu0 %v6498_v29, %s5605_s15 }
 0x12e   : > { %4401 = vrot.lane.b32.xlu1 %v6080_v51, %s5606_s16  ;;  %4391 = vrot.lane.b32.xlu2 %v6519_v59, %s5605_s15 }
 0x12f   : > { %4396 = vrot.lane.b32.xlu0 %v6011_v5, %s5606_s16  ;;  %v6541_v5 = vpop.permute.xlu0 %4201 }
 0x130   : > { %v6531_v28 = vpop.permute.xlu2 %4226  ;;  %9577 = vst [vmem:[#allocation115_spill] sm:$0xff] %v6541_v5  ;;  %v602_v5 = vrot.slane %v6480_v9, 4 }
 0x131   : > { %9575 = vst [vmem:[#allocation113_spill] sm:$0xff] %v6531_v28  ;;  %v6551_v28 = vld [vmem:[#allocation2 + $0x1a8] sm:$0xff] }
 0x135   : > { %v6549_v13 = vpop.permute.xlu1 %4221 }
 0x136   : > { %4416 = vrot.lane.b32.xlu1 %v6186_v56, %s5606_s16  ;;  %4406 = vrot.lane.b32.xlu2 %v6103_v0, %s5606_s16  ;;  %9579 = vst [vmem:[#allocation117_spill] sm:$0xff] %v6549_v13  ;;  %v6557_v0 = vld [vmem:[#allocation2 + $0x190] sm:$0xff]  ;;  %v598_v13 = vrot.slane %v6492_v60, 4 }
 0x137   : > { %4411 = vrot.lane.b32.xlu0 %v6067_v32, %s5606_s16  ;;  %v6555_v42 = vpop.permute.xlu0 %4216  ;;  %v603_v32 = vrot.slane %v6482_v63, 4  ;;  %v600_v38 = vrot.slane %v6557_v0, 4 }
 0x138   : > { %v6543_v22 = vpop.permute.xlu2 %4241  ;;  %9580 = vst [vmem:[#allocation118_spill] sm:$0xff] %v6555_v42 }
 0x139   : > { %9578 = vst [vmem:[#allocation116_spill] sm:$0xff] %v6543_v22  ;;  %v605_v22 = vrot.slane %v6551_v28, 4  ;;  %v6570_v42 = vsel %vm504_vm1, %v602_v5, %v603_v32  ;;  %v6583_v10 = vsel %vm504_vm1, %v598_v13, %v600_v38  ;;  %v612_v38 = vrot.slane %v441_v8, 4 }
 0x13a   : > { %9582 = vst [vmem:[#allocation120_spill] sm:$0xff] %v6570_v42 }
 0x13b   : > { %v6573_v9 = vsel %vm504_vm1, %v603_v32, %v605_v22  ;;  %9587 = vst [vmem:[#allocation124_spill] sm:$0xff] %v6583_v10  ;;  %v443_v32 = vld [vmem:[#allocation2 + $0x1d8] sm:$0xff] }
 0x13c   : > { %9583 = vst [vmem:[#allocation121_spill] sm:$0xff] %v6573_v9  ;;  %v6591_v5 = vpack.i.bf16 %v6573_v9, %v6570_v42  ;;  %v615_v52 = vrot.slane %v443_v32, 4  ;;  %v608_v42 = vrot.slane %v6476_v46, 4 }
 0x13e   : > { %4431 = vrot.lane.b32.xlu1 %v6251_v39, %s5606_s16  ;;  %4421 = vrot.lane.b32.xlu2 %v6177_v11, %s5606_s16  ;;  %9590 = vst [vmem:[#allocation126_spill] sm:$0xff] %v6591_v5 }
 0x13f   : > { %4426 = vrot.lane.b32.xlu0 %v6155_v23, %s5606_s16 }
 0x140   : > { %v6562_v51 = vpop.permute.xlu2 %4256 }
 0x141   : > { %9581 = vst [vmem:[#allocation119_spill] sm:$0xff] %v6562_v51  ;;  %v6580_v51 = vsel %vm504_vm1, %v597_v37, %v598_v13  ;;  %v6599_v37 = vld [vmem:[#allocation2 + $0x1c0] sm:$0xff]  ;;  %v613_v13 = vrot.slane %v6514_v61, 4 }
 0x142   : > { %9586 = vst [vmem:[#allocation123_spill] sm:$0xff] %v6580_v51  ;;  %v610_v9 = vrot.slane %v6599_v37, 4 }
 0x143   : > { %v6615_v8 = vsel %vm504_vm1, %v613_v13, %v615_v52 }
 0x144   : > { %9594 = vst [vmem:[#allocation130_spill] sm:$0xff] %v6615_v8  ;;  %v6625_v3 = vsel %vm504_vm1, %v608_v42, %v610_v9 }
 0x145   : > { %9596 = vst [vmem:[#allocation132_spill] sm:$0xff] %v6625_v3 }
 0x146   : > { %4446 = vrot.lane.b32.xlu1 %v6282_v17, %s5606_s16  ;;  %4436 = vrot.lane.b32.xlu2 %v9588_v34, %s5606_s16 }
 0x147   : > { %4441 = vrot.lane.b32.xlu0 %v9584_v43, %s5606_s16 }
 0x148   : > { %v6577_v35 = vpop.permute.xlu1 %4236  ;;  %v6593_v22 = vpop.permute.xlu2 %4271 }
 0x149   : > { %9585 = vst [vmem:[#allocation122_spill] sm:$0xff] %v6577_v35  ;;  %v6587_v30 = vpop.permute.xlu0 %4231  ;;  %v6597_v35 = vpack.i.bf16 %v6583_v10, %v6580_v51  ;;  %v6612_v51 = vsel %vm504_vm1, %v612_v38, %v613_v13 }
 0x14a   : > { %9589 = vst [vmem:[#allocation125_spill] sm:$0xff] %v6587_v30  ;;  %v607_v30 = vrot.slane %v6474_v24, 4  ;;  %v6631_v38 = vpack.i.bf16 %v6615_v8, %v6612_v51 }
 0x14b   : > { %9591 = vst [vmem:[#allocation127_spill] sm:$0xff] %v6593_v22 }
 0x14c   : > { %9592 = vst [vmem:[#allocation128_spill] sm:$0xff] %v6597_v35  ;;  %v6622_v24 = vsel %vm504_vm1, %v607_v30, %v608_v42 }
 0x14d   : > { %9593 = vst [vmem:[#allocation129_spill] sm:$0xff] %v6612_v51  ;;  %v6635_v52 = vpack.i.bf16 %v6625_v3, %v6622_v24  ;;  %v4545_v3 = vpack.i.bf16 %v6599_v37, %v6476_v46 }
 0x14e   : > { %4461 = vrot.lane.b32.xlu1 %v6591_v5, %s5606_s16  ;;  %4451 = vrot.lane.b32.xlu2 %v6278_v45, %s5606_s16  ;;  %9595 = vst [vmem:[#allocation131_spill] sm:$0xff] %v6622_v24 }
 0x14f   : > { %4456 = vrot.lane.b32.xlu0 %v6597_v35, %s5606_s16  ;;  %9598 = vst [vmem:[#allocation134_spill] sm:$0xff] %v6631_v38 }
 0x150   : > { %v6609_v10 = vpop.permute.xlu1 %4251  ;;  %v6627_v15 = vpop.permute.xlu2 %4286  ;;  %9599 = vst [vmem:[#allocation135_spill] sm:$0xff] %v6635_v52 }
 0x151   : > { %v6619_v22 = vpop.permute.xlu0 %4246  ;;  %9597 = vst [vmem:[#allocation133_spill] sm:$0xff] %v6627_v15 }
 0x156   : > { %4476 = vrot.lane.b32.xlu1 %v6308_v2, %s5607_s17  ;;  %4466 = vrot.lane.b32.xlu2 %v6635_v52, %s5606_s16 }
 0x157   : > { %4471 = vrot.lane.b32.xlu0 %v6631_v38, %s5606_s16 }
 0x158   : > { %v6641_v30 = vpop.permute.xlu1 %4266  ;;  %v6647_v9 = vpop.permute.xlu2 %4301 }
 0x159   : > { %9600 = vst [vmem:[#allocation136_spill] sm:$0xff] %v6641_v30  ;;  %v6645_v42 = vpop.permute.xlu0 %4261 }
 0x15a   : > { %9601 = vst [vmem:[#allocation137_spill] sm:$0xff] %v6645_v42 }
 0x15e   : > { %4491 = vrot.lane.b32.xlu1 %v6326_v21, %s5607_s17  ;;  %4481 = vrot.lane.b32.xlu2 %v6304_v62, %s5607_s17 }
 0x15f   : > { %4486 = vrot.lane.b32.xlu0 %v6300_v53, %s5607_s17 }
 0x160   : > { %v6653_v13 = vpop.permute.xlu1 %4281  ;;  %v6659_v51 = vpop.permute.xlu2 %4316 }
 0x161   : > { %9602 = vst [vmem:[#allocation138_spill] sm:$0xff] %v6653_v13  ;;  %v6657_v2 = vpop.permute.xlu0 %4276  ;;  %v6773_v13 = vld [vmem:[#allocation2 + $0x228] sm:$0xff] }
 0x162   : > { %9603 = vst [vmem:[#allocation139_spill] sm:$0xff] %v6657_v2 }
 0x166   : > { %4506 = vrot.lane.b32.xlu1 %v6344_v7, %s5607_s17  ;;  %4496 = vrot.lane.b32.xlu2 %v6322_v20, %s5607_s17  ;;  %v4535_v20 = vpack.i.bf16 %v6557_v0, %v6492_v60 }
 0x167   : > { %4501 = vrot.lane.b32.xlu0 %v6318_v4, %s5607_s17 }
 0x168   : > { %v6665_v8 = vpop.permute.xlu1 %4296  ;;  %v6671_v21 = vpop.permute.xlu2 %4331 }
 0x169   : > { %9604 = vst [vmem:[#allocation140_spill] sm:$0xff] %v6665_v8  ;;  %v6669_v53 = vpop.permute.xlu0 %4291 }
 0x16a   : > { %9605 = vst [vmem:[#allocation141_spill] sm:$0xff] %v6669_v53 }
 0x16b   : > { %9606 = vst [vmem:[#allocation142_spill] sm:$0xff] %v6671_v21 }
 0x16e   : > { %4521 = vrot.lane.b32.xlu1 %v6362_v40, %s5607_s17  ;;  %4511 = vrot.lane.b32.xlu2 %v6340_v27, %s5607_s17  ;;  %v4550_v27 = vpack.i.bf16 %v443_v32, %v6514_v61 }
 0x16f   : > { %4516 = vrot.lane.b32.xlu0 %v6336_v26, %s5607_s17 }
 0x170   : > { %v6677_v62 = vpop.permute.xlu1 %4311  ;;  %v6685_v7 = vpop.permute.xlu2 %4346 }
 0x171   : > { %v6681_v4 = vpop.permute.xlu0 %4306  ;;  %9607 = vst [vmem:[#allocation143_spill] sm:$0xff] %v6685_v7 }
 0x176   : > { %4536 = vrot.lane.b32.xlu1 %v4535_v20, %s5607_s17  ;;  %4526 = vrot.lane.b32.xlu2 %v6358_v48, %s5607_s17  ;;  %v4540_v20 = vpack.i.bf16 %v6551_v28, %v6482_v63 }
 0x177   : > { %4531 = vrot.lane.b32.xlu0 %v6354_v36, %s5607_s17 }
 0x178   : > { %v6690_v40 = vpop.permute.xlu1 %4326  ;;  %v6697_v24 = vpop.permute.xlu2 %4361 }
 0x179   : > { %v6694_v26 = vpop.permute.xlu0 %4321  ;;  %9608 = vst [vmem:[#allocation144_spill] sm:$0xff] %v6697_v24 }
 0x17e   : > { %4551 = vrot.lane.b32.xlu1 %v4550_v27, %s5607_s17  ;;  %4541 = vrot.lane.b32.xlu2 %v4540_v20, %s5607_s17  ;;  %v6752_v20 = vld [vmem:[#allocation2 + $0x218] sm:$0xff] }
 0x17f   : > { %4546 = vrot.lane.b32.xlu0 %v4545_v3, %s5607_s17 }
 0x180   : > { %v6705_v36 = vpop.permute.xlu1 %4341  ;;  %v6710_v53 = vpop.permute.xlu2 %4376 }
 0x181   : > { %9609 = vst [vmem:[#allocation145_spill] sm:$0xff] %v6705_v36  ;;  %v6708_v48 = vpop.permute.xlu0 %4336  ;;  %v449_v36 = vld [vmem:[#allocation2 + $0x208] sm:$0xff] }
 0x182   : > { %9610 = vst [vmem:[#allocation146_spill] sm:$0xff] %v6708_v48 }
 0x183   : > { %9611 = vst [vmem:[#allocation147_spill] sm:$0xff] %v6710_v53  ;;  %v448_v53 = vld [vmem:[#allocation2 + $0x200] sm:$0xff] }
 0x186   : > { %4566 = vrot.lane.b32.xlu1 %v6446_v1, %s5608_s26  ;;  %4556 = vrot.lane.b32.xlu2 %v6425_v41, %s5608_s26 }
 0x187   : > { %4561 = vrot.lane.b32.xlu0 %v6421_v33, %s5608_s26 }
 0x188   : > { %v6716_v61 = vpop.permute.xlu1 %4356  ;;  %v6722_v32 = vpop.permute.xlu2 %4391 }
 0x189   : > { %9612 = vst [vmem:[#allocation148_spill] sm:$0xff] %v6716_v61  ;;  %v6720_v3 = vpop.permute.xlu0 %4351  ;;  %v6775_v61 = vld [vmem:[#allocation2 + $0x230] sm:$0xff] }
 0x18a   : > { %9613 = vst [vmem:[#allocation149_spill] sm:$0xff] %v6720_v3 }
 0x18b   : > { %9614 = vst [vmem:[#allocation150_spill] sm:$0xff] %v6722_v32 }
 0x18e   : > { %4581 = vrot.lane.b32.xlu1 %v6468_v12, %s5608_s26  ;;  %4571 = vrot.lane.b32.xlu2 %v6442_v31, %s5608_s26  ;;  %v6750_v31 = vld [vmem:[#allocation2 + $0x210] sm:$0xff] }
 0x18f   : > { %4576 = vrot.lane.b32.xlu0 %v6436_v54, %s5608_s26 }
 0x190   : > { %v6728_v27 = vpop.permute.xlu1 %4371  ;;  %v6734_v1 = vpop.permute.xlu2 %4406 }
 0x191   : > { %9615 = vst [vmem:[#allocation151_spill] sm:$0xff] %v6728_v27  ;;  %v6732_v33 = vpop.permute.xlu0 %4366  ;;  %v4625_v27 = vpack.i.bf16 %v6752_v20, %v6750_v31 }
 0x192   : > { %9616 = vst [vmem:[#allocation152_spill] sm:$0xff] %v6732_v33  ;;  %v445_v33 = vld [vmem:[#allocation2 + $0x1e8] sm:$0xff] }
 0x193   : > { %v630_v21 = vrot.slane %v445_v33, 4 }
 0x196   : > { %4596 = vrot.lane.b32.xlu1 %v6502_v44, %s5608_s26  ;;  %4586 = vrot.lane.b32.xlu2 %v6462_v25, %s5608_s26 }
 0x197   : > { %4591 = vrot.lane.b32.xlu0 %v6456_v6, %s5608_s26  ;;  %v447_v6 = vld [vmem:[#allocation2 + $0x1f8] sm:$0xff] }
 0x198   : > { %v6740_v41 = vpop.permute.xlu1 %4386  ;;  %v6746_v12 = vpop.permute.xlu2 %4421  ;;  %v4620_v15 = vpack.i.bf16 %v448_v53, %v447_v6  ;;  %v634_v30 = vrot.slane %v447_v6, 4 }
 0x199   : > { %v6744_v54 = vpop.permute.xlu0 %4381  ;;  %9617 = vst [vmem:[#allocation153_spill] sm:$0xff] %v6746_v12  ;;  %v658_v12 = vrot.slane %v5973_v50, 3  ;;  %v635_v50 = vrot.slane %v448_v53, 4 }
 0x19e   : > { %4611 = vrot.lane.b32.xlu1 %v6519_v59, %s5608_s26  ;;  %4601 = vrot.lane.b32.xlu2 %v6498_v29, %s5608_s26  ;;  %v444_v59 = vld [vmem:[#allocation2 + $0x1e0] sm:$0xff] }
 0x19f   : > { %4606 = vrot.lane.b32.xlu0 %v6488_v16, %s5608_s26  ;;  %v4615_v24 = vpack.i.bf16 %v445_v33, %v444_v59 }
 0x1a0   : > { %v6756_v44 = vpop.permute.xlu1 %4401  ;;  %v6764_v8 = vpop.permute.xlu2 %4436 }
 0x1a1   : > { %v6760_v25 = vpop.permute.xlu0 %4396  ;;  %9618 = vst [vmem:[#allocation154_spill] sm:$0xff] %v6764_v8  ;;  %v4630_v8 = vpack.i.bf16 %v6775_v61, %v6773_v13 }
 0x1a6   : > { %4626 = vrot.lane.b32.xlu1 %v4625_v27, %s5608_s26  ;;  %4616 = vrot.lane.b32.xlu2 %v4615_v24, %s5608_s26 }
 0x1a7   : > { %4621 = vrot.lane.b32.xlu0 %v4620_v15, %s5608_s26 }
 0x1a8   : > { %v6768_v16 = vpop.permute.xlu1 %4416  ;;  %v6777_v3 = vpop.permute.xlu2 %4451 }
 0x1a9   : > { %9619 = vst [vmem:[#allocation155_spill] sm:$0xff] %v6768_v16  ;;  %v6771_v29 = vpop.permute.xlu0 %4411  ;;  %v637_v16 = vrot.slane %v449_v36, 4 }
 0x1aa   : > { %9620 = vst [vmem:[#allocation156_spill] sm:$0xff] %v6771_v29  ;;  %v629_v29 = vrot.slane %v444_v59, 4  ;;  %v6841_v59 = vld [vmem:[#allocation2 + $0x48] sm:$0xff] }
 0x1ab   : > { %9621 = vst [vmem:[#allocation157_spill] sm:$0xff] %v6777_v3 }
 0x1ac   : > { %v6832_v53 = vsel %vm504_vm1, %v629_v29, %v630_v21  ;;  %v6847_v29 = vld [vmem:[#allocation2 + $0x58] sm:$0xff] }
 0x1ad   : > { %9629 = vst [vmem:[#allocation165_spill] sm:$0xff] %v6832_v53 }
 0x1ae   : > { %4641 = vrot.lane.b32.xlu1 %v6177_v11, %s5609_s8  ;;  %4631 = vrot.lane.b32.xlu2 %v4630_v8, %s5608_s26  ;;  %v655_v8 = vrot.slane %v5964_v47, 3 }
 0x1af   : > { %4636 = vrot.lane.b32.xlu0 %v6186_v56, %s5609_s8 }
 0x1b0   : > { %v6785_v15 = vpop.permute.xlu1 %4431  ;;  %v6790_v27 = vpop.permute.xlu2 %4466 }
 0x1b1   : > { %9622 = vst [vmem:[#allocation158_spill] sm:$0xff] %v6785_v15  ;;  %v6788_v24 = vpop.permute.xlu0 %4426 }
 0x1b2   : > { %9623 = vst [vmem:[#allocation159_spill] sm:$0xff] %v6788_v24  ;;  %v656_v24 = vrot.slane %v5971_v49, 3  ;;  %v446_v49 = vld [vmem:[#allocation2 + $0x1f0] sm:$0xff] }
 0x1b3   : > { %v632_v32 = vrot.slane %v446_v49, 4 }
 0x1b4   : > { %v659_v7 = vsel %vm649_vm2, %v656_v24, %v658_v12 }
 0x1b5   : > { %v6835_v36 = vsel %vm504_vm1, %v630_v21, %v632_v32  ;;  %v653_v21 = vrot.slane %v6847_v29, 3 }
 0x1b6   : > { %4656 = vrot.lane.b32.xlu1 %v9588_v34, %s5609_s8  ;;  %4646 = vrot.lane.b32.xlu2 %v6155_v23, %s5609_s8  ;;  %9630 = vst [vmem:[#allocation166_spill] sm:$0xff] %v6835_v36  ;;  %v4695_v49 = vpack.i.bf16 %v6835_v36, %v6832_v53 }
 0x1b7   : > { %4651 = vrot.lane.b32.xlu0 %v6251_v39, %s5609_s8 }
 0x1b8   : > { %v6796_v3 = vpop.permute.xlu1 %4446  ;;  %v6802_v15 = vpop.permute.xlu2 %4481 }
 0x1b9   : > { %9624 = vst [vmem:[#allocation160_spill] sm:$0xff] %v6796_v3  ;;  %v6800_v2 = vpop.permute.xlu0 %4441 }
 0x1ba   : > { %9625 = vst [vmem:[#allocation161_spill] sm:$0xff] %v6800_v2  ;;  %v657_v2 = vsel %vm649_vm2, %v655_v8, %v656_v24  ;;  %v6844_v24 = vld [vmem:[#allocation2 + $0x50] sm:$0xff] }
 0x1bb   : > { %v6815_v42 = vpack.i.bf16 %v659_v7, %v657_v2  ;;  %v636_v2 = vsel %vm504_vm1, %v634_v30, %v635_v50  ;;  %v638_v7 = vsel %vm504_vm1, %v635_v50, %v637_v16  ;;  %v455_v30 = vld [vmem:[#allocation2 + $0x238] sm:$0xff]  ;;  %v650_v16 = vrot.slane %v6841_v59, 3  ;;  %v452_v50 = vld [vmem:[#allocation2 + $0x220] sm:$0xff] }
 0x1bc   : > { %v4700_v6 = vpack.i.bf16 %v638_v7, %v636_v2  ;;  %v651_v8 = vrot.slane %v6844_v24, 3  ;;  %v645_v2 = vrot.slane %v6775_v61, 4  ;;  %v644_v7 = vrot.slane %v6773_v13, 4 }
 0x1bd   : > { %9626 = vst [vmem:[#allocation162_spill] sm:$0xff] %v6815_v42 }
 0x1be   : > { %4671 = vrot.lane.b32.xlu1 %v6278_v45, %s5609_s8  ;;  %4661 = vrot.lane.b32.xlu2 %v9584_v43, %s5609_s8  ;;  %v652_v45 = vsel %vm649_vm2, %v650_v16, %v651_v8  ;;  %v646_v61 = vsel %vm504_vm1, %v644_v7, %v645_v2  ;;  %v665_v16 = vrot.slane %v6025_v14, 3  ;;  %v663_v7 = vrot.slane %v5992_v58, 3  ;;  %v9638_v58 = vld [vmem:[#allocation48_spill] sm:$0xff] }
 0x1bf   : > { %4666 = vrot.lane.b32.xlu0 %v6282_v17, %s5609_s8 }
 0x1c0   : > { %v6811_v3 = vpop.permute.xlu1 %4461  ;;  %v6821_v48 = vpop.permute.xlu2 %4496 }
 0x1c1   : > { %v6819_v47 = vpop.permute.xlu0 %4456  ;;  %9628 = vst [vmem:[#allocation164_spill] sm:$0xff] %v6821_v48  ;;  %v640_v48 = vrot.slane %v6752_v20, 4 }
 0x1c2   : > { %9627 = vst [vmem:[#allocation163_spill] sm:$0xff] %v6819_v47  ;;  %v647_v47 = vrot.slane %v455_v30, 4 }
 0x1c4   : > { %v648_v13 = vsel %vm504_vm1, %v645_v2, %v647_v47  ;;  %v660_v47 = vrot.slane %v5983_v55, 3  ;;  %v661_v2 = vrot.slane %v5990_v57, 3 }
 0x1c6   : > { %4686 = vrot.lane.b32.xlu1 %v6635_v52, %s5609_s8  ;;  %4676 = vrot.lane.b32.xlu2 %v6597_v35, %s5609_s8  ;;  %v642_v52 = vrot.slane %v452_v50, 4  ;;  %v4710_v50 = vpack.i.bf16 %v648_v13, %v646_v61  ;;  %v9640_v61 = vld [vmem:[#allocation51_spill] sm:$0xff] }
 0x1c7   : > { %4681 = vrot.lane.b32.xlu0 %v6591_v5, %s5609_s8  ;;  %v683_v13 = vrot.slane %v9640_v61, 3 }
 0x1c8   : > { %v6829_v12 = vpop.permute.xlu1 %4476  ;;  %v6850_v32 = vpop.permute.xlu2 %4511  ;;  %v643_v30 = vsel %vm504_vm1, %v640_v48, %v642_v52  ;;  %v664_v52 = vsel %vm649_vm2, %v661_v2, %v663_v7  ;;  %v6908_v7 = vld [vmem:[#allocation2 + $0xb0] sm:$0xff] }
 0x1c9   : > { %v6839_v33 = vpop.permute.xlu0 %4471  ;;  %9632 = vst [vmem:[#allocation168_spill] sm:$0xff] %v6850_v32  ;;  %v654_v32 = vsel %vm649_vm2, %v651_v8, %v653_v21  ;;  %v666_v8 = vrot.slane %v6040_v18, 3  ;;  %v668_v21 = vrot.slane %v6042_v19, 3  ;;  %v662_v19 = vsel %vm649_vm2, %v660_v47, %v661_v2  ;;  %v6905_v47 = vld [vmem:[#allocation2 + $0xa8] sm:$0xff] }
 0x1ca   : > { %9631 = vst [vmem:[#allocation167_spill] sm:$0xff] %v6839_v33  ;;  %v639_v33 = vrot.slane %v6750_v31, 4  ;;  %v670_v2 = vrot.slane %v6905_v47, 3 }
 0x1cb   : > { %v669_v14 = vsel %vm649_vm2, %v666_v8, %v668_v21 }
 0x1cc   : > { %v641_v31 = vsel %vm504_vm1, %v639_v33, %v640_v48  ;;  %v680_v48 = vrot.slane %v9638_v58, 3  ;;  %v9639_v33 = vld [vmem:[#allocation50_spill] sm:$0xff] }
 0x1cd   : > { %v4705_v36 = vpack.i.bf16 %v643_v30, %v641_v31  ;;  %v9642_v30 = vld [vmem:[#allocation33_spill] sm:$0xff] }
 0x1ce   : > { %4701 = vrot.lane.b32.xlu1 %v4700_v6, %s5609_s8  ;;  %4691 = vrot.lane.b32.xlu2 %v6631_v38, %s5609_s8  ;;  %v4715_v6 = vpack.i.bf16 %v654_v32, %v652_v45  ;;  %v667_v45 = vsel %vm649_vm2, %v665_v16, %v666_v8  ;;  %v681_v32 = vrot.slane %v9639_v33, 3  ;;  %v675_v16 = vrot.slane %v9642_v30, 3  ;;  %v9643_v8 = vld [vmem:[#allocation36_spill] sm:$0xff] }
 0x1cf   : > { %4696 = vrot.lane.b32.xlu0 %v4695_v49, %s5609_s8  ;;  %v6891_v57 = vpack.i.bf16 %v669_v14, %v667_v45  ;;  %v676_v21 = vrot.slane %v9643_v8, 3  ;;  %v671_v45 = vrot.slane %v6908_v7, 3  ;;  %v6911_v14 = vld [vmem:[#allocation2 + $0xb8] sm:$0xff] }
 0x1d0   : > { %v6862_v53 = vpop.permute.xlu1 %4491  ;;  %v6875_v49 = vpop.permute.xlu2 %4526  ;;  %v684_v58 = vsel %vm649_vm2, %v681_v32, %v683_v13 }
 0x1d1   : > { %9633 = vst [vmem:[#allocation169_spill] sm:$0xff] %v6862_v53  ;;  %v6868_v20 = vpop.permute.xlu0 %4486  ;;  %v677_v61 = vsel %vm649_vm2, %v675_v16, %v676_v21 }
 0x1d2   : > { %9634 = vst [vmem:[#allocation170_spill] sm:$0xff] %v6875_v49  ;;  %v9649_v49 = vld [vmem:[#allocation69_spill] sm:$0xff] }
 0x1d3   : > { %9637 = vst [vmem:[#allocation173_spill] sm:$0xff] %v6891_v57 }
 0x1d6   : > { %4716 = vrot.lane.b32.xlu1 %v4715_v6, %s5603_s29  ;;  %4706 = vrot.lane.b32.xlu2 %v4705_v36, %s5609_s8  ;;  %v6898_v6 = vpack.i.bf16 %v664_v52, %v662_v19  ;;  %v673_v19 = vrot.slane %v6911_v14, 3  ;;  %v682_v52 = vsel %vm649_vm2, %v680_v48, %v681_v32  ;;  %v9648_v32 = vld [vmem:[#allocation68_spill] sm:$0xff] }
 0x1d7   : > { %4711 = vrot.lane.b32.xlu0 %v4710_v50, %s5609_s8  ;;  %v9644_v50 = vld [vmem:[#allocation37_spill] sm:$0xff]  ;;  %v6927_v38 = vpack.i.bf16 %v684_v58, %v682_v52  ;;  %v695_v13 = vrot.slane %v9648_v32, 3 }
 0x1d8   : > { %v6884_v18 = vpop.permute.xlu1 %4506  ;;  %v6896_v31 = vpop.permute.xlu2 %4541  ;;  %9641 = vst [vmem:[#allocation48_spill] sm:$0xff] %v6898_v6  ;;  %v678_v36 = vrot.slane %v9644_v50, 3  ;;  %v672_v50 = vsel %vm649_vm2, %v670_v2, %v671_v45  ;;  %v674_v48 = vsel %vm649_vm2, %v671_v45, %v673_v19  ;;  %v9656_v45 = vld [vmem:[#allocation42_spill] sm:$0xff] }
 0x1d9   : > { %9635 = vst [vmem:[#allocation171_spill] sm:$0xff] %v6884_v18  ;;  %v6889_v55 = vpop.permute.xlu0 %4501  ;;  %v696_v18 = vrot.slane %v9649_v49, 3  ;;  %v6940_v52 = vpack.i.bf16 %v674_v48, %v672_v50  ;;  %v685_v19 = vrot.slane %v9656_v45, 3  ;;  %v9657_v49 = vld [vmem:[#allocation46_spill] sm:$0xff] }
 0x1da   : > { %9636 = vst [vmem:[#allocation172_spill] sm:$0xff] %v6889_v55  ;;  %v679_v30 = vsel %vm649_vm2, %v676_v21, %v678_v36  ;;  %v9652_v36 = vld [vmem:[#allocation58_spill] sm:$0xff]  ;;  %v686_v58 = vrot.slane %v9657_v49, 3 }
 0x1db   : > { %9647 = vst [vmem:[#allocation33_spill] sm:$0xff] %v6927_v38  ;;  %v6935_v21 = vpack.i.bf16 %v679_v30, %v677_v61  ;;  %v697_v61 = vsel %vm649_vm2, %v695_v13, %v696_v18  ;;  %v9662_v13 = vld [vmem:[#allocation76_spill] sm:$0xff] }
 0x1dc   : > { %9655 = vst [vmem:[#allocation37_spill] sm:$0xff] %v6940_v52  ;;  %v710_v49 = vrot.slane %v9662_v13, 3  ;;  %v9672_v13 = vld [vmem:[#allocation65_spill] sm:$0xff] }
 0x1dd   : > { %9651 = vst [vmem:[#allocation36_spill] sm:$0xff] %v6935_v21 }
 0x1de   : > { %4731 = vrot.lane.b32.xlu1 %v6891_v57, %s5603_s29  ;;  %4721 = vrot.lane.b32.xlu2 %v6815_v42, %s5603_s29  ;;  %v690_v57 = vrot.slane %v9652_v36, 3  ;;  %v9654_v42 = vld [vmem:[#allocation62_spill] sm:$0xff]  ;;  %v687_v36 = vsel %vm649_vm2, %v685_v19, %v686_v58 }
 0x1df   : > { %4726 = vrot.lane.b32.xlu0 %v6898_v6, %s5603_s29  ;;  %v9653_v6 = vld [vmem:[#allocation61_spill] sm:$0xff]  ;;  %v693_v2 = vrot.slane %v9654_v42, 3  ;;  %v9667_v19 = vld [vmem:[#allocation82_spill] sm:$0xff] }
 0x1e0   : > { %v6918_v33 = vpop.permute.xlu1 %4521  ;;  %v6933_v16 = vpop.permute.xlu2 %4556 }
 0x1e1   : > { %9645 = vst [vmem:[#allocation50_spill] sm:$0xff] %v6918_v33  ;;  %v6924_v8 = vpop.permute.xlu0 %4516  ;;  %v9650_v33 = vld [vmem:[#allocation70_spill] sm:$0xff] }
 0x1e2   : > { %9646 = vst [vmem:[#allocation51_spill] sm:$0xff] %v6924_v8  ;;  %v698_v55 = vrot.slane %v9650_v33, 3  ;;  %v691_v8 = vrot.slane %v9653_v6, 3  ;;  %v9658_v33 = vld [vmem:[#allocation47_spill] sm:$0xff] }
 0x1e3   : > { %v688_v32 = vrot.slane %v9658_v33, 3 }
 0x1e4   : > { %v699_v30 = vsel %vm649_vm2, %v696_v18, %v698_v55  ;;  %v692_v42 = vsel %vm649_vm2, %v690_v57, %v691_v8  ;;  %v694_v50 = vsel %vm649_vm2, %v691_v8, %v693_v2  ;;  %v4084_v18 = vld [vmem:[%s9217_s1 + $0x38] sm:$0xff]  ;;  %v9663_v57 = vld [vmem:[#allocation77_spill] sm:$0xff]  ;;  %v9664_v8 = vld [vmem:[#allocation78_spill] sm:$0xff] }
 0x1e5   : > { %v6960_v45 = vpack.i.bf16 %v699_v30, %v697_v61  ;;  %v689_v55 = vsel %vm649_vm2, %v686_v58, %v688_v32  ;;  %v711_v33 = vrot.slane %v9663_v57, 3  ;;  %v713_v2 = vrot.slane %v9664_v8, 3  ;;  %3033 = vmatpush.bf16.msra.mxu0 %v4084_v18  ;;  %v9668_v30 = vld [vmem:[#allocation83_spill] sm:$0xff] }
 0x1e6   : > { %4746 = vrot.lane.b32.xlu1 %v6927_v38, %s5603_s29  ;;  %4736 = vrot.lane.b32.xlu2 %v6940_v52, %s5603_s29  ;;  %v6971_v38 = vpack.i.bf16 %v694_v50, %v692_v42  ;;  %v705_v61 = vrot.slane %v9667_v19, 3  ;;  %v6976_v53 = vpack.i.bf16 %v689_v55, %v687_v36  ;;  %v9671_v58 = vld [vmem:[#allocation63_spill] sm:$0xff]  ;;  %v701_v57 = vrot.slane %v9672_v13, 3  ;;  %v9673_v50 = vld [vmem:[#allocation66_spill] sm:$0xff]  ;;  %v9676_v13 = vld [vmem:[#allocation104_spill] sm:$0xff] }
 0x1e7   : > { %4741 = vrot.lane.b32.xlu0 %v6935_v21, %s5603_s29  ;;  %9661 = vst [vmem:[#allocation70_spill] sm:$0xff] %v6960_v45  ;;  %v9669_v21 = vld [vmem:[#allocation84_spill] sm:$0xff]  ;;  %v700_v32 = vrot.slane %v9671_v58, 3  ;;  %v4083_v42 = vld [vmem:[%s9217_s1 + $0x30] sm:$0xff]  ;;  %v703_v18 = vrot.slane %v9673_v50, 3  ;;  %v712_v8 = vsel %vm649_vm2, %v710_v49, %v711_v33  ;;  %v714_v19 = vsel %vm649_vm2, %v711_v33, %v713_v2  ;;  %v4082_v33 = vld [vmem:[%s9217_s1 + $0x28] sm:$0xff] }
 0x1e8   : > { %v6951_v6 = vpop.permute.xlu1 %4536  ;;  %9666 = vst [vmem:[#allocation61_spill] sm:$0xff] %v6971_v38  ;;  %v708_v52 = vrot.slane %v9669_v21, 3  ;;  %v6999_v49 = vpack.i.bf16 %v714_v19, %v712_v8  ;;  %v721_v19 = vrot.slane %v6482_v63, 3 }
 0x1e9   : > { %9659 = vst [vmem:[#allocation68_spill] sm:$0xff] %v6951_v6  ;;  %v6957_v48 = vpop.permute.xlu0 %4531  ;;  %v6969_v6 = vpop.permute.xlu2 %4571  ;;  %3034 = vmatpush.bf16.msra.mxu0 %v4083_v42  ;;  %v702_v58 = vsel %vm649_vm2, %v700_v32, %v701_v57  ;;  %v704_v2 = vsel %vm649_vm2, %v701_v57, %v703_v18  ;;  %v725_v42 = vrot.slane %v9676_v13, 3  ;;  %v9679_v32 = vld [vmem:[#allocation105_spill] sm:$0xff]  ;;  %v4080_v13 = vld [vmem:[%s9217_s1 + $0x18] sm:$0xff] }
 0x1ea   : > { %9660 = vst [vmem:[#allocation69_spill] sm:$0xff] %v6957_v48  ;;  %v706_v48 = vrot.slane %v9668_v30, 3  ;;  %v720_v8 = vrot.slane %v9679_v32, 3  ;;  %v4081_v57 = vld [vmem:[%s9217_s1 + $0x20] sm:$0xff]  ;;  %v7018_v18 = vpack.i.bf16 %v704_v2, %v702_v58 }
 0x1eb   : > { %9665 = vst [vmem:[#allocation58_spill] sm:$0xff] %v6969_v6 }
 0x1ec   : > { %9670 = vst [vmem:[#allocation62_spill] sm:$0xff] %v6976_v53  ;;  %v707_v36 = vsel %vm649_vm2, %v705_v61, %v706_v48  ;;  %v709_v55 = vsel %vm649_vm2, %v706_v48, %v708_v52  ;;  %v726_v61 = vrot.slane %v6476_v46, 3  ;;  %v728_v52 = vrot.slane %v6599_v37, 3  ;;  %v9681_v46 = vld [vmem:[#allocation106_spill] sm:$0xff] }
 0x1ed   : > { %9675 = vst [vmem:[#allocation46_spill] sm:$0xff] %v6999_v49  ;;  %v7010_v50 = vpack.i.bf16 %v709_v55, %v707_v36  ;;  %3035 = vmatpush.bf16.msra.mxu0 %v4082_v33  ;;  %v715_v37 = vrot.slane %v9681_v46, 3  ;;  %v716_v36 = vrot.slane %v6492_v60, 3  ;;  %v718_v55 = vrot.slane %v6557_v0, 3  ;;  %v4078_v46 = vld [vmem:[%s9217_s1 + $0x8] sm:$0xff] }
 0x1ee   : > { %4761 = vrot.lane.b32.xlu1 %v6960_v45, %s5603_s29  ;;  %4751 = vrot.lane.b32.xlu2 %v6976_v53, %s5603_s29  ;;  %v723_v45 = vrot.slane %v6551_v28, 3  ;;  %9680 = vst [vmem:[#allocation77_spill] sm:$0xff] %v7018_v18  ;;  %v727_v33 = vsel %vm649_vm2, %v725_v42, %v726_v61  ;;  %v729_v63 = vsel %vm649_vm2, %v726_v61, %v728_v52 }
 0x1ef   : > { %4756 = vrot.lane.b32.xlu0 %v6971_v38, %s5603_s29  ;;  %9678 = vst [vmem:[#allocation76_spill] sm:$0xff] %v7010_v50  ;;  %v722_v58 = vsel %vm649_vm2, %v720_v8, %v721_v19  ;;  %v7037_v0 = vpack.i.bf16 %v729_v63, %v727_v33  ;;  %v717_v42 = vsel %vm649_vm2, %v715_v37, %v716_v36  ;;  %v9690_v63 = vld [vmem:[#allocation103_spill] sm:$0xff]  ;;  %v9696_v38 = vld [vmem:[#allocation9_spill] sm:$0xff] }
 0x1f0   : > { %v6990_v21 = vpop.permute.xlu1 %4551  ;;  %v724_v2 = vsel %vm649_vm2, %v721_v19, %v723_v45  ;;  %v719_v61 = vsel %vm649_vm2, %v716_v36, %v718_v55  ;;  %v4079_v45 = vld [vmem:[%s9217_s1 + $0x10] sm:$0xff]  ;;  %v4077_v36 = vld [vmem:[%s9217_s1] sm:$0xff]  ;;  %v9689_v55 = vld [vmem:[#allocation102_spill] sm:$0xff] }
 0x1f1   : > { %9674 = vst [vmem:[#allocation42_spill] sm:$0xff] %v6990_v21  ;;  %v6996_v30 = vpop.permute.xlu0 %4546  ;;  %v7008_v48 = vpop.permute.xlu2 %4586  ;;  %3036 = vmatpush.bf16.msra.mxu0 %v4081_v57  ;;  %v7046_v32 = vpack.i.bf16 %v724_v2, %v722_v58  ;;  %v7051_v8 = vpack.i.bf16 %v719_v61, %v717_v42  ;;  %v4169_v33 = vunpack.i.h.bf16 %v9689_v55  ;;  %v4159_v58 = vunpack.i.h.bf16 %v9690_v63  ;;  %v9692_v61 = vld [vmem:[#allocation108_spill] sm:$0xff] }
 0x1f2   : > { %9677 = vst [vmem:[#allocation47_spill] sm:$0xff] %v7008_v48  ;;  %v4158_v2 = vunpack.i.l.bf16 %v9690_v63  ;;  %v4168_v42 = vunpack.i.l.bf16 %v9689_v55  ;;  %v4248_v21 = vunpack.i.l.bf16 %v6619_v22 }
 0x1f3   : > { %9682 = vst [vmem:[#allocation78_spill] sm:$0xff] %v7037_v0 }
 0x1f4   : > { %9684 = vst [vmem:[#allocation83_spill] sm:$0xff] %v7046_v32 }
 0x1f5   : > { %3037 = vmatpush.bf16.msra.mxu0 %v4080_v13  ;;  %9685 = vst [vmem:[#allocation84_spill] sm:$0xff] %v7051_v8  ;;  %v9691_v13 = vld [vmem:[#allocation39_spill] sm:$0xff] }
 0x1f6   : > { %4776 = vrot.lane.b32.xlu1 %v6999_v49, %s5603_s29  ;;  %4766 = vrot.lane.b32.xlu2 %v7018_v18, %s5603_s29 }
 0x1f7   : > { %4771 = vrot.lane.b32.xlu0 %v7010_v50, %s5603_s29  ;;  %v5428_v50 = vld [vmem:[#allocation2 + $0x8] sm:$0xff] }
 0x1f8   : > { %v7029_v28 = vpop.permute.xlu1 %4566  ;;  %v2208_v18 = vsel %vm278_vm0, %v5428_v50, %v4159_v58  ;;  %v9700_v58 = vld [vmem:[#allocation116_spill] sm:$0xff] }
 0x1f9   : > { %v7035_v60 = vpop.permute.xlu0 %4561  ;;  %v7044_v52 = vpop.permute.xlu2 %4601  ;;  %3038 = vmatpush.bf16.msra.mxu0 %v4079_v45  ;;  %v4174_v45 = vunpack.i.h.bf16 %v9692_v61 }
 0x1fa   : > { %9683 = vst [vmem:[#allocation82_spill] sm:$0xff] %v7044_v52  ;;  %v5429_v52 = vld [vmem:[#allocation2] sm:$0xff] }
 0x1fb   : > { %v2207_v55 = vsel %vm278_vm0, %v5429_v52, %v4158_v2  ;;  %v4244_v52 = vunpack.i.h.bf16 %v9700_v58  ;;  %v4243_v2 = vunpack.i.l.bf16 %v9700_v58  ;;  %v5432_v58 = vld [vmem:[#allocation2 + $0x18] sm:$0xff] }
 0x1fd   : > { %3039 = vmatpush.bf16.msra.mxu0 %v4078_v46 }
 0x1fe   : > { %4791 = vrot.lane.b32.xlu1 %v7037_v0, %s5603_s29  ;;  %4781 = vrot.lane.b32.xlu2 %v7051_v8, %s5603_s29  ;;  %v9693_v0 = vld [vmem:[#allocation25_spill] sm:$0xff] }
 0x1ff   : > { %4786 = vrot.lane.b32.xlu0 %v7046_v32, %s5603_s29  ;;  %v4173_v32 = vunpack.i.l.bf16 %v9692_v61  ;;  %v9695_v8 = vld [vmem:[#allocation109_spill] sm:$0xff]  ;;  %v7094_v61 = vsel %vm278_vm0, %v6844_v24, %v4174_v45 }
 0x200   : > { %v7057_v19 = vpop.permute.xlu1 %4581  ;;  %v4164_v49 = vunpack.i.h.bf16 %v9695_v8  ;;  %9698 = vst [vmem:[#allocation106_spill] sm:$0xff] %v7094_v61 }
 0x201   : > { %9686 = vst [vmem:[#allocation63_spill] sm:$0xff] %v7057_v19  ;;  %v7061_v57 = vpop.permute.xlu0 %4576  ;;  %v7066_v37 = vpop.permute.xlu2 %4616  ;;  %3040 = vmatpush.bf16.msra.mxu0 %v4077_v36 }
 0x202   : > { %9687 = vst [vmem:[#allocation65_spill] sm:$0xff] %v7061_v57 }
 0x203   : > { %9688 = vst [vmem:[#allocation66_spill] sm:$0xff] %v7066_v37  ;;  %v5427_v37 = vld [vmem:[#allocation2 + $0x38] sm:$0xff] }
 0x204   : > { %v2212_v63 = vsel %vm278_vm0, %v5427_v37, %v4169_v33  ;;  %v4163_v37 = vunpack.i.l.bf16 %v9695_v8  ;;  %v9699_v33 = vld [vmem:[#allocation113_spill] sm:$0xff] }
 0x205   : > { %v4229_v48 = vunpack.i.h.bf16 %v9699_v33  ;;  %v4228_v50 = vunpack.i.l.bf16 %v9699_v33 }
 0x206   : > { %4806 = vrot.lane.b32.xlu1 %v9691_v13, %s5604_s13  ;;  %4796 = vrot.lane.b32.xlu2 %v9696_v38, %s5604_s13  ;;  %v9704_v13 = vld [vmem:[#allocation122_spill] sm:$0xff] }
 0x207   : > { %4801 = vrot.lane.b32.xlu0 %v9693_v0, %s5604_s13  ;;  %v4239_v33 = vunpack.i.h.bf16 %v9704_v13  ;;  %v4238_v57 = vunpack.i.l.bf16 %v9704_v13  ;;  %v2209_v0 = vsel %vm278_vm0, %v5432_v58, %v4163_v37  ;;  %v9708_v37 = vld [vmem:[#allocation35_spill] sm:$0xff] }
 0x208   : > { %v7080_v46 = vpop.permute.xlu1 %4596 }
 0x209   : > { %9694 = vst [vmem:[#allocation104_spill] sm:$0xff] %v7080_v46  ;;  %v7089_v53 = vpop.permute.xlu0 %4591  ;;  %v5430_v46 = vld [vmem:[#allocation2 + $0x30] sm:$0xff]  ;;  %v7101_v38 = vpop.permute.xlu2 %4631 }
 0x20a   : > { %9697 = vst [vmem:[#allocation105_spill] sm:$0xff] %v7089_v53  ;;  %v2211_v36 = vsel %vm278_vm0, %v5430_v46, %v4168_v42  ;;  %v7105_v53 = vsel %vm278_vm0, %v6841_v59, %v4173_v32  ;;  %v5431_v42 = vld [vmem:[#allocation2 + $0x20] sm:$0xff]  ;;  %v7115_v32 = vld [vmem:[#allocation2 + $0x158] sm:$0xff] }
 0x20b   : > { %9701 = vst [vmem:[#allocation102_spill] sm:$0xff] %v7101_v38  ;;  %v2210_v45 = vsel %vm278_vm0, %v5431_v42, %v4164_v49  ;;  %v9703_v46 = vld [vmem:[#allocation117_spill] sm:$0xff]  ;;  %v2236_v49 = vsel %vm278_vm0, %v7115_v32, %v4229_v48 }
 0x20c   : > { %9702 = vst [vmem:[#allocation103_spill] sm:$0xff] %v7105_v53  ;;  %v4224_v8 = vunpack.i.h.bf16 %v9703_v46  ;;  %v4223_v19 = vunpack.i.l.bf16 %v9703_v46  ;;  %v9706_v42 = vld [vmem:[#allocation125_spill] sm:$0xff]  ;;  %v7121_v46 = vld [vmem:[#allocation2 + $0x150] sm:$0xff]  ;;  %v2243_v38 = vsel %vm2239_vm3, %v2210_v45, %v4244_v52  ;;  %v7138_v52 = vld [vmem:[#allocation2 + $0x138] sm:$0xff]  ;;  %v2240_v45 = vsel %vm2239_vm3, %v2207_v55, %v4238_v57 }
 0x20d   : > { %9705 = vst [vmem:[#allocation108_spill] sm:$0xff] %v7115_v32  ;;  %v4234_v6 = vunpack.i.h.bf16 %v9706_v42  ;;  %v4233_v53 = vunpack.i.l.bf16 %v9706_v42  ;;  %v2235_v13 = vsel %vm278_vm0, %v7121_v46, %v4228_v50  ;;  %v7131_v48 = vld [vmem:[#allocation2 + $0x140] sm:$0xff]  ;;  %v4249_v32 = vunpack.i.h.bf16 %v6619_v22  ;;  %v5438_v22 = vld [vmem:[#allocation2 + $0x168] sm:$0xff] }
 0x20e   : > { %4821 = vrot.lane.b32.xlu1 %v6186_v56, %s5604_s13  ;;  %9707 = vst [vmem:[#allocation109_spill] sm:$0xff] %v7121_v46  ;;  %v2242_v56 = vsel %vm2239_vm3, %v2209_v0, %v4243_v2  ;;  %v2234_v42 = vsel %vm278_vm0, %v7131_v48, %v4224_v8  ;;  %v4304_v50 = vunpack.i.h.bf16 %v6647_v9  ;;  %v2233_v0 = vsel %vm278_vm0, %v7138_v52, %v4223_v19  ;;  %v5437_v8 = vld [vmem:[#allocation2 + $0x170] sm:$0xff] }
 0x20f   : > { %4816 = vrot.lane.b32.xlu0 %v9708_v37, %s5604_s13  ;;  %9710 = vst [vmem:[#allocation113_spill] sm:$0xff] %v7131_v48  ;;  %v2241_v2 = vsel %vm2239_vm3, %v2208_v18, %v4239_v33  ;;  %v7149_v46 = vsel %vm278_vm0, %v5437_v8, %v4234_v6  ;;  %v7152_v61 = vsel %vm278_vm0, %v5438_v22, %v4233_v53  ;;  %v4303_v19 = vunpack.i.l.bf16 %v6647_v9 }
 0x210   : > { %v7129_v58 = vpop.permute.xlu1 %4611  ;;  %v4319_v57 = vunpack.i.h.bf16 %v6659_v51  ;;  %v4318_v55 = vunpack.i.l.bf16 %v6659_v51  ;;  %v2244_v6 = vsel %vm2239_vm3, %v2211_v36, %v4248_v21  ;;  %v7164_v8 = vsel %vm2239_vm3, %v2234_v42, %v4304_v50 }
 0x211   : > { %9709 = vst [vmem:[#allocation9_spill] sm:$0xff] %v7129_v58  ;;  %v9711_v58 = vld [vmem:[#allocation45_spill] sm:$0xff]  ;;  %v7146_v37 = vpop.permute.xlu0 %4606  ;;  %v7159_v33 = vpop.permute.xlu2 %4646  ;;  %v4308_v53 = vunpack.i.l.bf16 %v6681_v4  ;;  %v4309_v22 = vunpack.i.h.bf16 %v6681_v4  ;;  %v4329_v9 = vunpack.i.h.bf16 %v6690_v40  ;;  %v4328_v18 = vunpack.i.l.bf16 %v6690_v40 }
 0x212   : > { %4811 = vrot.lane.b32.xlu2 %v9711_v58, %s5604_s13  ;;  %9712 = vst [vmem:[#allocation116_spill] sm:$0xff] %v7146_v37  ;;  %v2245_v37 = vsel %vm2239_vm3, %v2212_v63, %v4249_v32  ;;  %v2266_v51 = vsel %vm2239_vm3, %v2233_v0, %v4303_v19  ;;  %v4324_v63 = vunpack.i.h.bf16 %v6694_v26  ;;  %v4323_v21 = vunpack.i.l.bf16 %v6694_v26 }
 0x213   : > { %v4409_v36 = vunpack.i.h.bf16 %v6734_v1  ;;  %v2274_v32 = vsel %vm2272_vm4, %v2241_v2, %v4319_v57  ;;  %v2273_v42 = vsel %vm2272_vm4, %v2240_v45, %v4318_v55  ;;  %v4408_v4 = vunpack.i.l.bf16 %v6734_v1 }
 0x214   : > { %v2268_v0 = vsel %vm2239_vm3, %v2235_v13, %v4308_v53  ;;  %v4389_v26 = vunpack.i.h.bf16 %v6740_v41  ;;  %v4388_v19 = vunpack.i.l.bf16 %v6740_v41  ;;  %v2269_v2 = vsel %vm2239_vm3, %v2236_v49, %v4309_v22 }
 0x215   : > { %v2277_v45 = vsel %vm2272_vm4, %v2244_v6, %v4328_v18  ;;  %v2278_v57 = vsel %vm2272_vm4, %v2245_v37, %v4329_v9  ;;  %v2275_v55 = vsel %vm2272_vm4, %v2242_v56, %v4323_v21  ;;  %v2276_v50 = vsel %vm2272_vm4, %v2243_v38, %v4324_v63 }
 0x216   : > { %4836 = vrot.lane.b32.xlu1 %v6251_v39, %s5604_s13  ;;  %v7197_v13 = vsel %vm2305_vm5, %v2278_v57, %v4409_v36  ;;  %v4383_v41 = vunpack.i.l.bf16 %v6744_v54  ;;  %v7201_v49 = vsel %vm2305_vm5, %v2277_v45, %v4408_v4  ;;  %v4399_v18 = vunpack.i.h.bf16 %v6760_v25  ;;  %v7236_v45 = vld [vmem:[#allocation2 + $0x60] sm:$0xff] }
 0x217   : > { %4831 = vrot.lane.b32.xlu0 %v6155_v23, %s5604_s13  ;;  %v4398_v37 = vunpack.i.l.bf16 %v6760_v25  ;;  %v2301_v53 = vsel %vm2272_vm4, %v2268_v0, %v4388_v19  ;;  %v2302_v56 = vsel %vm2272_vm4, %v2269_v2, %v4389_v26  ;;  %v4479_v38 = vunpack.i.h.bf16 %v6829_v12 }
 0x218   : > { %v7181_v40 = vpop.permute.xlu1 %4626  ;;  %v4478_v22 = vunpack.i.l.bf16 %v6829_v12  ;;  %v4384_v9 = vunpack.i.h.bf16 %v6744_v54  ;;  %v4559_v63 = vunpack.i.h.bf16 %v6933_v16  ;;  %v4558_v21 = vunpack.i.l.bf16 %v6933_v16 }
 0x219   : > { %v7192_v1 = vpop.permute.xlu0 %4621  ;;  %v7205_v6 = vpop.permute.xlu2 %4661  ;;  %v7217_v25 = vsel %vm2272_vm4, %v2266_v51, %v4383_v41  ;;  %v4404_v36 = vunpack.i.h.bf16 %v6756_v44  ;;  %v4403_v4 = vunpack.i.l.bf16 %v6756_v44  ;;  %v2306_v12 = vsel %vm2305_vm5, %v2273_v42, %v4398_v37 }
 0x21a   : > { %4826 = vrot.lane.b32.xlu2 %v6177_v11, %s5604_s13  ;;  %v2307_v54 = vsel %vm2305_vm5, %v2274_v32, %v4399_v18  ;;  %v4469_v0 = vunpack.i.h.bf16 %v6790_v27  ;;  %v4468_v51 = vunpack.i.l.bf16 %v6790_v27  ;;  %v4483_v26 = vunpack.i.l.bf16 %v6802_v15  ;;  %v7239_v18 = vld [vmem:[#allocation2 + $0x68] sm:$0xff] }
 0x21b   : > { %v2339_v19 = vsel %vm2338_vm6, %v2306_v12, %v4478_v22  ;;  %v2340_v2 = vsel %vm2338_vm6, %v2307_v54, %v4479_v38  ;;  %v736_v57 = vrot.slane %v7236_v45, 5  ;;  %v737_v37 = vrot.slane %v7239_v18, 5  ;;  %v5441_v22 = vld [vmem:[#allocation2 + $0x70] sm:$0xff] }
 0x21c   : > { %v2372_v32 = vsel %vm2371_vm7, %v2339_v19, %v4558_v21  ;;  %v2373_v42 = vsel %vm2371_vm7, %v2340_v2, %v4559_v63  ;;  %v739_v38 = vrot.slane %v5441_v22, 5  ;;  %v731_v21 = vrot.slane %v6841_v59, 5 }
 0x21d   : > { %v732_v19 = vrot.slane %v6844_v24, 5  ;;  %v734_v2 = vrot.slane %v6847_v29, 5  ;;  %v2308_v22 = vsel %vm2305_vm5, %v2275_v55, %v4403_v4  ;;  %v2309_v59 = vsel %vm2305_vm5, %v2276_v50, %v4404_v36 }
 0x21e   : > { %4851 = vrot.lane.b32.xlu1 %v6282_v17, %s5604_s13  ;;  %v740_v24 = vsel %vm730_vm9, %v737_v37, %v739_v38  ;;  %v2341_v50 = vsel %vm2338_vm6, %v2308_v22, %v4483_v26  ;;  %v7281_v26 = vld [vmem:[#allocation2 + $0x80] sm:$0xff]  ;;  %v751_v38 = vrot.slane %v6905_v47, 5  ;;  %v4548_v22 = vunpack.i.l.bf16 %v6996_v30 }
 0x21f   : > { %4846 = vrot.lane.b32.xlu0 %v9584_v43, %s5604_s13  ;;  %v733_v36 = vsel %vm730_vm9, %v731_v21, %v732_v19  ;;  %v735_v4 = vsel %vm730_vm9, %v732_v19, %v734_v2  ;;  %v752_v21 = vrot.slane %v6908_v7, 5  ;;  %v4549_v2 = vunpack.i.h.bf16 %v6996_v30 }
 0x220   : > { %v7226_v16 = vpop.permute.xlu1 %4641  ;;  %v4563_v29 = vunpack.i.l.bf16 %v7035_v60  ;;  %v4564_v19 = vunpack.i.h.bf16 %v7035_v60  ;;  %v4488_v17 = vunpack.i.l.bf16 %v6868_v20  ;;  %v4629_v60 = vunpack.i.h.bf16 %v7181_v40 }
 0x221   : > { %v4637_v44 = vpop.permute.xlu0 %4636  ;;  %v7242_v12 = vpop.permute.xlu2 %4676  ;;  %v4628_v43 = vunpack.i.l.bf16 %v7181_v40  ;;  %v9722_v23 = vunpack.i.h.bf16 %v6811_v3 }
 0x222   : > { %4841 = vrot.lane.b32.xlu2 %v9588_v34, %s5604_s13  ;;  %v4639_v41 = vunpack.i.h.bf16 %v4637_v44  ;;  %v4638_v27 = vunpack.i.l.bf16 %v4637_v44  ;;  %9713 = vst [vmem:[#allocation117_spill] sm:$0xff] %v7242_v12  ;;  %v7251_v44 = vsel %vm2272_vm4, %v7164_v8, %v4384_v9  ;;  %v2335_v8 = vsel %vm2305_vm5, %v2302_v56, %v4469_v0  ;;  %v7297_v9 = vld [vmem:[#allocation2 + $0x98] sm:$0xff] }
 0x223   : > { %v2333_v12 = vsel %vm2305_vm5, %v7251_v44, %v9722_v23  ;;  %v9724_v23 = vunpack.i.h.bf16 %v6868_v20  ;;  %v781_v20 = vrot.slane %v7138_v52, 5 }
 0x224   : > { %v2405_v63 = vsel %vm2404_vm8, %v2372_v32, %v4638_v27  ;;  %v2406_v54 = vsel %vm2404_vm8, %v2373_v42, %v4639_v41  ;;  %v4484_v32 = vunpack.i.h.bf16 %v6802_v15  ;;  %v738_v42 = vsel %vm730_vm9, %v736_v57, %v737_v37  ;;  %v5444_v27 = vld [vmem:[#allocation2 + $0x88] sm:$0xff] }
 0x225   : > { %v2789_v48 = vpack.c.bf16 %v2406_v54, %v2405_v63  ;;  %v2334_v41 = vsel %vm2305_vm5, %v2301_v53, %v4468_v51  ;;  %v9714_v53 = vld [vmem:[#allocation90_spill] sm:$0xff]  ;;  %v7276_v0 = vpack.i.bf16 %v740_v24, %v738_v42  ;;  %v742_v57 = vrot.slane %v7281_v26, 5 }
 0x226   : > { %4866 = vrot.lane.b32.xlu1 %v6591_v5, %s5604_s13  ;;  %v744_v37 = vrot.slane %v5444_v27, 5  ;;  %v754_v63 = vrot.slane %v6911_v14, 5  ;;  %v2342_v54 = vsel %vm2338_vm6, %v2309_v59, %v4484_v32  ;;  %v4875_v24 = vpack.i.bf16 %v735_v4, %v733_v36  ;;  %v7294_v27 = vld [vmem:[#allocation2 + $0x90] sm:$0xff]  ;;  %v5447_v59 = vld [vmem:[#allocation2 + $0xa0] sm:$0xff] }
 0x227   : > { %4861 = vrot.lane.b32.xlu0 %v6597_v35, %s5604_s13  ;;  %3041 = vmatmul.bf16.vlgmr.msra.gmra.mxu0 %v2789_v48  ;;  %v7278_v48 = vld [vmem:[#allocation2 + $0x78] sm:$0xff]  ;;  %v746_v15 = vrot.slane %v7294_v27, 5  ;;  %v747_v14 = vrot.slane %v7297_v9, 5  ;;  %v749_v32 = vrot.slane %v5447_v59, 5  ;;  %v4644_v4 = vunpack.i.h.bf16 %v7226_v16 }
 0x228   : > { %v7265_v55 = vpop.permute.xlu1 %4656  ;;  %v741_v51 = vrot.slane %v7278_v48, 5  ;;  %v745_v36 = vsel %vm730_vm9, %v742_v57, %v744_v37  ;;  %v4643_v5 = vunpack.i.l.bf16 %v7226_v16  ;;  %v753_v35 = vsel %vm730_vm9, %v751_v38, %v752_v21 }
 0x229   : > { %v7274_v56 = vpop.permute.xlu0 %4651  ;;  %v7291_v42 = vpop.permute.xlu2 %4691  ;;  %v2367_v59 = vsel %vm2338_vm6, %v2334_v41, %v4548_v22  ;;  %v748_v16 = vsel %vm730_vm9, %v746_v15, %v747_v14  ;;  %v750_v37 = vsel %vm730_vm9, %v747_v14, %v749_v32  ;;  %v2374_v38 = vsel %vm2371_vm7, %v2341_v50, %v4563_v29  ;;  %v7334_v50 = vld [vmem:[#allocation2 + $0x100] sm:$0xff] }
 0x22a   : > { %4856 = vrot.lane.b32.xlu2 %v9714_v53, %s5604_s13  ;;  %9715 = vst [vmem:[#allocation122_spill] sm:$0xff] %v7291_v42  ;;  %v743_v30 = vsel %vm730_vm9, %v741_v51, %v742_v57  ;;  %v755_v53 = vsel %vm730_vm9, %v752_v21, %v754_v63  ;;  %v2368_v57 = vsel %vm2338_vm6, %v2335_v8, %v4549_v2  ;;  %v9717_v21 = vld [vmem:[#allocation135_spill] sm:$0xff]  ;;  %v7331_v2 = vld [vmem:[#allocation2 + $0xf8] sm:$0xff]  ;;  %v769_v14 = vrot.slane %v7334_v50, 5 }
 0x22b   : > { %v7324_v63 = vpack.i.bf16 %v745_v36, %v743_v30  ;;  %v7326_v40 = vpack.i.bf16 %v755_v53, %v753_v35  ;;  %v2375_v22 = vsel %vm2371_vm7, %v2342_v54, %v4564_v19  ;;  %v2407_v8 = vsel %vm2404_vm8, %v2374_v38, %v4643_v5  ;;  %v5451_v19 = vld [vmem:[#allocation2 + $0xd8] sm:$0xff] }
 0x22c   : > { %v2408_v15 = vsel %vm2404_vm8, %v2375_v22, %v4644_v4  ;;  %v767_v29 = vrot.slane %v7331_v2, 5  ;;  %v2400_v32 = vsel %vm2371_vm7, %v2367_v59, %v4628_v43  ;;  %v2401_v35 = vsel %vm2371_vm7, %v2368_v57, %v4629_v60  ;;  %v7341_v4 = vld [vmem:[#allocation2 + $0xe0] sm:$0xff]  ;;  %v7344_v22 = vld [vmem:[#allocation2 + $0xe8] sm:$0xff] }
 0x22d   : > { %v7339_v54 = vpack.i.bf16 %v750_v37, %v748_v16  ;;  %v761_v30 = vrot.slane %v5451_v19, 5  ;;  %v762_v38 = vrot.slane %v7341_v4, 5  ;;  %v2792_v43 = vpack.c.bf16 %v2408_v15, %v2407_v8  ;;  %v7349_v59 = vld [vmem:[#allocation2 + $0xc0] sm:$0xff]  ;;  %v7352_v57 = vld [vmem:[#allocation2 + $0xc8] sm:$0xff]  ;;  %v7355_v37 = vld [vmem:[#allocation2 + $0xd0] sm:$0xff] }
 0x22e   : > { %4881 = vrot.lane.b32.xlu1 %v7276_v0, %s5605_s15  ;;  %9718 = vst [vmem:[#allocation45_spill] sm:$0xff] %v7349_v59  ;;  %v756_v60 = vrot.slane %v7349_v59, 5  ;;  %v757_v16 = vrot.slane %v7352_v57, 5  ;;  %v9721_v15 = vunpack.i.l.bf16 %v6811_v3  ;;  %v2343_v3 = vsel %vm2338_vm6, %v7201_v49, %v4488_v17  ;;  %v9727_v49 = vld [vmem:[#allocation113_spill] sm:$0xff] }
 0x22f   : > { %4876 = vrot.lane.b32.xlu0 %v4875_v24, %s5605_s15  ;;  %v5448_v24 = vld [vmem:[#allocation2 + $0xf0] sm:$0xff]  ;;  %v2344_v44 = vsel %vm2338_vm6, %v7197_v13, %v9724_v23  ;;  %v7401_v13 = vld [vmem:[#allocation2 + $0x148] sm:$0xff] }
 0x230   : > { %v7314_v51 = vpop.permute.xlu1 %4671  ;;  %v766_v42 = vrot.slane %v5448_v24, 5  ;;  %v764_v24 = vrot.slane %v7344_v22, 5  ;;  %v2332_v39 = vsel %vm2305_vm5, %v7217_v25, %v9721_v15  ;;  %v4648_v15 = vunpack.i.l.bf16 %v7159_v33 }
 0x231   : > { %9716 = vst [vmem:[#allocation125_spill] sm:$0xff] %v7314_v51  ;;  %v7322_v41 = vpop.permute.xlu0 %4666  ;;  %v4707_v53 = vpop.permute.xlu2 %4706 }
 0x232   : > { %4871 = vrot.lane.b32.xlu2 %v9717_v21, %s5604_s13  ;;  %v4709_v5 = vunpack.i.h.bf16 %v4707_v53  ;;  %v4708_v36 = vunpack.i.l.bf16 %v4707_v53  ;;  %v759_v53 = vrot.slane %v7355_v37, 5  ;;  %v768_v19 = vsel %vm730_vm9, %v766_v42, %v767_v29  ;;  %s4097_s13 = sshll.u32 %s5662_s22, 5 }
 0x233   : > { %v770_v21 = vsel %vm730_vm9, %v767_v29, %v769_v14  ;;  %v4568_v42 = vunpack.i.l.bf16 %v7029_v28  ;;  %v765_v25 = vsel %vm730_vm9, %v762_v38, %v764_v24  ;;  %v782_v24 = vrot.slane %v9727_v49, 5  ;;  %v7415_v49 = vld [vmem:[#allocation2 + $0x130] sm:$0xff] }
 0x234   : > { %v7361_v34 = vsel %vm2404_vm8, %v2400_v32, %v4708_v36  ;;  %v7364_v8 = vsel %vm2404_vm8, %v2401_v35, %v4709_v5  ;;  %v763_v32 = vsel %vm730_vm9, %v761_v30, %v762_v38  ;;  %v4544_v35 = vunpack.i.h.bf16 %v6896_v31 }
 0x235   : > { %9719 = vst [vmem:[#allocation174_spill] sm:$0xff] %v7361_v34  ;;  %v4543_v5 = vunpack.i.l.bf16 %v6896_v31  ;;  %v758_v30 = vsel %vm730_vm9, %v756_v60, %v757_v16  ;;  %v7396_v38 = vpack.i.bf16 %v770_v21, %v768_v19  ;;  %v760_v17 = vsel %vm730_vm9, %v757_v16, %v759_v53  ;;  %v5458_v16 = vld [vmem:[#allocation2 + $0x120] sm:$0xff]  ;;  %v7412_v53 = vld [vmem:[#allocation2 + $0x128] sm:$0xff] }
 0x236   : > { %4896 = vrot.lane.b32.xlu1 %v7326_v40, %s5605_s15  ;;  %9720 = vst [vmem:[#allocation175_spill] sm:$0xff] %v7364_v8  ;;  %v4569_v31 = vunpack.i.h.bf16 %v7029_v28  ;;  %v7408_v14 = vpack.i.bf16 %v765_v25, %v763_v32  ;;  %v2376_v21 = vsel %vm2371_vm7, %v2343_v3, %v4568_v42  ;;  %v4649_v60 = vunpack.i.h.bf16 %v7159_v33  ;;  %v5461_v33 = vld [vmem:[#allocation2 + $0x108] sm:$0xff]  ;;  %v7424_v25 = vld [vmem:[#allocation2 + $0x110] sm:$0xff] }
 0x237   : > { %4891 = vrot.lane.b32.xlu0 %v7339_v54, %s5605_s15  ;;  %3046 = vmatmul.bf16.gmra.mxu0 %v2792_v43  ;;  %9726 = vst [vmem:[#allocation178_spill] sm:$0xff] %v7396_v38  ;;  %v784_v43 = vrot.slane %v7401_v13, 5  ;;  %v776_v52 = vrot.slane %v5458_v16, 5  ;;  %v777_v19 = vrot.slane %v7412_v53, 5  ;;  %v779_v28 = vrot.slane %v7415_v49, 5  ;;  %v7427_v16 = vld [vmem:[#allocation2 + $0x118] sm:$0xff] }
 0x238   : > { %v7377_v29 = vpop.permute.xlu1 %4686  ;;  %9728 = vst [vmem:[#allocation113_spill] sm:$0xff] %v7412_v53  ;;  %v4624_v34 = vunpack.i.h.bf16 %v7192_v1  ;;  %v4623_v8 = vunpack.i.l.bf16 %v7192_v1  ;;  %v7420_v32 = vpack.i.bf16 %v760_v17, %v758_v30  ;;  %v771_v42 = vrot.slane %v5461_v33, 5 }
 0x239   : > { %9723 = vst [vmem:[#allocation176_spill] sm:$0xff] %v7377_v29  ;;  %v7393_v36 = vpop.permute.xlu0 %4681  ;;  %v7406_v23 = vpop.permute.xlu2 %4721  ;;  %v772_v3 = vrot.slane %v7424_v25, 5  ;;  %v774_v29 = vrot.slane %v7427_v16, 5  ;;  %v785_v11 = vsel %vm730_vm9, %v782_v24, %v784_v43  ;;  %v2365_v1 = vsel %vm2338_vm6, %v2332_v39, %v4543_v5 }
 0x23a   : > { %4886 = vrot.lane.b32.xlu2 %v7324_v63, %s5605_s15  ;;  %9725 = vst [vmem:[#allocation177_spill] sm:$0xff] %v7393_v36  ;;  %v783_v36 = vsel %vm730_vm9, %v781_v20, %v782_v24  ;;  %v2366_v30 = vsel %vm2338_vm6, %v2333_v12, %v4544_v35  ;;  %v2377_v33 = vsel %vm2371_vm7, %v2344_v44, %v4569_v31 }
 0x23b   : > { %v2409_v59 = vsel %vm2404_vm8, %v2376_v21, %v4648_v15  ;;  %v778_v53 = vsel %vm730_vm9, %v776_v52, %v777_v19  ;;  %v780_v20 = vsel %vm730_vm9, %v777_v19, %v779_v28  ;;  %v2398_v24 = vsel %vm2371_vm7, %v2365_v1, %v4623_v8  ;;  %v9738_v28 = vld [vmem:[#allocation167_spill] sm:$0xff]  ;;  %v9739_v1 = vld [vmem:[#allocation42_spill] sm:$0xff] }
 0x23c   : > { %v2399_v39 = vsel %vm2371_vm7, %v2366_v30, %v4624_v34  ;;  %v7446_v35 = vpack.i.bf16 %v785_v11, %v783_v36  ;;  %v2410_v44 = vsel %vm2404_vm8, %v2377_v33, %v4649_v60  ;;  %v773_v5 = vsel %vm730_vm9, %v771_v42, %v772_v3  ;;  %v9733_v34 = vld [vmem:[#allocation150_spill] sm:$0xff] }
 0x23d   : > { %v775_v43 = vsel %vm730_vm9, %v772_v3, %v774_v29  ;;  %v4394_v15 = vunpack.i.h.bf16 %v9733_v34  ;;  %v4393_v21 = vunpack.i.l.bf16 %v9733_v34  ;;  %v7461_v11 = vpack.i.bf16 %v780_v20, %v778_v53  ;;  %v9736_v29 = vld [vmem:[#allocation106_spill] sm:$0xff]  ;;  %v9742_v34 = vld [vmem:[#allocation108_spill] sm:$0xff] }
 0x23e   : > { %4911 = vrot.lane.b32.xlu1 %v7396_v38, %s5605_s15  ;;  %9730 = vst [vmem:[#allocation180_spill] sm:$0xff] %v7446_v35  ;;  %v9735_v60 = vunpack.i.h.bf16 %v6609_v10  ;;  %v9737_v19 = vunpack.i.l.bf16 %v6677_v62  ;;  %v4474_v42 = vunpack.i.h.bf16 %v9738_v28  ;;  %v4473_v3 = vunpack.i.l.bf16 %v9738_v28  ;;  %v9743_v28 = vld [vmem:[#allocation102_spill] sm:$0xff] }
 0x23f   : > { %4906 = vrot.lane.b32.xlu0 %v7408_v14, %s5605_s15  ;;  %9734 = vst [vmem:[#allocation150_spill] sm:$0xff] %v7461_v11  ;;  %v4554_v53 = vunpack.i.h.bf16 %v9739_v1  ;;  %v4553_v30 = vunpack.i.l.bf16 %v9739_v1  ;;  %v2795_v33 = vpack.c.bf16 %v2410_v44, %v2409_v59  ;;  %v9740_v20 = vunpack.i.h.bf16 %v6677_v62  ;;  %v9745_v44 = vld [vmem:[#allocation103_spill] sm:$0xff] }
 0x240   : > { %v4702_v17 = vpop.permute.xlu1 %4701  ;;  %v4634_v1 = vunpack.i.h.bf16 %v9743_v28  ;;  %v4633_v59 = vunpack.i.l.bf16 %v9743_v28 }
 0x241   : > { %v4704_v38 = vunpack.i.h.bf16 %v4702_v17  ;;  %v4703_v51 = vunpack.i.l.bf16 %v4702_v17  ;;  %v7444_v12 = vpop.permute.xlu0 %4696  ;;  %v7459_v52 = vpop.permute.xlu2 %4736  ;;  %v7477_v17 = vpack.i.bf16 %v775_v43, %v773_v5 }
 0x242   : > { %4901 = vrot.lane.b32.xlu2 %v7420_v32, %s5605_s15  ;;  %9729 = vst [vmem:[#allocation179_spill] sm:$0xff] %v7444_v12 }
 0x243   : > { %v7452_v31 = vsel %vm2404_vm8, %v2398_v24, %v4703_v51  ;;  %v7455_v8 = vsel %vm2404_vm8, %v2399_v39, %v4704_v38  ;;  %v2247_v51 = vsel %vm2239_vm3, %v9736_v29, %v9735_v60  ;;  %v2270_v38 = vsel %vm2239_vm3, %v7152_v61, %v9737_v19  ;;  %v9741_v61 = vld [vmem:[#allocation109_spill] sm:$0xff] }
 0x244   : > { %9731 = vst [vmem:[#allocation181_spill] sm:$0xff] %v7452_v31  ;;  %v2271_v24 = vsel %vm2239_vm3, %v7149_v46, %v9740_v20  ;;  %v786_v39 = vrot.slane %v9741_v61, 5  ;;  %v787_v60 = vrot.slane %v9742_v34, 5  ;;  %v7487_v29 = vld [vmem:[#allocation2 + $0x160] sm:$0xff]  ;;  %v2303_v43 = vsel %vm2272_vm4, %v2270_v38, %v4393_v21  ;;  %v9746_v61 = vld [vmem:[#allocation142_spill] sm:$0xff] }
 0x245   : > { %9732 = vst [vmem:[#allocation182_spill] sm:$0xff] %v7455_v8  ;;  %v789_v19 = vrot.slane %v7487_v29, 5  ;;  %v2304_v5 = vsel %vm2272_vm4, %v2271_v24, %v4394_v15  ;;  %v9744_v46 = vunpack.i.l.bf16 %v6609_v10  ;;  %v4334_v36 = vunpack.i.h.bf16 %v9746_v61  ;;  %v9747_v24 = vld [vmem:[#allocation156_spill] sm:$0xff] }
 0x246   : > { %4926 = vrot.lane.b32.xlu1 %v7446_v35, %s5605_s15  ;;  %v2336_v15 = vsel %vm2305_vm5, %v2303_v43, %v4473_v3  ;;  %v2337_v21 = vsel %vm2305_vm5, %v2304_v5, %v4474_v42  ;;  %v4333_v38 = vunpack.i.l.bf16 %v9746_v61  ;;  %v4414_v28 = vunpack.i.h.bf16 %v9747_v24 }
 0x247   : > { %4921 = vrot.lane.b32.xlu0 %v7461_v11, %s5605_s15  ;;  %3051 = vmatmul.bf16.gmra.mxu0 %v2795_v33  ;;  %v2246_v20 = vsel %vm2239_vm3, %v9745_v44, %v9744_v46  ;;  %v2369_v31 = vsel %vm2338_vm6, %v2336_v15, %v4553_v30  ;;  %v2370_v33 = vsel %vm2338_vm6, %v2337_v21, %v4554_v53  ;;  %v4413_v42 = vunpack.i.l.bf16 %v9747_v24  ;;  %v9748_v30 = vld [vmem:[#allocation169_spill] sm:$0xff] }
 0x248   : > { %v7496_v62 = vpop.permute.xlu1 %4716  ;;  %v788_v44 = vsel %vm730_vm9, %v786_v39, %v787_v60  ;;  %v790_v3 = vsel %vm730_vm9, %v787_v60, %v789_v19  ;;  %v2402_v5 = vsel %vm2371_vm7, %v2369_v31, %v4633_v59  ;;  %v2403_v43 = vsel %vm2371_vm7, %v2370_v33, %v4634_v1  ;;  %v9751_v39 = vld [vmem:[#allocation58_spill] sm:$0xff] }
 0x249   : > { %v4712_v10 = vpop.permute.xlu0 %4711  ;;  %v7516_v61 = vpop.permute.xlu2 %4751  ;;  %v4494_v53 = vunpack.i.h.bf16 %v9748_v30  ;;  %v4493_v15 = vunpack.i.l.bf16 %v9748_v30  ;;  %v4574_v60 = vunpack.i.h.bf16 %v9751_v39  ;;  %v4573_v19 = vunpack.i.l.bf16 %v9751_v39  ;;  %v9753_v31 = vld [vmem:[#allocation162_spill] sm:$0xff] }
 0x24a   : > { %4916 = vrot.lane.b32.xlu2 %v7477_v17, %s5605_s15  ;;  %v4714_v8 = vunpack.i.h.bf16 %v4712_v10  ;;  %v4713_v46 = vunpack.i.l.bf16 %v4712_v10  ;;  %v7528_v24 = vpack.i.bf16 %v790_v3, %v788_v44  ;;  %v2280_v59 = vsel %vm2272_vm4, %v2247_v51, %v4334_v36 }
 0x24b   : > { %v2279_v33 = vsel %vm2272_vm4, %v2246_v20, %v4333_v38  ;;  %v9754_v20 = vld [vmem:[#allocation100_spill] sm:$0xff]  ;;  %v4658_v11 = vunpack.i.l.bf16 %v7265_v55 }
 0x24c   : > { %v7521_v21 = vsel %vm2404_vm8, %v2402_v5, %v4713_v46  ;;  %v7524_v10 = vsel %vm2404_vm8, %v2403_v43, %v4714_v8  ;;  %9752 = vst [vmem:[#allocation42_spill] sm:$0xff] %v7528_v24  ;;  %v4654_v46 = vunpack.i.h.bf16 %v7274_v56  ;;  %v4653_v8 = vunpack.i.l.bf16 %v7274_v56 }
 0x24d   : > { %9749 = vst [vmem:[#allocation106_spill] sm:$0xff] %v7521_v21  ;;  %v2312_v5 = vsel %vm2305_vm5, %v2279_v33, %v4413_v42  ;;  %v2313_v43 = vsel %vm2305_vm5, %v2280_v59, %v4414_v28  ;;  %v4179_v38 = vunpack.i.h.bf16 %v9754_v20  ;;  %v4178_v39 = vunpack.i.l.bf16 %v9754_v20  ;;  %v9756_v33 = vld [vmem:[#allocation111_spill] sm:$0xff]  ;;  %v9766_v21 = vld [vmem:[#allocation136_spill] sm:$0xff] }
 0x24e   : > { %9750 = vst [vmem:[#allocation167_spill] sm:$0xff] %v7524_v10  ;;  %4941 = vrot.lane.b32.xlu1 %v9753_v31, %s5606_s16  ;;  %v2345_v3 = vsel %vm2338_vm6, %v2312_v5, %v4493_v15  ;;  %v2346_v30 = vsel %vm2338_vm6, %v2313_v43, %v4494_v53  ;;  %v9755_v15 = vld [vmem:[#allocation101_spill] sm:$0xff]  ;;  %v4194_v5 = vunpack.i.h.bf16 %v9756_v33  ;;  %v9757_v43 = vld [vmem:[#allocation112_spill] sm:$0xff]  ;;  %v4268_v10 = vunpack.i.l.bf16 %v9766_v21 }
 0x24f   : > { %4936 = vrot.lane.b32.xlu0 %v7324_v63, %s5603_s29  ;;  %v2378_v56 = vsel %vm2371_vm7, %v2345_v3, %v4573_v19  ;;  %v2379_v51 = vsel %vm2371_vm7, %v2346_v30, %v4574_v60  ;;  %v4184_v31 = vunpack.i.h.bf16 %v9755_v15  ;;  %v4183_v53 = vunpack.i.l.bf16 %v9755_v15  ;;  %v9758_v3 = vld [vmem:[#allocation48_spill] sm:$0xff]  ;;  %v9759_v30 = vld [vmem:[#allocation119_spill] sm:$0xff] }
 0x250   : > { %v7542_v44 = vpop.permute.xlu1 %4731  ;;  %v2411_v28 = vsel %vm2404_vm8, %v2378_v56, %v4653_v8  ;;  %v2412_v42 = vsel %vm2404_vm8, %v2379_v51, %v4654_v46  ;;  %v4193_v19 = vunpack.i.l.bf16 %v9756_v33  ;;  %v4189_v60 = vunpack.i.h.bf16 %v9757_v43 }
 0x251   : > { %v7548_v36 = vpop.permute.xlu0 %4726  ;;  %v7558_v59 = vpop.permute.xlu2 %4766  ;;  %v2798_v8 = vpack.c.bf16 %v2412_v42, %v2411_v28  ;;  %v2216_v46 = vsel %vm278_vm0, %v7239_v18, %v4179_v38  ;;  %v4259_v56 = vunpack.i.h.bf16 %v9759_v30  ;;  %v4258_v51 = vunpack.i.l.bf16 %v9759_v30  ;;  %v9760_v38 = vld [vmem:[#allocation107_spill] sm:$0xff] }
 0x252   : > { %4931 = vrot.lane.b32.xlu2 %v7528_v24, %s5605_s15  ;;  %v2215_v20 = vsel %vm278_vm0, %v7236_v45, %v4178_v39  ;;  %v7573_v15 = vsel %vm278_vm0, %v7281_v26, %v4184_v31  ;;  %v7577_v33 = vsel %vm278_vm0, %v7278_v48, %v4183_v53  ;;  %v2222_v45 = vsel %vm278_vm0, %v6908_v7, %v4194_v5  ;;  %v9761_v31 = vld [vmem:[#allocation146_spill] sm:$0xff]  ;;  %v9762_v53 = vld [vmem:[#allocation25_spill] sm:$0xff]  ;;  %v9763_v5 = vld [vmem:[#allocation155_spill] sm:$0xff] }
 0x253   : > { %v2221_v26 = vsel %vm278_vm0, %v6905_v47, %v4193_v19  ;;  %v2220_v48 = vsel %vm278_vm0, %v7297_v9, %v4189_v60  ;;  %v4188_v39 = vunpack.i.l.bf16 %v9757_v43  ;;  %v2248_v30 = vsel %vm2239_vm3, %v2215_v20, %v4258_v51  ;;  %v9764_v19 = vld [vmem:[#allocation127_spill] sm:$0xff]  ;;  %v9765_v43 = vld [vmem:[#allocation164_spill] sm:$0xff]  ;;  %v9767_v20 = vld [vmem:[#allocation65_spill] sm:$0xff] }
 0x254   : > { %v2249_v1 = vsel %vm2239_vm3, %v2216_v46, %v4259_v56  ;;  %v4339_v7 = vunpack.i.h.bf16 %v9761_v31  ;;  %v4418_v47 = vunpack.i.l.bf16 %v9763_v5  ;;  %v4274_v42 = vunpack.i.h.bf16 %v9764_v19 }
 0x255   : > { %v4419_v9 = vunpack.i.h.bf16 %v9763_v5  ;;  %v4498_v60 = vunpack.i.l.bf16 %v9765_v43  ;;  %v4499_v51 = vunpack.i.h.bf16 %v9765_v43  ;;  %v4578_v46 = vunpack.i.l.bf16 %v9767_v20  ;;  %v9768_v5 = vld [vmem:[#allocation39_spill] sm:$0xff] }
 0x256   : > { %4956 = vrot.lane.b32.xlu1 %v9758_v3, %s5609_s8  ;;  %v4269_v56 = vunpack.i.h.bf16 %v9766_v21  ;;  %v4579_v12 = vunpack.i.h.bf16 %v9767_v20  ;;  %v2282_v24 = vsel %vm2272_vm4, %v2249_v1, %v4339_v7  ;;  %v2219_v43 = vsel %vm278_vm0, %v7294_v27, %v4188_v39  ;;  %v9769_v39 = vld [vmem:[#allocation137_spill] sm:$0xff] }
 0x257   : > { %4951 = vrot.lane.b32.xlu0 %v7276_v0, %s5608_s26  ;;  %3056 = vmatmul.bf16.gmra.mxu0 %v2798_v8  ;;  %v4338_v0 = vunpack.i.l.bf16 %v9761_v31  ;;  %v7622_v21 = vsel %vm2239_vm3, %v2222_v45, %v4274_v42  ;;  %v4719_v45 = vunpack.i.h.bf16 %v7496_v62 }
 0x258   : > { %v7581_v18 = vpop.permute.xlu1 %4746 }
 0x259   : > { %v7595_v8 = vpop.permute.xlu0 %4741  ;;  %v7604_v28 = vpop.permute.xlu2 %4781  ;;  %v2281_v31 = vsel %vm2272_vm4, %v2248_v30, %v4338_v0  ;;  %v2315_v0 = vsel %vm2305_vm5, %v2282_v24, %v4419_v9  ;;  %v4718_v24 = vunpack.i.l.bf16 %v7496_v62  ;;  %v9771_v62 = vld [vmem:[#allocation145_spill] sm:$0xff] }
 0x25a   : > { %4946 = vrot.lane.b32.xlu2 %v9762_v53, %s5607_s17  ;;  %v4273_v53 = vunpack.i.l.bf16 %v9764_v19  ;;  %v2314_v35 = vsel %vm2305_vm5, %v2281_v31, %v4418_v47  ;;  %v4659_v19 = vunpack.i.h.bf16 %v7265_v55  ;;  %v7634_v55 = vsel %vm2239_vm3, %v2219_v43, %v4268_v10 }
 0x25b   : > { %v2347_v1 = vsel %vm2338_vm6, %v2314_v35, %v4498_v60  ;;  %v2348_v27 = vsel %vm2338_vm6, %v2315_v0, %v4499_v51  ;;  %v4263_v10 = vunpack.i.l.bf16 %v9769_v39  ;;  %v4264_v60 = vunpack.i.h.bf16 %v9769_v39 }
 0x25c   : > { %v7631_v7 = vsel %vm2239_vm3, %v2221_v26, %v4273_v53  ;;  %v2380_v42 = vsel %vm2371_vm7, %v2347_v1, %v4578_v46  ;;  %v2381_v35 = vsel %vm2371_vm7, %v2348_v27, %v4579_v12  ;;  %v2253_v26 = vsel %vm2239_vm3, %v2220_v48, %v4269_v56  ;;  %v9770_v53 = vld [vmem:[#allocation143_spill] sm:$0xff] }
 0x25d   : > { %v2413_v47 = vsel %vm2404_vm8, %v2380_v42, %v4658_v11  ;;  %v2414_v9 = vsel %vm2404_vm8, %v2381_v35, %v4659_v19  ;;  %v4349_v51 = vunpack.i.h.bf16 %v9770_v53  ;;  %v4344_v20 = vunpack.i.h.bf16 %v9771_v62 }
 0x25e   : > { %4971 = vrot.lane.b32.xlu1 %v9768_v5, %s5607_s17  ;;  %v4343_v31 = vunpack.i.l.bf16 %v9771_v62  ;;  %v9772_v5 = vld [vmem:[#allocation153_spill] sm:$0xff]  ;;  %v2438_v48 = vsel %vm278_vm0, %v7355_v37, %v4719_v45  ;;  %v2437_v11 = vsel %vm278_vm0, %v7352_v57, %v4718_v24  ;;  %v2801_v56 = vpack.c.bf16 %v2414_v9, %v2413_v47  ;;  %v9774_v45 = vld [vmem:[#allocation139_spill] sm:$0xff] }
 0x25f   : > { %4966 = vrot.lane.b32.xlu0 %v9758_v3, %s5606_s16  ;;  %v4423_v43 = vunpack.i.l.bf16 %v9772_v5  ;;  %v2250_v19 = vsel %vm2239_vm3, %v7577_v33, %v4263_v10  ;;  %v4424_v1 = vunpack.i.h.bf16 %v9772_v5  ;;  %v2251_v37 = vsel %vm2239_vm3, %v7573_v15, %v4264_v60  ;;  %v9775_v47 = vld [vmem:[#allocation173_spill] sm:$0xff] }
 0x260   : > { %v7627_v30 = vpop.permute.xlu1 %4761  ;;  %v4348_v39 = vunpack.i.l.bf16 %v9770_v53  ;;  %v2286_v10 = vsel %vm2272_vm4, %v2253_v26, %v4349_v51  ;;  %v2283_v9 = vsel %vm2272_vm4, %v2250_v19, %v4343_v31  ;;  %v2284_v62 = vsel %vm2272_vm4, %v2251_v37, %v4344_v20  ;;  %v9777_v26 = vld [vmem:[#allocation159_spill] sm:$0xff]  ;;  %v9778_v31 = vld [vmem:[#allocation172_spill] sm:$0xff] }
 0x261   : > { %v7642_v3 = vpop.permute.xlu0 %4756  ;;  %v4797_v46 = vpop.permute.xlu2 %4796  ;;  %v2316_v60 = vsel %vm2305_vm5, %v2283_v9, %v4423_v43  ;;  %v4734_v5 = vunpack.i.h.bf16 %v7542_v44  ;;  %v4733_v53 = vunpack.i.l.bf16 %v7542_v44  ;;  %v4429_v51 = vunpack.i.h.bf16 %v9777_v26  ;;  %v9779_v43 = vld [vmem:[#allocation63_spill] sm:$0xff] }
 0x262   : > { %4961 = vrot.lane.b32.xlu2 %v7339_v54, %s5603_s29  ;;  %v4799_v12 = vunpack.i.h.bf16 %v4797_v46  ;;  %v4798_v0 = vunpack.i.l.bf16 %v4797_v46  ;;  %v9776_v46 = vld [vmem:[#allocation149_spill] sm:$0xff]  ;;  %v4503_v20 = vunpack.i.l.bf16 %v9778_v31  ;;  %v4583_v19 = vunpack.i.l.bf16 %v9779_v43 }
 0x263   : > { %v4353_v15 = vunpack.i.l.bf16 %v9776_v46  ;;  %v4664_v37 = vunpack.i.h.bf16 %v7205_v6  ;;  %v2444_v35 = vsel %vm278_vm0, %v7427_v16, %v4734_v5  ;;  %v4354_v16 = vunpack.i.h.bf16 %v9776_v46 }
 0x264   : > { %v7664_v27 = vsel %vm2239_vm3, %v2438_v48, %v4799_v12  ;;  %v7667_v42 = vsel %vm2239_vm3, %v2437_v11, %v4798_v0  ;;  %v2317_v0 = vsel %vm2305_vm5, %v2284_v62, %v4424_v1  ;;  %v4504_v48 = vunpack.i.h.bf16 %v9778_v31  ;;  %v9780_v1 = vld [vmem:[#allocation171_spill] sm:$0xff] }
 0x265   : > { %9773 = vst [vmem:[#allocation109_spill] sm:$0xff] %v7664_v27  ;;  %v4428_v11 = vunpack.i.l.bf16 %v9777_v26  ;;  %v4508_v62 = vunpack.i.l.bf16 %v9780_v1  ;;  %v2443_v31 = vsel %vm278_vm0, %v7424_v25, %v4733_v53  ;;  %v2285_v27 = vsel %vm2272_vm4, %v7634_v55, %v4348_v39 }
 0x266   : > { %4986 = vrot.lane.b32.xlu1 %v7326_v40, %s5603_s29 }
 0x267   : > { %4981 = vrot.lane.b32.xlu0 %v9775_v47, %s5609_s8  ;;  %3061 = vmatmul.bf16.gmra.mxu0 %v2801_v56  ;;  %v4584_v56 = vunpack.i.h.bf16 %v9779_v43  ;;  %v2318_v39 = vsel %vm2305_vm5, %v2285_v27, %v4428_v11  ;;  %v4668_v27 = vunpack.i.l.bf16 %v7322_v41 }
 0x268   : > { %v7676_v33 = vpop.permute.xlu1 %4776 }
 0x269   : > { %v7687_v12 = vpop.permute.xlu0 %4771 }
 0x26a   : > { %4976 = vrot.lane.b32.xlu2 %v7324_v63, %s5608_s26  ;;  %v4663_v63 = vunpack.i.l.bf16 %v7205_v6  ;;  %v2349_v6 = vsel %vm2338_vm6, %v2316_v60, %v4503_v20  ;;  %v9781_v60 = vld [vmem:[#allocation158_spill] sm:$0xff] }
 0x26b   : > { %v4433_v53 = vunpack.i.l.bf16 %v9781_v60 }
 0x26c   : > { %v4812_v44 = vpop.permute.xlu2 %4811 }
 0x26d   : > { %v4814_v9 = vunpack.i.h.bf16 %v4812_v44  ;;  %v4813_v24 = vunpack.i.l.bf16 %v4812_v44  ;;  %v2350_v44 = vsel %vm2338_vm6, %v2317_v0, %v4504_v48  ;;  %v4748_v48 = vunpack.i.l.bf16 %v7581_v18 }
 0x26e   : > { %5001 = vrot.lane.b32.xlu1 %v7339_v54, %s5608_s26  ;;  %v2382_v54 = vsel %vm2371_vm7, %v2349_v6, %v4583_v19 }
 0x26f   : > { %v7706_v26 = vsel %vm2239_vm3, %v2444_v35, %v4814_v9  ;;  %v7709_v43 = vsel %vm2239_vm3, %v2443_v31, %v4813_v24  ;;  %4996 = vrot.lane.b32.xlu0 %v9711_v58, %s5607_s17  ;;  %v2383_v35 = vsel %vm2371_vm7, %v2350_v44, %v4584_v56  ;;  %v7724_v24 = vsel %vm2272_vm4, %v7631_v7, %v4353_v15  ;;  %v9782_v56 = vld [vmem:[#allocation47_spill] sm:$0xff] }
 0x270   : > { %v7718_v5 = vpop.permute.xlu1 %4791  ;;  %v2415_v0 = vsel %vm2404_vm8, %v2382_v54, %v4663_v63  ;;  %v2416_v55 = vsel %vm2404_vm8, %v2383_v35, %v4664_v37  ;;  %v4749_v58 = vunpack.i.h.bf16 %v7581_v18  ;;  %v2319_v7 = vsel %vm2305_vm5, %v2286_v10, %v4429_v51 }
 0x271   : > { %v7734_v20 = vpop.permute.xlu0 %4786  ;;  %v4509_v15 = vunpack.i.h.bf16 %v9780_v1  ;;  %v4588_v19 = vunpack.i.l.bf16 %v9782_v56  ;;  %v2351_v63 = vsel %vm2338_vm6, %v2318_v39, %v4508_v62  ;;  %v4589_v37 = vunpack.i.h.bf16 %v9782_v56  ;;  %v9783_v62 = vld [vmem:[#allocation37_spill] sm:$0xff] }
 0x272   : > { %4991 = vrot.lane.b32.xlu2 %v9775_v47, %s5606_s16  ;;  %v2804_v9 = vpack.c.bf16 %v2416_v55, %v2415_v0  ;;  %v4669_v18 = vunpack.i.h.bf16 %v7322_v41  ;;  %v4729_v47 = vunpack.i.h.bf16 %v7548_v36  ;;  %v4728_v10 = vunpack.i.l.bf16 %v7548_v36 }
 0x273   : > { %v2450_v51 = vsel %vm278_vm0, %v7487_v29, %v4749_v58  ;;  %v2449_v1 = vsel %vm278_vm0, %v9742_v34, %v4748_v48  ;;  %v2352_v54 = vsel %vm2338_vm6, %v2319_v7, %v4509_v15  ;;  %v2384_v35 = vsel %vm2371_vm7, %v2351_v63, %v4588_v19 }
 0x274   : > { %v4827_v11 = vpop.permute.xlu2 %4826  ;;  %v4724_v36 = vunpack.i.h.bf16 %v7406_v23  ;;  %v4723_v29 = vunpack.i.l.bf16 %v7406_v23  ;;  %v2385_v0 = vsel %vm2371_vm7, %v2352_v54, %v4589_v37  ;;  %v7765_v55 = vsel %vm2404_vm8, %v2384_v35, %v4668_v27 }
 0x275   : > { %v4829_v31 = vunpack.i.h.bf16 %v4827_v11  ;;  %v4828_v6 = vunpack.i.l.bf16 %v4827_v11  ;;  %v2442_v39 = vsel %vm278_vm0, %v7334_v50, %v4729_v47  ;;  %v7770_v7 = vsel %vm2404_vm8, %v2385_v0, %v4669_v18 }
 0x276   : > { %5016 = vrot.lane.b32.xlu1 %v9783_v62, %s5606_s16  ;;  %v2441_v23 = vsel %vm278_vm0, %v7331_v2, %v4728_v10  ;;  %v4764_v15 = vunpack.i.h.bf16 %v7627_v30  ;;  %v4763_v56 = vunpack.i.l.bf16 %v7627_v30  ;;  %v2440_v11 = vsel %vm278_vm0, %v7344_v22, %v4724_v36 }
 0x277   : > { %v7752_v44 = vsel %vm2239_vm3, %v2450_v51, %v4829_v31  ;;  %v7755_v41 = vsel %vm2239_vm3, %v2449_v1, %v4828_v6  ;;  %5011 = vrot.lane.b32.xlu0 %v7420_v32, %s5603_s29  ;;  %3066 = vmatmul.bf16.gmra.mxu0 %v2804_v9  ;;  %v2439_v2 = vsel %vm278_vm0, %v7341_v4, %v4723_v29  ;;  %v4744_v30 = vunpack.i.h.bf16 %v7595_v8  ;;  %v7796_v51 = vld [vmem:[#allocation2 + $0x1a8] sm:$0xff]  ;;  %v7800_v1 = vld [vmem:[#allocation2 + $0x1a0] sm:$0xff] }
 0x278   : > { %v4807_v34 = vpop.permute.xlu1 %4806  ;;  %v4743_v10 = vunpack.i.l.bf16 %v7595_v8  ;;  %v2456_v22 = vsel %vm278_vm0, %v7796_v51, %v4764_v15  ;;  %v2455_v4 = vsel %vm278_vm0, %v7800_v1, %v4763_v56  ;;  %v7810_v54 = vsel %vm2272_vm4, %v7622_v21, %v4354_v16 }
 0x279   : > { %v4809_v58 = vunpack.i.h.bf16 %v4807_v34  ;;  %v4808_v48 = vunpack.i.l.bf16 %v4807_v34  ;;  %v4802_v19 = vpop.permute.xlu0 %4801  ;;  %v4434_v8 = vunpack.i.h.bf16 %v9781_v60  ;;  %v7823_v29 = vsel %vm2305_vm5, %v7724_v24, %v4433_v53  ;;  %v9785_v34 = vld [vmem:[#allocation168_spill] sm:$0xff]  ;;  %v5467_v24 = vld [vmem:[#allocation2 + $0x140] sm:$0xff] }
 0x27a   : > { %5006 = vrot.lane.b32.xlu2 %v9783_v62, %s5609_s8  ;;  %v4804_v37 = vunpack.i.h.bf16 %v4802_v19  ;;  %v4803_v27 = vunpack.i.l.bf16 %v4802_v19  ;;  %v9784_v62 = vld [vmem:[#allocation36_spill] sm:$0xff]  ;;  %v4739_v0 = vunpack.i.h.bf16 %v7459_v52  ;;  %v4738_v21 = vunpack.i.l.bf16 %v7459_v52  ;;  %v9786_v52 = vld [vmem:[#allocation35_spill] sm:$0xff] }
 0x27b   : > { %v7779_v63 = vsel %vm2239_vm3, %v2441_v23, %v4808_v48  ;;  %v7782_v50 = vsel %vm2239_vm3, %v2442_v39, %v4809_v58  ;;  %v2448_v39 = vsel %vm278_vm0, %v7401_v13, %v4744_v30  ;;  %v2807_v23 = vpack.c.bf16 %v7770_v7, %v7765_v55  ;;  %v9787_v7 = vld [vmem:[#allocation113_spill] sm:$0xff] }
 0x27c   : > { %v4842_v9 = vpop.permute.xlu2 %4841  ;;  %v7790_v31 = vsel %vm2239_vm3, %v2439_v2, %v4803_v27  ;;  %v7793_v6 = vsel %vm2239_vm3, %v2440_v11, %v4804_v37  ;;  %v2447_v53 = vsel %vm278_vm0, %v5467_v24, %v4743_v10  ;;  %v4779_v15 = vunpack.i.h.bf16 %v7676_v33 }
 0x27d   : > { %v4844_v18 = vunpack.i.h.bf16 %v4842_v9  ;;  %v4843_v47 = vunpack.i.l.bf16 %v4842_v9  ;;  %v4778_v56 = vunpack.i.l.bf16 %v7676_v33  ;;  %v2446_v55 = vsel %vm278_vm0, %v7415_v49, %v4739_v0  ;;  %v5469_v49 = vld [vmem:[#allocation2 + $0x1e8] sm:$0xff] }
 0x27e   : > { %5031 = vrot.lane.b32.xlu1 %v9784_v62, %s5609_s8  ;;  %v2445_v11 = vsel %vm278_vm0, %v9787_v7, %v4738_v21  ;;  %v4759_v33 = vunpack.i.h.bf16 %v7642_v3  ;;  %v4758_v10 = vunpack.i.l.bf16 %v7642_v3  ;;  %v9788_v21 = vld [vmem:[#allocation67_spill] sm:$0xff] }
 0x27f   : > { %v7814_v35 = vsel %vm2239_vm3, %v2456_v22, %v4844_v18  ;;  %v7817_v36 = vsel %vm2239_vm3, %v2455_v4, %v4843_v47  ;;  %5026 = vrot.lane.b32.xlu0 %v7326_v40, %s5608_s26  ;;  %v5468_v22 = vld [vmem:[#allocation2 + $0x1f0] sm:$0xff]  ;;  %v2461_v0 = vsel %vm278_vm0, %v5469_v49, %v4778_v56  ;;  %v4753_v56 = vunpack.i.l.bf16 %v7516_v61  ;;  %v7894_v49 = vld [vmem:[#allocation2 + $0x178] sm:$0xff] }
 0x280   : > { %v4822_v16 = vpop.permute.xlu1 %4821  ;;  %v2462_v4 = vsel %vm278_vm0, %v5468_v22, %v4779_v15 }
 0x281   : > { %v4824_v58 = vunpack.i.h.bf16 %v4822_v16  ;;  %v4823_v48 = vunpack.i.l.bf16 %v4822_v16  ;;  %v4817_v40 = vpop.permute.xlu0 %4816  ;;  %v4513_v16 = vunpack.i.l.bf16 %v9785_v34 }
 0x282   : > { %5021 = vrot.lane.b32.xlu2 %v9786_v52, %s5607_s17  ;;  %v4819_v37 = vunpack.i.h.bf16 %v4817_v40  ;;  %v4818_v27 = vunpack.i.l.bf16 %v4817_v40  ;;  %v4754_v52 = vunpack.i.h.bf16 %v7516_v61  ;;  %v4794_v61 = vunpack.i.h.bf16 %v7718_v5 }
 0x283   : > { %v7840_v19 = vsel %vm2239_vm3, %v2447_v53, %v4823_v48  ;;  %v7843_v13 = vsel %vm2239_vm3, %v2448_v39, %v4824_v58  ;;  %v9789_v39 = vld [vmem:[#allocation105_spill] sm:$0xff] }
 0x284   : > { %v4857_v2 = vpop.permute.xlu2 %4856  ;;  %v7851_v18 = vsel %vm2239_vm3, %v2445_v11, %v4818_v27  ;;  %v7854_v47 = vsel %vm2239_vm3, %v2446_v55, %v4819_v37  ;;  %v4594_v58 = vunpack.i.h.bf16 %v9789_v39  ;;  %v4593_v3 = vunpack.i.l.bf16 %v9789_v39  ;;  %v9792_v53 = vld [vmem:[#allocation125_spill] sm:$0xff]  ;;  %v7876_v27 = vld [vmem:[#allocation2 + $0x190] sm:$0xff] }
 0x285   : > { %v4859_v30 = vunpack.i.h.bf16 %v4857_v2  ;;  %v4858_v9 = vunpack.i.l.bf16 %v4857_v2  ;;  %v4674_v15 = vunpack.i.h.bf16 %v9792_v53  ;;  %v4673_v37 = vunpack.i.l.bf16 %v9792_v53  ;;  %v7880_v2 = vld [vmem:[#allocation2 + $0x188] sm:$0xff] }
 0x286   : > { %5046 = vrot.lane.b32.xlu1 %v9788_v21, %s5607_s17  ;;  %v2454_v55 = vsel %vm278_vm0, %v7876_v27, %v4759_v33  ;;  %v4774_v21 = vunpack.i.h.bf16 %v7687_v12 }
 0x287   : > { %v7864_v48 = vsel %vm2239_vm3, %v2462_v4, %v4859_v30  ;;  %v7867_v24 = vsel %vm2239_vm3, %v2461_v0, %v4858_v9  ;;  %5041 = vrot.lane.b32.xlu0 %v9784_v62, %s5606_s16  ;;  %3071 = vmatmul.bf16.gmra.mxu0 %v2807_v23  ;;  %v2453_v30 = vsel %vm278_vm0, %v7880_v2, %v4758_v10  ;;  %v4793_v62 = vunpack.i.l.bf16 %v7718_v5  ;;  %v7898_v0 = vld [vmem:[#allocation2 + $0x170] sm:$0xff] }
 0x288   : > { %9790 = vst [vmem:[#allocation108_spill] sm:$0xff] %v7864_v48  ;;  %v4837_v40 = vpop.permute.xlu1 %4836  ;;  %v2452_v10 = vsel %vm278_vm0, %v7894_v49, %v4754_v52  ;;  %v2451_v5 = vsel %vm278_vm0, %v7898_v0, %v4753_v56  ;;  %v9793_v56 = vld [vmem:[#allocation178_spill] sm:$0xff] }
 0x289   : > { %9791 = vst [vmem:[#allocation102_spill] sm:$0xff] %v7867_v24  ;;  %v4839_v7 = vunpack.i.h.bf16 %v4837_v40  ;;  %v4838_v11 = vunpack.i.l.bf16 %v4837_v40  ;;  %v4832_v23 = vpop.permute.xlu0 %4831  ;;  %v5487_v24 = vld [vmem:[#allocation2 + $0xf8] sm:$0xff] }
 0x28a   : > { %5036 = vrot.lane.b32.xlu2 %v7408_v14, %s5603_s29  ;;  %v4834_v22 = vunpack.i.h.bf16 %v4832_v23  ;;  %v4833_v4 = vunpack.i.l.bf16 %v4832_v23  ;;  %v5475_v23 = vld [vmem:[#allocation2 + $0x230] sm:$0xff] }
 0x28b   : > { %v7889_v9 = vsel %vm2239_vm3, %v2453_v30, %v4838_v11  ;;  %v7892_v33 = vsel %vm2239_vm3, %v2454_v55, %v4839_v7  ;;  %v4773_v11 = vunpack.i.l.bf16 %v7687_v12  ;;  %v5474_v30 = vld [vmem:[#allocation2 + $0x238] sm:$0xff]  ;;  %v2467_v46 = vsel %vm278_vm0, %v5475_v23, %v4793_v62 }
 0x28c   : > { %v4872_v39 = vpop.permute.xlu2 %4871  ;;  %v7904_v55 = vsel %vm2239_vm3, %v2451_v5, %v4833_v4  ;;  %v7907_v7 = vsel %vm2239_vm3, %v2452_v10, %v4834_v22  ;;  %v2468_v52 = vsel %vm278_vm0, %v5474_v30, %v4794_v61  ;;  %v2321_v4 = vsel %vm2305_vm5, %v7810_v54, %v4434_v8  ;;  %v9796_v10 = vld [vmem:[#allocation33_spill] sm:$0xff] }
 0x28d   : > { %v4874_v53 = vunpack.i.h.bf16 %v4872_v39  ;;  %v4873_v40 = vunpack.i.l.bf16 %v4872_v39  ;;  %v2353_v12 = vsel %vm2338_vm6, %v7823_v29, %v4513_v16  ;;  %v4769_v61 = vunpack.i.h.bf16 %v7558_v59  ;;  %v5476_v16 = vld [vmem:[#allocation2 + $0x1d8] sm:$0xff] }
 0x28e   : > { %5061 = vrot.lane.b32.xlu1 %v9793_v56, %s5603_s29  ;;  %v4768_v62 = vunpack.i.l.bf16 %v7558_v59  ;;  %v9797_v39 = vunpack.i.h.bf16 %v9785_v34  ;;  %v2386_v8 = vsel %vm2371_vm7, %v2353_v12, %v4593_v3  ;;  %v2460_v30 = vsel %vm278_vm0, %v5476_v16, %v4774_v21  ;;  %v7937_v59 = vld [vmem:[#allocation2 + $0x1d0] sm:$0xff]  ;;  %v9798_v21 = vld [vmem:[#allocation148_spill] sm:$0xff] }
 0x28f   : > { %v7919_v5 = vsel %vm2239_vm3, %v2468_v52, %v4874_v53  ;;  %v7922_v22 = vsel %vm2239_vm3, %v2467_v46, %v4873_v40  ;;  %5056 = vrot.lane.b32.xlu0 %v9796_v10, %s5609_s8  ;;  %v2419_v29 = vsel %vm2404_vm8, %v2386_v8, %v4673_v37  ;;  %v2459_v52 = vsel %vm278_vm0, %v7937_v59, %v4773_v11 }
 0x290   : > { %9794 = vst [vmem:[#allocation103_spill] sm:$0xff] %v7919_v5  ;;  %v4852_v60 = vpop.permute.xlu1 %4851  ;;  %v2354_v54 = vsel %vm2338_vm6, %v2321_v4, %v9797_v39  ;;  %v4358_v12 = vunpack.i.l.bf16 %v9798_v21  ;;  %v7955_v39 = vld [vmem:[#allocation2 + $0x1b8] sm:$0xff] }
 0x291   : > { %9795 = vst [vmem:[#allocation142_spill] sm:$0xff] %v7922_v22  ;;  %v4854_v53 = vunpack.i.h.bf16 %v4852_v60  ;;  %v4853_v46 = vunpack.i.l.bf16 %v4852_v60  ;;  %v2387_v40 = vsel %vm2371_vm7, %v2354_v54, %v4594_v58  ;;  %v4847_v34 = vpop.permute.xlu0 %4846  ;;  %v7951_v60 = vld [vmem:[#allocation2 + $0x1c0] sm:$0xff]  ;;  %v9799_v54 = vunpack.i.h.bf16 %v9760_v38  ;;  %v5482_v22 = vld [vmem:[#allocation2 + $0x208] sm:$0xff] }
 0x292   : > { %5051 = vrot.lane.b32.xlu2 %v7420_v32, %s5608_s26  ;;  %v2420_v3 = vsel %vm2404_vm8, %v2387_v40, %v4674_v15  ;;  %v4849_v37 = vunpack.i.h.bf16 %v4847_v34  ;;  %v4848_v4 = vunpack.i.l.bf16 %v4847_v34  ;;  %v2458_v11 = vsel %vm278_vm0, %v7951_v60, %v4769_v61 }
 0x293   : > { %v7945_v23 = vsel %vm2239_vm3, %v2459_v52, %v4853_v46  ;;  %v7948_v58 = vsel %vm2239_vm3, %v2460_v30, %v4854_v53  ;;  %v2457_v32 = vsel %vm278_vm0, %v7955_v39, %v4768_v62  ;;  %v2224_v8 = vsel %vm278_vm0, %v7352_v57, %v9799_v54  ;;  %v9801_v46 = vld [vmem:[#allocation45_spill] sm:$0xff]  ;;  %v4092_v62 = vld [vmem:[%s9217_s1 + $0x78] sm:$0xff]  ;;  %v9805_v54 = vld [vmem:[#allocation154_spill] sm:$0xff] }
 0x294   : > { %v7959_v15 = vpop.permute.xlu2 %4886  ;;  %v9800_v53 = vunpack.i.l.bf16 %v9760_v38  ;;  %v7970_v16 = vsel %vm2239_vm3, %v2457_v32, %v4848_v4  ;;  %v7973_v61 = vsel %vm2239_vm3, %v2458_v11, %v4849_v37  ;;  %v4789_v30 = vunpack.i.h.bf16 %v7734_v20  ;;  %3122 = vmatpush.bf16.msra.mxu1 %v4092_v62  ;;  %v4091_v11 = vld [vmem:[%s9217_s1 + $0x70] sm:$0xff] }
 0x295   : > { %v4788_v52 = vunpack.i.l.bf16 %v7734_v20  ;;  %v2810_v57 = vpack.c.bf16 %v2420_v3, %v2419_v29  ;;  %v9802_v38 = vunpack.i.l.bf16 %v9774_v45  ;;  %v9803_v4 = vunpack.i.h.bf16 %v9774_v45  ;;  %v9804_v3 = vld [vmem:[#allocation64_spill] sm:$0xff]  ;;  %v9806_v62 = vld [vmem:[#allocation51_spill] sm:$0xff] }
 0x296   : > { %v2223_v40 = vsel %vm278_vm0, %v9801_v46, %v9800_v53  ;;  %5076 = vrot.lane.b32.xlu1 %v7408_v14, %s5608_s26  ;;  %v4359_v32 = vunpack.i.h.bf16 %v9798_v21  ;;  %v4784_v14 = vunpack.i.h.bf16 %v7604_v28  ;;  %v4783_v29 = vunpack.i.l.bf16 %v7604_v28  ;;  %v5480_v21 = vld [vmem:[#allocation2 + $0x220] sm:$0xff] }
 0x297   : > { %v2256_v34 = vsel %vm2239_vm3, %v2223_v40, %v9802_v38  ;;  %v2257_v37 = vsel %vm2239_vm3, %v2224_v8, %v9803_v4  ;;  %5071 = vrot.lane.b32.xlu0 %v9804_v3, %s5607_s17  ;;  %3076 = vmatmul.bf16.gmra.mxu0 %v2810_v57  ;;  %v4439_v8 = vunpack.i.h.bf16 %v9805_v54  ;;  %v4438_v53 = vunpack.i.l.bf16 %v9805_v54 }
 0x298   : > { %v2289_v20 = vsel %vm2272_vm4, %v2256_v34, %v4358_v12  ;;  %v4867_v45 = vpop.permute.xlu1 %4866  ;;  %v4519_v38 = vunpack.i.h.bf16 %v9806_v62  ;;  %v2466_v12 = vsel %vm278_vm0, %v5480_v21, %v4789_v30  ;;  %v5481_v34 = vld [vmem:[#allocation2 + $0x218] sm:$0xff]  ;;  %3123 = vmatpush.bf16.msra.mxu1 %v4091_v11  ;;  %v4518_v5 = vunpack.i.l.bf16 %v9806_v62  ;;  %v5483_v21 = vld [vmem:[#allocation2 + $0x200] sm:$0xff]  ;;  %v4090_v11 = vld [vmem:[%s9217_s1 + $0x68] sm:$0xff] }
 0x299   : > { %v4869_v46 = vunpack.i.h.bf16 %v4867_v45  ;;  %v4868_v40 = vunpack.i.l.bf16 %v4867_v45  ;;  %v2465_v4 = vsel %vm278_vm0, %v5481_v34, %v4788_v52  ;;  %v4862_v28 = vpop.permute.xlu0 %4861  ;;  %v2464_v30 = vsel %vm278_vm0, %v5482_v22, %v4784_v14 }
 0x29a   : > { %5066 = vrot.lane.b32.xlu2 %v9796_v10, %s5606_s16  ;;  %v4864_v54 = vunpack.i.h.bf16 %v4862_v28  ;;  %v4863_v45 = vunpack.i.l.bf16 %v4862_v28  ;;  %v2463_v52 = vsel %vm278_vm0, %v5483_v21, %v4783_v29  ;;  %v2290_v62 = vsel %vm2272_vm4, %v2257_v37, %v4359_v32  ;;  %v9812_v29 = vld [vmem:[#allocation62_spill] sm:$0xff]  ;;  %v4089_v37 = vld [vmem:[%s9217_s1 + $0x60] sm:$0xff] }
 0x29b   : > { %v8005_v57 = vsel %vm2239_vm3, %v2465_v4, %v4868_v40  ;;  %v8008_v3 = vsel %vm2239_vm3, %v2466_v12, %v4869_v46  ;;  %v9811_v12 = vld [vmem:[#allocation104_spill] sm:$0xff]  ;;  %v9813_v4 = vld [vmem:[#allocation117_spill] sm:$0xff]  ;;  %v2322_v32 = vsel %vm2305_vm5, %v2289_v20, %v4438_v53  ;;  %v2323_v21 = vsel %vm2305_vm5, %v2290_v62, %v4439_v8  ;;  %v4094_v8 = vld [vmem:[%s9217_s1 + $0x88] sm:$0xff] }
 0x29c   : > { %9807 = vst [vmem:[#allocation156_spill] sm:$0xff] %v8005_v57  ;;  %v4902_v34 = vpop.permute.xlu2 %4901  ;;  %v8014_v40 = vsel %vm2239_vm3, %v2463_v52, %v4863_v45  ;;  %v8017_v46 = vsel %vm2239_vm3, %v2464_v30, %v4864_v54  ;;  %v4599_v22 = vunpack.i.h.bf16 %v9811_v12  ;;  %v4598_v14 = vunpack.i.l.bf16 %v9811_v12  ;;  %3124 = vmatpush.bf16.msra.mxu1 %v4090_v11  ;;  %v9814_v53 = vld [vmem:[#allocation115_spill] sm:$0xff]  ;;  %v9815_v62 = vld [vmem:[#allocation110_spill] sm:$0xff]  ;;  %3217 = vmatpush.bf16.msra.mxu2 %v4094_v8 }
 0x29d   : > { %9808 = vst [vmem:[#allocation169_spill] sm:$0xff] %v8008_v3  ;;  %v4904_v10 = vunpack.i.h.bf16 %v4902_v34  ;;  %v4903_v48 = vunpack.i.l.bf16 %v4902_v34  ;;  %v4679_v28 = vunpack.i.h.bf16 %v9813_v4  ;;  %v4678_v45 = vunpack.i.l.bf16 %v9813_v4  ;;  %v9821_v57 = vld [vmem:[#allocation50_spill] sm:$0xff] }
 0x29e   : > { %9809 = vst [vmem:[#allocation58_spill] sm:$0xff] %v8014_v40  ;;  %5091 = vrot.lane.b32.xlu1 %v9812_v29, %s5606_s16  ;;  %v2356_v34 = vsel %vm2338_vm6, %v2323_v21, %v4519_v38  ;;  %v4203_v11 = vunpack.i.l.bf16 %v9814_v53  ;;  %v4214_v12 = vunpack.i.h.bf16 %v9815_v62 }
 0x29f   : > { %9810 = vst [vmem:[#allocation162_spill] sm:$0xff] %v8017_v46  ;;  %v8031_v54 = vsel %vm2272_vm4, %v7843_v13, %v4904_v10  ;;  %v8035_v30 = vsel %vm2272_vm4, %v7840_v19, %v4903_v48  ;;  %5086 = vrot.lane.b32.xlu0 %v7477_v17, %s5603_s29  ;;  %v2355_v13 = vsel %vm2338_vm6, %v2322_v32, %v4518_v5  ;;  %v4204_v10 = vunpack.i.h.bf16 %v9814_v53  ;;  %v9817_v32 = vld [vmem:[#allocation144_spill] sm:$0xff] }
 0x2a0   : > { %v8044_v52 = vpop.permute.xlu1 %4881  ;;  %v2388_v48 = vsel %vm2371_vm7, %v2355_v13, %v4598_v14  ;;  %v2389_v20 = vsel %vm2371_vm7, %v2356_v34, %v4599_v22  ;;  %3125 = vmatpush.bf16.msra.mxu1 %v4089_v37  ;;  %v4364_v21 = vunpack.i.h.bf16 %v9817_v32  ;;  %v4088_v53 = vld [vmem:[%s9217_s1 + $0x58] sm:$0xff] }
 0x2a1   : > { %v8050_v19 = vpop.permute.xlu0 %4876  ;;  %v2421_v5 = vsel %vm2404_vm8, %v2388_v48, %v4678_v45  ;;  %v2422_v38 = vsel %vm2404_vm8, %v2389_v20, %v4679_v28  ;;  %v9818_v28 = vld [vmem:[#allocation61_spill] sm:$0xff] }
 0x2a2   : > { %5081 = vrot.lane.b32.xlu2 %v9812_v29, %s5609_s8  ;;  %v9816_v29 = vld [vmem:[#allocation138_spill] sm:$0xff]  ;;  %v2813_v37 = vpack.c.bf16 %v2422_v38, %v2421_v5  ;;  %v4093_v48 = vld [vmem:[%s9217_s1 + $0x80] sm:$0xff]  ;;  %v4087_v5 = vld [vmem:[%s9217_s1 + $0x50] sm:$0xff]  ;;  %v8089_v38 = vsel %vm278_vm0, %v7424_v25, %v4214_v12 }
 0x2a3   : > { %v4284_v4 = vunpack.i.h.bf16 %v9816_v29  ;;  %v4283_v14 = vunpack.i.l.bf16 %v9816_v29  ;;  %v5484_v20 = vld [vmem:[#allocation2 + $0xe0] sm:$0xff]  ;;  %v5485_v29 = vld [vmem:[#allocation2 + $0xd8] sm:$0xff]  ;;  %3218 = vmatpush.bf16.msra.mxu2 %v4093_v48  ;;  %v4523_v48 = vunpack.i.l.bf16 %v9821_v57 }
 0x2a4   : > { %v4917_v22 = vpop.permute.xlu2 %4916  ;;  %v2226_v8 = vsel %vm278_vm0, %v5484_v20, %v4204_v10  ;;  %3126 = vmatpush.bf16.msra.mxu1 %v4088_v53  ;;  %v9819_v10 = vld [vmem:[#allocation114_spill] sm:$0xff]  ;;  %v9820_v25 = vld [vmem:[#allocation161_spill] sm:$0xff] }
 0x2a5   : > { %v4919_v13 = vunpack.i.h.bf16 %v4917_v22  ;;  %v4918_v34 = vunpack.i.l.bf16 %v4917_v22  ;;  %v2225_v22 = vsel %vm278_vm0, %v5485_v29, %v4203_v11  ;;  %v4444_v12 = vunpack.i.h.bf16 %v9820_v25 }
 0x2a6   : > { %5106 = vrot.lane.b32.xlu1 %v9818_v28, %s5609_s8  ;;  %v2258_v11 = vsel %vm2239_vm3, %v2225_v22, %v4283_v14  ;;  %v4443_v20 = vunpack.i.l.bf16 %v9820_v25  ;;  %v4524_v14 = vunpack.i.h.bf16 %v9821_v57  ;;  %v9823_v22 = vld [vmem:[#allocation82_spill] sm:$0xff] }
 0x2a7   : > { %v8078_v3 = vsel %vm2272_vm4, %v7892_v33, %v4919_v13  ;;  %v8082_v45 = vsel %vm2272_vm4, %v7889_v9, %v4918_v34  ;;  %v2259_v33 = vsel %vm2239_vm3, %v2226_v8, %v4284_v4  ;;  %5101 = vrot.lane.b32.xlu0 %v9793_v56, %s5608_s26  ;;  %3081 = vmatmul.bf16.gmra.mxu0 %v2813_v37  ;;  %v4363_v34 = vunpack.i.l.bf16 %v9817_v32  ;;  %v9822_v4 = vld [vmem:[#allocation57_spill] sm:$0xff] }
 0x2a8   : > { %v4897_v9 = vpop.permute.xlu1 %4896  ;;  %v2292_v13 = vsel %vm2272_vm4, %v2259_v33, %v4364_v21  ;;  %3127 = vmatpush.bf16.msra.mxu1 %v4087_v5  ;;  %v4604_v33 = vunpack.i.h.bf16 %v9823_v22  ;;  %v9824_v5 = vld [vmem:[#allocation177_spill] sm:$0xff] }
 0x2a9   : > { %v4899_v53 = vunpack.i.h.bf16 %v4897_v9  ;;  %v4898_v29 = vunpack.i.l.bf16 %v4897_v9  ;;  %v4892_v8 = vpop.permute.xlu0 %4891  ;;  %v4603_v9 = vunpack.i.l.bf16 %v9823_v22  ;;  %v4683_v57 = vunpack.i.l.bf16 %v9824_v5 }
 0x2aa   : > { %5096 = vrot.lane.b32.xlu2 %v9822_v4, %s5607_s17  ;;  %v4894_v21 = vunpack.i.h.bf16 %v4892_v8  ;;  %v4893_v37 = vunpack.i.l.bf16 %v4892_v8  ;;  %v9825_v8 = vld [vmem:[#allocation85_spill] sm:$0xff] }
 0x2ab   : > { %v8105_v56 = vsel %vm2272_vm4, %v7851_v18, %v4898_v29  ;;  %v8109_v32 = vsel %vm2272_vm4, %v7854_v47, %v4899_v53  ;;  %v2291_v53 = vsel %vm2272_vm4, %v2258_v11, %v4363_v34  ;;  %v4684_v29 = vunpack.i.h.bf16 %v9824_v5  ;;  %v4086_v11 = vld [vmem:[%s9217_s1 + $0x48] sm:$0xff] }
 0x2ac   : > { %v4932_v25 = vpop.permute.xlu2 %4931  ;;  %v8116_v18 = vsel %vm2272_vm4, %v7709_v43, %v4893_v37  ;;  %v8120_v47 = vsel %vm2272_vm4, %v7706_v26, %v4894_v21  ;;  %v2324_v22 = vsel %vm2305_vm5, %v2291_v53, %v4443_v20  ;;  %v4208_v34 = vunpack.i.l.bf16 %v9819_v10  ;;  %v9828_v21 = vld [vmem:[#allocation118_spill] sm:$0xff]  ;;  %3128 = vmatpush.bf16.msra.mxu1 %v4086_v11  ;;  %v4085_v53 = vld [vmem:[%s9217_s1 + $0x40] sm:$0xff] }
 0x2ad   : > { %v4934_v4 = vunpack.i.h.bf16 %v4932_v25  ;;  %v4933_v46 = vunpack.i.l.bf16 %v4932_v25  ;;  %v2325_v25 = vsel %vm2305_vm5, %v2292_v13, %v4444_v12  ;;  %v4219_v37 = vunpack.i.h.bf16 %v9828_v21  ;;  %v9830_v11 = vld [vmem:[#allocation133_spill] sm:$0xff] }
 0x2ae   : > { %5121 = vrot.lane.b32.xlu1 %v9825_v8, %s5607_s17  ;;  %v2357_v13 = vsel %vm2338_vm6, %v2324_v22, %v4523_v48  ;;  %v4218_v5 = vunpack.i.l.bf16 %v9828_v21  ;;  %v4289_v21 = vunpack.i.h.bf16 %v9830_v11 }
 0x2af   : > { %v8131_v43 = vsel %vm2272_vm4, %v7948_v58, %v4934_v4  ;;  %v8135_v26 = vsel %vm2272_vm4, %v7945_v23, %v4933_v46  ;;  %5116 = vrot.lane.b32.xlu0 %v9818_v28, %s5606_s16  ;;  %v2358_v58 = vsel %vm2338_vm6, %v2325_v25, %v4524_v14  ;;  %v2390_v23 = vsel %vm2371_vm7, %v2357_v13, %v4603_v9  ;;  %v9829_v28 = vld [vmem:[#allocation150_spill] sm:$0xff]  ;;  %v9831_v13 = vld [vmem:[#allocation140_spill] sm:$0xff] }
 0x2b0   : > { %9826 = vst [vmem:[#allocation100_spill] sm:$0xff] %v8131_v43  ;;  %v4912_v20 = vpop.permute.xlu1 %4911  ;;  %v2391_v46 = vsel %vm2371_vm7, %v2358_v58, %v4604_v33  ;;  %v2423_v48 = vsel %vm2404_vm8, %v2390_v23, %v4683_v57  ;;  %v4298_v58 = vunpack.i.l.bf16 %v9831_v13  ;;  %v9832_v57 = vld [vmem:[#allocation141_spill] sm:$0xff]  ;;  %3129 = vmatpush.bf16.msra.mxu1 %v4085_v53  ;;  %v5488_v43 = vld [vmem:[#allocation2 + $0xf0] sm:$0xff]  ;;  %v5489_v53 = vld [vmem:[#allocation2 + $0x128] sm:$0xff] }
 0x2b1   : > { %9827 = vst [vmem:[#allocation101_spill] sm:$0xff] %v8135_v26  ;;  %v4914_v12 = vunpack.i.h.bf16 %v4912_v20  ;;  %v4913_v4 = vunpack.i.l.bf16 %v4912_v20  ;;  %v4907_v8 = vpop.permute.xlu0 %4906  ;;  %v2424_v14 = vsel %vm2404_vm8, %v2391_v46, %v4684_v29  ;;  %v4288_v20 = vunpack.i.l.bf16 %v9830_v11  ;;  %v9834_v11 = vld [vmem:[#allocation180_spill] sm:$0xff] }
 0x2b2   : > { %5111 = vrot.lane.b32.xlu2 %v9829_v28, %s5603_s29  ;;  %v4909_v22 = vunpack.i.h.bf16 %v4907_v8  ;;  %v4908_v25 = vunpack.i.l.bf16 %v4907_v8  ;;  %v4299_v29 = vunpack.i.h.bf16 %v9831_v13  ;;  %v4293_v23 = vunpack.i.l.bf16 %v9832_v57  ;;  %v9846_v26 = vld [vmem:[#allocation176_spill] sm:$0xff] }
 0x2b3   : > { %v8158_v9 = vsel %vm2272_vm4, %v7904_v55, %v4913_v4  ;;  %v8162_v33 = vsel %vm2272_vm4, %v7907_v7, %v4914_v12  ;;  %v5486_v12 = vld [vmem:[#allocation2 + $0x108] sm:$0xff]  ;;  %v9833_v4 = vunpack.i.l.bf16 %v9815_v62  ;;  %v4294_v8 = vunpack.i.h.bf16 %v9832_v57  ;;  %v5490_v62 = vld [vmem:[#allocation2 + $0x120] sm:$0xff] }
 0x2b4   : > { %v8167_v40 = vpop.permute.xlu2 %4946  ;;  %v8173_v55 = vsel %vm2272_vm4, %v7755_v41, %v4908_v25  ;;  %v8177_v7 = vsel %vm2272_vm4, %v7752_v44, %v4909_v22  ;;  %v2816_v13 = vpack.c.bf16 %v2424_v14, %v2423_v48  ;;  %v9835_v41 = vunpack.i.h.bf16 %v9819_v10  ;;  %v9836_v10 = vld [vmem:[#allocation70_spill] sm:$0xff] }
 0x2b5   : > { %v2229_v46 = vsel %vm278_vm0, %v5486_v12, %v9833_v4  ;;  %v2227_v44 = vsel %vm278_vm0, %v5488_v43, %v4208_v34  ;;  %v2232_v22 = vsel %vm278_vm0, %v5489_v53, %v4219_v37  ;;  %v2231_v12 = vsel %vm278_vm0, %v5490_v62, %v4218_v5 }
 0x2b6   : > { %5136 = vrot.lane.b32.xlu1 %v9834_v11, %s5603_s29  ;;  %v2228_v25 = vsel %vm278_vm0, %v5487_v24, %v9835_v41  ;;  %v2260_v4 = vsel %vm2239_vm3, %v2227_v44, %v4288_v20  ;;  %v8194_v48 = vsel %vm2239_vm3, %v2231_v12, %v4298_v58  ;;  %v8199_v43 = vsel %vm2239_vm3, %v2232_v22, %v4299_v29 }
 0x2b7   : > { %v2261_v57 = vsel %vm2239_vm3, %v2228_v25, %v4289_v21  ;;  %5131 = vrot.lane.b32.xlu0 %v9836_v10, %s5609_s8  ;;  %3086 = vmatmul.bf16.gmra.mxu0 %v2816_v13  ;;  %v2262_v34 = vsel %vm2239_vm3, %v2229_v46, %v4293_v23  ;;  %v2263_v5 = vsel %vm2239_vm3, %v8089_v38, %v4294_v8  ;;  %v9837_v21 = vld [vmem:[#allocation152_spill] sm:$0xff]  ;;  %v9840_v25 = vld [vmem:[#allocation151_spill] sm:$0xff] }
 0x2b8   : > { %v4927_v24 = vpop.permute.xlu1 %4926  ;;  %v4369_v20 = vunpack.i.h.bf16 %v9837_v21  ;;  %v4368_v58 = vunpack.i.l.bf16 %v9837_v21  ;;  %v4373_v38 = vunpack.i.l.bf16 %v9840_v25  ;;  %v9841_v8 = vld [vmem:[#allocation160_spill] sm:$0xff] }
 0x2b9   : > { %v4929_v37 = vunpack.i.h.bf16 %v4927_v24  ;;  %v4928_v14 = vunpack.i.l.bf16 %v4927_v24  ;;  %v4922_v41 = vpop.permute.xlu0 %4921  ;;  %v4449_v44 = vunpack.i.h.bf16 %v9841_v8  ;;  %v4448_v53 = vunpack.i.l.bf16 %v9841_v8  ;;  %v9844_v24 = vld [vmem:[#allocation147_spill] sm:$0xff] }
 0x2ba   : > { %5126 = vrot.lane.b32.xlu2 %v7477_v17, %s5608_s26  ;;  %v4924_v23 = vunpack.i.h.bf16 %v4922_v41  ;;  %v4923_v46 = vunpack.i.l.bf16 %v4922_v41  ;;  %v9842_v17 = vld [vmem:[#allocation170_spill] sm:$0xff]  ;;  %v2293_v8 = vsel %vm2272_vm4, %v2260_v4, %v4368_v58  ;;  %v9849_v58 = vld [vmem:[#allocation69_spill] sm:$0xff] }
 0x2bb   : > { %v8210_v13 = vsel %vm2272_vm4, %v7970_v16, %v4928_v14  ;;  %v8214_v29 = vsel %vm2272_vm4, %v7973_v61, %v4929_v37  ;;  %v4529_v62 = vunpack.i.h.bf16 %v9842_v17  ;;  %v4528_v12 = vunpack.i.l.bf16 %v9842_v17  ;;  %v9845_v14 = vld [vmem:[#allocation116_spill] sm:$0xff] }
 0x2bc   : > { %9838 = vst [vmem:[#allocation111_spill] sm:$0xff] %v8210_v13  ;;  %v8219_v22 = vpop.permute.xlu2 %4961  ;;  %v8225_v16 = vsel %vm2272_vm4, %v7817_v36, %v4923_v46  ;;  %v8229_v61 = vsel %vm2272_vm4, %v7814_v35, %v4924_v23  ;;  %v4609_v21 = vunpack.i.h.bf16 %v9845_v14  ;;  %v4608_v41 = vunpack.i.l.bf16 %v9845_v14  ;;  %v9847_v14 = vld [vmem:[#allocation81_spill] sm:$0xff] }
 0x2bd   : > { %9839 = vst [vmem:[#allocation112_spill] sm:$0xff] %v8214_v29  ;;  %v2294_v17 = vsel %vm2272_vm4, %v2261_v57, %v4369_v20  ;;  %v4689_v36 = vunpack.i.h.bf16 %v9846_v26  ;;  %v4688_v46 = vunpack.i.l.bf16 %v9846_v26  ;;  %v4374_v35 = vunpack.i.h.bf16 %v9840_v25  ;;  %v9848_v13 = vld [vmem:[#allocation157_spill] sm:$0xff] }
 0x2be   : > { %9843 = vst [vmem:[#allocation48_spill] sm:$0xff] %v8229_v61  ;;  %5151 = vrot.lane.b32.xlu1 %v9829_v28, %s5608_s26  ;;  %v2295_v23 = vsel %vm2272_vm4, %v2262_v34, %v4373_v38  ;;  %v2326_v37 = vsel %vm2305_vm5, %v2293_v8, %v4448_v53  ;;  %v2327_v29 = vsel %vm2305_vm5, %v2294_v17, %v4449_v44  ;;  %v4454_v4 = vunpack.i.h.bf16 %v9848_v13  ;;  %v9850_v61 = vld [vmem:[#allocation28_spill] sm:$0xff] }
 0x2bf   : > { %5146 = vrot.lane.b32.xlu0 %v9847_v14, %s5607_s17  ;;  %v4453_v57 = vunpack.i.l.bf16 %v9848_v13  ;;  %v2359_v20 = vsel %vm2338_vm6, %v2326_v37, %v4528_v12  ;;  %v2360_v26 = vsel %vm2338_vm6, %v2327_v29, %v4529_v62  ;;  %v4533_v25 = vunpack.i.l.bf16 %v9849_v58 }
 0x2c0   : > { %v4942_v28 = vpop.permute.xlu1 %4941  ;;  %v2392_v38 = vsel %vm2371_vm7, %v2359_v20, %v4608_v41  ;;  %v2393_v44 = vsel %vm2371_vm7, %v2360_v26, %v4609_v21  ;;  %v2296_v12 = vsel %vm2272_vm4, %v2263_v5, %v4374_v35  ;;  %v4879_v29 = vunpack.i.h.bf16 %v8050_v19  ;;  %v9851_v21 = vld [vmem:[#allocation29_spill] sm:$0xff] }
 0x2c1   : > { %v4937_v34 = vpop.permute.xlu0 %4936  ;;  %v2425_v17 = vsel %vm2404_vm8, %v2392_v38, %v4688_v46  ;;  %v2426_v13 = vsel %vm2404_vm8, %v2393_v44, %v4689_v36  ;;  %v4878_v62 = vunpack.i.l.bf16 %v8050_v19  ;;  %v4943_v14 = vunpack.i.l.bf16 %v4942_v28  ;;  %v9852_v36 = vld [vmem:[#allocation77_spill] sm:$0xff] }
 0x2c2   : > { %5141 = vrot.lane.b32.xlu2 %v9836_v10, %s5606_s16  ;;  %v4939_v53 = vunpack.i.h.bf16 %v4937_v34  ;;  %v4938_v8 = vunpack.i.l.bf16 %v4937_v34  ;;  %v4944_v10 = vunpack.i.h.bf16 %v4942_v28  ;;  %v2328_v46 = vsel %vm2305_vm5, %v2295_v23, %v4453_v57  ;;  %v9853_v38 = vld [vmem:[#allocation109_spill] sm:$0xff] }
 0x2c3   : > { %v2819_v5 = vpack.c.bf16 %v2426_v13, %v2425_v17  ;;  %v4378_v26 = vunpack.i.l.bf16 %v9844_v24  ;;  %v2329_v19 = vsel %vm2305_vm5, %v2296_v12, %v4454_v4  ;;  %v4534_v34 = vunpack.i.h.bf16 %v9849_v58  ;;  %v9855_v4 = vld [vmem:[#allocation9_spill] sm:$0xff]  ;;  %v9856_v13 = vld [vmem:[#allocation122_spill] sm:$0xff] }
 0x2c4   : > { %v8260_v37 = vpop.permute.xlu2 %4976  ;;  %v2757_v41 = vsel %vm278_vm0, %v9850_v61, %v4938_v8  ;;  %v2758_v20 = vsel %vm278_vm0, %v9851_v21, %v4939_v53  ;;  %v2361_v28 = vsel %vm2338_vm6, %v2328_v46, %v4533_v25  ;;  %v2501_v61 = vsel %vm2272_vm4, %v7667_v42, %v4878_v62  ;;  %v9854_v53 = vld [vmem:[#allocation42_spill] sm:$0xff] }
 0x2c5   : > { %v2791_v35 = vpack.c.bf16 %v2758_v20, %v2757_v41  ;;  %v2502_v44 = vsel %vm2272_vm4, %v9853_v38, %v4879_v29  ;;  %v4949_v23 = vunpack.i.h.bf16 %v8167_v40  ;;  %v4948_v57 = vunpack.i.l.bf16 %v8167_v40 }
 0x2c6   : > { %5166 = vrot.lane.b32.xlu1 %v9852_v36, %s5606_s16  ;;  %v4614_v17 = vunpack.i.h.bf16 %v9855_v4  ;;  %v4613_v58 = vunpack.i.l.bf16 %v9855_v4  ;;  %v2533_v25 = vsel %vm2305_vm5, %v2501_v61, %v4943_v14  ;;  %v2534_v42 = vsel %vm2305_vm5, %v2502_v44, %v4944_v10 }
 0x2c7   : > { %5161 = vrot.lane.b32.xlu0 %v9854_v53, %s5603_s29  ;;  %3091 = vmatmul.bf16.gmra.mxu0 %v2819_v5  ;;  %v4694_v12 = vunpack.i.h.bf16 %v9856_v13  ;;  %v4693_v41 = vunpack.i.l.bf16 %v9856_v13  ;;  %v2565_v14 = vsel %vm2338_vm6, %v2533_v25, %v4948_v57  ;;  %v2566_v10 = vsel %vm2338_vm6, %v2534_v42, %v4949_v23  ;;  %v5491_v5 = vld [vmem:[#allocation2 + $0x168] sm:$0xff]  ;;  %v9857_v13 = vld [vmem:[#allocation76_spill] sm:$0xff]  ;;  %v9858_v25 = vld [vmem:[#allocation163_spill] sm:$0xff] }
 0x2c8   : > { %v4957_v8 = vpop.permute.xlu1 %4956  ;;  %4031 = vmatmul.msk.bf16.vlgmr.msra.gmra.mxu2 %vm2239_vm3, %v2791_v35  ;;  %v791_v35 = vrot.slane %v5491_v5, 5  ;;  %v794_v44 = vrot.slane %v7894_v49, 5  ;;  %v4963_v4 = vunpack.i.l.bf16 %v8219_v22  ;;  %v4459_v42 = vunpack.i.h.bf16 %v9858_v25  ;;  %v9860_v5 = vld [vmem:[#allocation40_spill] sm:$0xff] }
 0x2c9   : > { %v4959_v40 = vunpack.i.h.bf16 %v4957_v8  ;;  %v4958_v29 = vunpack.i.l.bf16 %v4957_v8  ;;  %v4952_v62 = vpop.permute.xlu0 %4951  ;;  %v4964_v8 = vunpack.i.h.bf16 %v8219_v22  ;;  %v4458_v49 = vunpack.i.l.bf16 %v9858_v25 }
 0x2ca   : > { %5156 = vrot.lane.b32.xlu2 %v9852_v36, %s5609_s8  ;;  %v4954_v21 = vunpack.i.h.bf16 %v4952_v62  ;;  %v4953_v20 = vunpack.i.l.bf16 %v4952_v62  ;;  %v792_v36 = vrot.slane %v7898_v0, 5  ;;  %v2394_v0 = vsel %vm2371_vm7, %v2361_v28, %v4613_v58  ;;  %v8317_v28 = vpop.f32.mrf.mxu0  ;;  %v9859_v58 = vld [vmem:[#allocation75_spill] sm:$0xff] }
 0x2cc   : > { %v8290_v46 = vpop.permute.xlu2 %4991  ;;  %v2597_v61 = vsel %vm2371_vm7, %v2565_v14, %v4953_v20  ;;  %v2598_v38 = vsel %vm2371_vm7, %v2566_v10, %v4954_v21  ;;  %v2362_v21 = vsel %vm2338_vm6, %v2329_v19, %v4534_v34  ;;  %v4883_v20 = vunpack.i.l.bf16 %v8044_v52 }
 0x2cd   : > { %v2629_v57 = vsel %vm2404_vm8, %v2597_v61, %v4958_v29  ;;  %v2630_v23 = vsel %vm2404_vm8, %v2598_v38, %v4959_v40  ;;  %v2395_v14 = vsel %vm2371_vm7, %v2362_v21, %v4614_v17  ;;  %v2427_v29 = vsel %vm2404_vm8, %v2394_v0, %v4693_v41  ;;  %v9861_v61 = vld [vmem:[#allocation41_spill] sm:$0xff] }
 0x2ce   : > { %5181 = vrot.lane.b32.xlu1 %v9857_v13, %s5609_s8  ;;  %v2790_v62 = vpack.c.bf16 %v2630_v23, %v2629_v57  ;;  %v4884_v40 = vunpack.i.h.bf16 %v8044_v52  ;;  %v793_v10 = vsel %vm730_vm9, %v791_v35, %v792_v36  ;;  %v795_v19 = vsel %vm730_vm9, %v792_v36, %v794_v44  ;;  %v5492_v52 = vld [vmem:[#allocation2 + $0x180] sm:$0xff]  ;;  %v9862_v44 = vld [vmem:[#allocation68_spill] sm:$0xff] }
 0x2cf   : > { %5176 = vrot.lane.b32.xlu0 %v9834_v11, %s5608_s26  ;;  %v2428_v34 = vsel %vm2404_vm8, %v2395_v14, %v4694_v12  ;;  %v2759_v17 = vsel %vm278_vm0, %v9860_v5, %v4963_v4  ;;  %v2760_v41 = vsel %vm278_vm0, %v9861_v61, %v4964_v8  ;;  %v796_v38 = vrot.slane %v5492_v52, 5  ;;  %v9863_v5 = vld [vmem:[#allocation91_spill] sm:$0xff] }
 0x2d0   : > { %v4972_v22 = vpop.permute.xlu1 %4971  ;;  %3130 = vmatmul.bf16.vlgmr.msra.gmra.mxu1 %v2790_v62  ;;  %v797_v36 = vrot.slane %v7880_v2, 5  ;;  %v799_v12 = vrot.slane %v7876_v27, 5  ;;  %v4539_v23 = vunpack.i.h.bf16 %v9862_v44  ;;  %v4538_v25 = vunpack.i.l.bf16 %v9862_v44 }
 0x2d1   : > { %v4967_v11 = vpop.permute.xlu0 %4966  ;;  %v2503_v62 = vsel %vm2272_vm4, %v7790_v31, %v4883_v20  ;;  %v2504_v8 = vsel %vm2272_vm4, %v7793_v6, %v4884_v40  ;;  %v4974_v4 = vunpack.i.h.bf16 %v4972_v22  ;;  %v4973_v0 = vunpack.i.l.bf16 %v4972_v22 }
 0x2d2   : > { %5171 = vrot.lane.b32.xlu2 %v9859_v58, %s5607_s17  ;;  %v4969_v57 = vunpack.i.h.bf16 %v4967_v11  ;;  %v4968_v35 = vunpack.i.l.bf16 %v4967_v11  ;;  %v2794_v14 = vpack.c.bf16 %v2760_v41, %v2759_v17  ;;  %v8337_v27 = vpack.i.bf16 %v795_v19, %v793_v10  ;;  %v8372_v44 = vpop.f32.mrf.mxu0 }
 0x2d3   : > { %v2822_v11 = vpack.c.bf16 %v2428_v34, %v2427_v29  ;;  %v9864_v31 = vunpack.i.h.bf16 %v9844_v24  ;;  %v2297_v6 = vsel %vm2272_vm4, %v8194_v48, %v4378_v26  ;;  %v798_v22 = vsel %vm730_vm9, %v796_v38, %v797_v36  ;;  %v9865_v24 = vld [vmem:[#allocation66_spill] sm:$0xff] }
 0x2d4   : > { %v8331_v21 = vpop.permute.xlu2 %5006  ;;  %v2535_v58 = vsel %vm2305_vm5, %v2503_v62, %v4968_v35  ;;  %v2536_v2 = vsel %vm2305_vm5, %v2504_v8, %v4969_v57  ;;  %v800_v40 = vsel %vm730_vm9, %v797_v36, %v799_v12  ;;  %v2330_v10 = vsel %vm2305_vm5, %v2297_v6, %v4458_v49 }
 0x2d5   : > { %v2298_v20 = vsel %vm2272_vm4, %v8199_v43, %v9864_v31  ;;  %v4979_v19 = vunpack.i.h.bf16 %v8260_v37  ;;  %v4978_v34 = vunpack.i.l.bf16 %v8260_v37  ;;  %v4619_v17 = vunpack.i.h.bf16 %v9865_v24  ;;  %v9866_v37 = vld [vmem:[#allocation179_spill] sm:$0xff] }
 0x2d6   : > { %5196 = vrot.lane.b32.xlu1 %v9863_v5, %s5607_s17  ;;  %v2331_v29 = vsel %vm2305_vm5, %v2298_v20, %v4459_v42  ;;  %v4618_v48 = vunpack.i.l.bf16 %v9865_v24  ;;  %v2567_v26 = vsel %vm2338_vm6, %v2535_v58, %v4973_v0  ;;  %v2568_v49 = vsel %vm2338_vm6, %v2536_v2, %v4974_v4 }
 0x2d7   : > { %5191 = vrot.lane.b32.xlu0 %v9857_v13, %s5606_s16  ;;  %3096 = vmatmul.bf16.gmra.mxu0 %v2822_v11  ;;  %v2363_v42 = vsel %vm2338_vm6, %v2330_v10, %v4538_v25  ;;  %v2364_v61 = vsel %vm2338_vm6, %v2331_v29, %v4539_v23  ;;  %v4699_v41 = vunpack.i.h.bf16 %v9866_v37  ;;  %v8367_v52 = vpack.i.bf16 %v800_v40, %v798_v22  ;;  %v9867_v40 = vld [vmem:[#allocation46_spill] sm:$0xff]  ;;  %v5493_v29 = vld [vmem:[#allocation2 + $0x198] sm:$0xff] }
 0x2d8   : > { %v4987_v43 = vpop.permute.xlu1 %4986  ;;  %4032 = vmatmul.msk.bf16.gmra.mxu2 %vm2239_vm3, %v2794_v14  ;;  %v4698_v38 = vunpack.i.l.bf16 %v9866_v37  ;;  %v4889_v57 = vunpack.i.h.bf16 %v7959_v15  ;;  %v4888_v12 = vunpack.i.l.bf16 %v7959_v15  ;;  %v2599_v23 = vsel %vm2371_vm7, %v2567_v26, %v4978_v34 }
 0x2d9   : > { %v4982_v13 = vpop.permute.xlu0 %4981  ;;  %v2600_v62 = vsel %vm2371_vm7, %v2568_v49, %v4979_v19  ;;  %v2396_v0 = vsel %vm2371_vm7, %v2363_v42, %v4618_v48  ;;  %v2397_v14 = vsel %vm2371_vm7, %v2364_v61, %v4619_v17  ;;  %v4989_v58 = vunpack.i.h.bf16 %v4987_v43  ;;  %v9868_v17 = vld [vmem:[#allocation31_spill] sm:$0xff]  ;;  %v9869_v48 = vld [vmem:[#allocation32_spill] sm:$0xff] }
 0x2da   : > { %5186 = vrot.lane.b32.xlu2 %v8337_v27, %s5603_s29  ;;  %v4984_v35 = vunpack.i.h.bf16 %v4982_v13  ;;  %v4983_v36 = vunpack.i.l.bf16 %v4982_v13  ;;  %v4988_v2 = vunpack.i.l.bf16 %v4987_v43  ;;  %v2429_v11 = vsel %vm2404_vm8, %v2396_v0, %v4698_v38 }
 0x2db   : > { %v2430_v5 = vsel %vm2404_vm8, %v2397_v14, %v4699_v41  ;;  %v2506_v31 = vsel %vm2272_vm4, %v7782_v50, %v4889_v57  ;;  %v2505_v20 = vsel %vm2272_vm4, %v7779_v63, %v4888_v12  ;;  %v4994_v6 = vunpack.i.h.bf16 %v8290_v46  ;;  %v8410_v57 = vpop.f32.mrf.mxu0 }
 0x2dc   : > { %v8374_v25 = vpop.permute.xlu2 %5021  ;;  %v2631_v8 = vsel %vm2404_vm8, %v2599_v23, %v4983_v36  ;;  %v2632_v4 = vsel %vm2404_vm8, %v2600_v62, %v4984_v35  ;;  %v4993_v22 = vunpack.i.l.bf16 %v8290_v46  ;;  %v801_v19 = vrot.slane %v5493_v29, 5 }
 0x2dd   : > { %v2793_v15 = vpack.c.bf16 %v2632_v4, %v2631_v8  ;;  %v802_v34 = vrot.slane %v7800_v1, 5  ;;  %v804_v43 = vrot.slane %v7796_v51, 5  ;;  %v2761_v46 = vsel %vm278_vm0, %v9868_v17, %v4988_v2  ;;  %v9870_v4 = vld [vmem:[#allocation90_spill] sm:$0xff]  ;;  %v9871_v17 = vld [vmem:[#allocation55_spill] sm:$0xff] }
 0x2de   : > { %5211 = vrot.lane.b32.xlu1 %v8367_v52, %s5603_s29  ;;  %v2762_v26 = vsel %vm278_vm0, %v9869_v48, %v4989_v58  ;;  %v5009_v49 = vunpack.i.h.bf16 %v8331_v21  ;;  %v5008_v42 = vunpack.i.l.bf16 %v8331_v21  ;;  %v2537_v51 = vsel %vm2305_vm5, %v2505_v20, %v4993_v22 }
 0x2df   : > { %5206 = vrot.lane.b32.xlu0 %v9867_v40, %s5609_s8  ;;  %v2538_v37 = vsel %vm2305_vm5, %v2506_v31, %v4994_v6  ;;  %v2797_v38 = vpack.c.bf16 %v2762_v26, %v2761_v46  ;;  %v2825_v35 = vpack.c.bf16 %v2430_v5, %v2429_v11  ;;  %v803_v12 = vsel %vm730_vm9, %v801_v19, %v802_v34 }
 0x2e0   : > { %v5002_v10 = vpop.permute.xlu1 %5001  ;;  %3135 = vmatmul.bf16.gmra.mxu1 %v2793_v15  ;;  %v805_v23 = vsel %vm730_vm9, %v802_v34, %v804_v43  ;;  %v5024_v22 = vunpack.i.h.bf16 %v8374_v25  ;;  %v5494_v34 = vld [vmem:[#allocation2 + $0x1b0] sm:$0xff] }
 0x2e1   : > { %v5004_v50 = vunpack.i.h.bf16 %v5002_v10  ;;  %v5003_v63 = vunpack.i.l.bf16 %v5002_v10  ;;  %v4997_v24 = vpop.permute.xlu0 %4996  ;;  %v8425_v2 = vpack.i.bf16 %v805_v23, %v803_v12  ;;  %v5023_v10 = vunpack.i.l.bf16 %v8374_v25  ;;  %v9872_v25 = vld [vmem:[#allocation56_spill] sm:$0xff]  ;;  %v9876_v12 = vld [vmem:[#allocation181_spill] sm:$0xff] }
 0x2e2   : > { %5201 = vrot.lane.b32.xlu2 %v9854_v53, %s5608_s26  ;;  %v4999_v61 = vunpack.i.h.bf16 %v4997_v24  ;;  %v4998_v1 = vunpack.i.l.bf16 %v4997_v24  ;;  %v806_v43 = vrot.slane %v5494_v34, 5 }
 0x2e3   : > { %v8431_v6 = vpop.f32.mrf.mxu0 }
 0x2e4   : > { %v8406_v53 = vpop.permute.xlu2 %5036  ;;  %v2569_v41 = vsel %vm2338_vm6, %v2537_v51, %v4998_v1  ;;  %v2570_v13 = vsel %vm2338_vm6, %v2538_v37, %v4999_v61 }
 0x2e5   : > { %v2601_v21 = vsel %vm2371_vm7, %v2569_v41, %v5003_v63  ;;  %v2602_v36 = vsel %vm2371_vm7, %v2570_v13, %v5004_v50 }
 0x2e6   : > { %5226 = vrot.lane.b32.xlu1 %v8337_v27, %s5608_s26  ;;  %v2633_v62 = vsel %vm2404_vm8, %v2601_v21, %v5008_v42  ;;  %v2634_v8 = vsel %vm2404_vm8, %v2602_v36, %v5009_v49  ;;  %v807_v49 = vrot.slane %v7955_v39, 5  ;;  %v9874_v21 = vld [vmem:[#allocation128_spill] sm:$0xff]  ;;  %v9875_v36 = vld [vmem:[#allocation182_spill] sm:$0xff] }
 0x2e7   : > { %5221 = vrot.lane.b32.xlu0 %v9870_v4, %s5607_s17  ;;  %3101 = vmatmul.bf16.gmra.mxu0 %v2825_v35  ;;  %v2796_v14 = vpack.c.bf16 %v2634_v8, %v2633_v62  ;;  %v9877_v23 = vpack.c.bf16 %v9875_v36, %v9876_v12 }
 0x2e8   : > { %v5017_v0 = vpop.permute.xlu1 %5016  ;;  %4033 = vmatmul.msk.bf16.gmra.mxu2 %vm2239_vm3, %v2797_v38 }
 0x2e9   : > { %v5012_v58 = vpop.permute.xlu0 %5011  ;;  %v5019_v11 = vunpack.i.h.bf16 %v5017_v0  ;;  %v5018_v5 = vunpack.i.l.bf16 %v5017_v0 }
 0x2ea   : > { %5216 = vrot.lane.b32.xlu2 %v9867_v40, %s5606_s16  ;;  %v5014_v31 = vunpack.i.h.bf16 %v5012_v58  ;;  %v5013_v20 = vunpack.i.l.bf16 %v5012_v58 }
 0x2eb   : > { %v2539_v29 = vsel %vm2305_vm5, %v8116_v18, %v5018_v5  ;;  %v2540_v19 = vsel %vm2305_vm5, %v8120_v47, %v5019_v11  ;;  %v809_v47 = vrot.slane %v7951_v60, 5  ;;  %v808_v60 = vsel %vm730_vm9, %v806_v43, %v807_v49  ;;  %v8467_v8 = vpop.f32.mrf.mxu0 }
 0x2ec   : > { %v8427_v15 = vpop.permute.xlu2 %5051  ;;  %v2763_v46 = vsel %vm278_vm0, %v9871_v17, %v5013_v20  ;;  %v2764_v48 = vsel %vm278_vm0, %v9872_v25, %v5014_v31  ;;  %v2571_v61 = vsel %vm2338_vm6, %v2539_v29, %v5023_v10  ;;  %v2572_v1 = vsel %vm2338_vm6, %v2540_v19, %v5024_v22  ;;  %v8495_v17 = vld [vmem:[#allocation2 + $0x1c8] sm:$0xff] }
 0x2ed   : > { %v2800_v51 = vpack.c.bf16 %v2764_v48, %v2763_v46  ;;  %v810_v38 = vsel %vm730_vm9, %v807_v49, %v809_v47  ;;  %v5039_v5 = vunpack.i.h.bf16 %v8406_v53  ;;  %v5038_v22 = vunpack.i.l.bf16 %v8406_v53 }
 0x2ee   : > { %5241 = vrot.lane.b32.xlu1 %v8425_v2, %s5603_s29  ;;  %v8469_v0 = vpack.i.bf16 %v810_v38, %v808_v60  ;;  %v5054_v29 = vunpack.i.h.bf16 %v8427_v15  ;;  %v5053_v19 = vunpack.i.l.bf16 %v8427_v15  ;;  %v816_v15 = vrot.slane %v8495_v17, 5  ;;  %v9881_v38 = vld [vmem:[#allocation126_spill] sm:$0xff] }
 0x2ef   : > { %5236 = vrot.lane.b32.xlu0 %v8337_v27, %s5605_s15  ;;  %v9873_v27 = vld [vmem:[#allocation84_spill] sm:$0xff]  ;;  %v817_v48 = vrot.slane %v7937_v59, 5 }
 0x2f0   : > { %v5032_v40 = vpop.permute.xlu1 %5031  ;;  %3140 = vmatmul.bf16.gmra.mxu1 %v2796_v14 }
 0x2f1   : > { %v5034_v50 = vunpack.i.h.bf16 %v5032_v40  ;;  %v5033_v63 = vunpack.i.l.bf16 %v5032_v40  ;;  %v5027_v24 = vpop.permute.xlu0 %5026 }
 0x2f2   : > { %5231 = vrot.lane.b32.xlu2 %v9873_v27, %s5609_s8  ;;  %v5029_v26 = vunpack.i.h.bf16 %v5027_v24  ;;  %v5028_v18 = vunpack.i.l.bf16 %v5027_v24 }
 0x2f4   : > { %v8449_v42 = vpop.permute.xlu2 %5066  ;;  %v2603_v37 = vsel %vm2371_vm7, %v2571_v61, %v5028_v18  ;;  %v2604_v41 = vsel %vm2371_vm7, %v2572_v1, %v5029_v26  ;;  %v8504_v18 = vpop.f32.mrf.mxu0 }
 0x2f5   : > { %v2635_v13 = vsel %vm2404_vm8, %v2603_v37, %v5033_v63  ;;  %v2636_v39 = vsel %vm2404_vm8, %v2604_v41, %v5034_v50  ;;  %v9878_v50 = vld [vmem:[#allocation59_spill] sm:$0xff]  ;;  %v9879_v63 = vld [vmem:[#allocation60_spill] sm:$0xff]  ;;  %v818_v41 = vsel %vm730_vm9, %v816_v15, %v817_v48  ;;  %v5068_v60 = vunpack.i.l.bf16 %v8449_v42 }
 0x2f6   : > { %5256 = vrot.lane.b32.xlu1 %v8367_v52, %s5608_s26  ;;  %v2799_v35 = vpack.c.bf16 %v2636_v39, %v2635_v13  ;;  %v2766_v24 = vsel %vm278_vm0, %v9879_v63, %v5039_v5  ;;  %v5069_v39 = vunpack.i.h.bf16 %v8449_v42 }
 0x2f7   : > { %5251 = vrot.lane.b32.xlu0 %v9874_v21, %s5607_s17  ;;  %3106 = vmatmul.bf16.gmra.mxu0 %v9877_v23  ;;  %v9883_v21 = vld [vmem:[#allocation174_spill] sm:$0xff] }
 0x2f8   : > { %v5047_v62 = vpop.permute.xlu1 %5046  ;;  %4034 = vmatmul.msk.bf16.gmra.mxu2 %vm2239_vm3, %v2800_v51 }
 0x2f9   : > { %v5042_v4 = vpop.permute.xlu0 %5041  ;;  %v5049_v31 = vunpack.i.h.bf16 %v5047_v62  ;;  %v5048_v20 = vunpack.i.l.bf16 %v5047_v62 }
 0x2fa   : > { %5246 = vrot.lane.b32.xlu2 %v9873_v27, %s5606_s16  ;;  %v5044_v14 = vunpack.i.h.bf16 %v5042_v4  ;;  %v5043_v58 = vunpack.i.l.bf16 %v5042_v4  ;;  %v8501_v27 = vld [vmem:[#allocation2 + $0x1d8] sm:$0xff] }
 0x2fb   : > { %v819_v26 = vrot.slane %v8501_v27, 5 }
 0x2fc   : > { %v8473_v11 = vpop.permute.xlu2 %5081  ;;  %v2541_v10 = vsel %vm2305_vm5, %v8105_v56, %v5043_v58  ;;  %v2542_v40 = vsel %vm2305_vm5, %v8109_v32, %v5044_v14  ;;  %v2765_v32 = vsel %vm278_vm0, %v9878_v50, %v5038_v22  ;;  %v2544_v22 = vsel %vm2305_vm5, %v8031_v54, %v5069_v39  ;;  %v8548_v50 = vld [vmem:[#allocation2 + $0x1e0] sm:$0xff] }
 0x2fd   : > { %v2573_v53 = vsel %vm2338_vm6, %v2541_v10, %v5048_v20  ;;  %v2574_v56 = vsel %vm2338_vm6, %v2542_v40, %v5049_v31  ;;  %v2803_v1 = vpack.c.bf16 %v2766_v24, %v2765_v32  ;;  %v820_v13 = vsel %vm730_vm9, %v817_v48, %v819_v26  ;;  %v9885_v48 = vld [vmem:[#allocation53_spill] sm:$0xff] }
 0x2fe   : > { %5271 = vrot.lane.b32.xlu1 %v8469_v0, %s5603_s29  ;;  %v2605_v47 = vsel %vm2371_vm7, %v2573_v53, %v5053_v19  ;;  %v2606_v61 = vsel %vm2371_vm7, %v2574_v56, %v5054_v29  ;;  %v8524_v14 = vpack.i.bf16 %v820_v13, %v818_v41  ;;  %v5084_v42 = vunpack.i.h.bf16 %v8473_v11  ;;  %v8538_v19 = vpop.f32.mrf.mxu0 }
 0x2ff   : > { %5266 = vrot.lane.b32.xlu0 %v8367_v52, %s5605_s15  ;;  %v9880_v52 = vld [vmem:[#allocation83_spill] sm:$0xff]  ;;  %v5083_v58 = vunpack.i.l.bf16 %v8473_v11  ;;  %v2543_v20 = vsel %vm2305_vm5, %v8035_v30, %v5068_v60  ;;  %v858_v32 = vrot.slane %v8548_v50, 5  ;;  %v811_v39 = vrot.slane %v8495_v17, 3 }
 0x300   : > { %v8487_v34 = vpop.permute.xlu1 %5061  ;;  %3145 = vmatmul.bf16.gmra.mxu1 %v2799_v35  ;;  %v9882_v35 = vld [vmem:[#allocation175_spill] sm:$0xff] }
 0x301   : > { %v5057_v43 = vpop.permute.xlu0 %5056  ;;  %v9884_v36 = vpack.c.bf16 %v9882_v35, %v9883_v21  ;;  %v5064_v53 = vunpack.i.h.bf16 %v8487_v34  ;;  %v5063_v11 = vunpack.i.l.bf16 %v8487_v34  ;;  %v8553_v34 = vld [vmem:[#allocation2 + $0x1e8] sm:$0xff]  ;;  %v5500_v60 = vld [vmem:[#allocation2 + $0x1d0] sm:$0xff]  ;;  %v814_v35 = vrot.slane %v8501_v27, 3 }
 0x302   : > { %5261 = vrot.lane.b32.xlu2 %v9880_v52, %s5609_s8  ;;  %v5059_v46 = vunpack.i.h.bf16 %v5057_v43  ;;  %v5058_v25 = vunpack.i.l.bf16 %v5057_v43  ;;  %v859_v24 = vrot.slane %v8553_v34, 5 }
 0x303   : > { %v2767_v26 = vsel %vm278_vm0, %v9885_v48, %v5063_v11 }
 0x304   : > { %v8506_v49 = vpop.permute.xlu2 %5096  ;;  %v2637_v51 = vsel %vm2404_vm8, %v2605_v47, %v5058_v25  ;;  %v2638_v37 = vsel %vm2404_vm8, %v2606_v61, %v5059_v46  ;;  %v9886_v47 = vld [vmem:[#allocation54_spill] sm:$0xff] }
 0x305   : > { %v2802_v59 = vpack.c.bf16 %v2638_v37, %v2637_v51  ;;  %v2768_v61 = vsel %vm278_vm0, %v9886_v47, %v5064_v53  ;;  %v860_v51 = vsel %vm730_vm9, %v858_v32, %v859_v24  ;;  %v9892_v47 = vld [vmem:[#allocation79_spill] sm:$0xff] }
 0x306   : > { %5286 = vrot.lane.b32.xlu1 %v8425_v2, %s5608_s26  ;;  %v2806_v41 = vpack.c.bf16 %v2768_v61, %v2767_v26  ;;  %v8573_v21 = vpop.f32.mrf.mxu0 }
 0x307   : > { %5281 = vrot.lane.b32.xlu0 %v9881_v38, %s5607_s17  ;;  %3111 = vmatmul.bf16.gmra.mxu0 %v9884_v36  ;;  %v812_v38 = vrot.slane %v5500_v60, 3  ;;  %v5099_v36 = vunpack.i.h.bf16 %v8506_v49  ;;  %v821_v60 = vrot.slane %v8548_v50, 3 }
 0x308   : > { %v5077_v12 = vpop.permute.xlu1 %5076  ;;  %4035 = vmatmul.msk.bf16.gmra.mxu2 %vm2239_vm3, %v2803_v1 }
 0x309   : > { %v5079_v23 = vunpack.i.h.bf16 %v5077_v12  ;;  %v5078_v62 = vunpack.i.l.bf16 %v5077_v12  ;;  %v5072_v4 = vpop.permute.xlu0 %5071  ;;  %v5098_v12 = vunpack.i.l.bf16 %v8506_v49 }
 0x30a   : > { %5276 = vrot.lane.b32.xlu2 %v9880_v52, %s5606_s16  ;;  %v5074_v5 = vunpack.i.h.bf16 %v5072_v4  ;;  %v5073_v31 = vunpack.i.l.bf16 %v5072_v4  ;;  %v8556_v52 = vld [vmem:[#allocation2 + $0x1f0] sm:$0xff]  ;;  %v9890_v4 = vld [vmem:[#allocation106_spill] sm:$0xff] }
 0x30b   : > { %v861_v46 = vrot.slane %v8556_v52, 5 }
 0x30c   : > { %v8534_v10 = vpop.permute.xlu2 %5111  ;;  %v2575_v40 = vsel %vm2338_vm6, %v2543_v20, %v5073_v31  ;;  %v2576_v29 = vsel %vm2338_vm6, %v2544_v22, %v5074_v5  ;;  %v813_v22 = vsel %vm649_vm2, %v811_v39, %v812_v38 }
 0x30d   : > { %v2607_v30 = vsel %vm2371_vm7, %v2575_v40, %v5078_v62  ;;  %v2608_v56 = vsel %vm2371_vm7, %v2576_v29, %v5079_v23  ;;  %v862_v13 = vsel %vm730_vm9, %v859_v24, %v861_v46  ;;  %v9888_v23 = vld [vmem:[#allocation135_spill] sm:$0xff]  ;;  %v815_v40 = vsel %vm649_vm2, %v812_v38, %v814_v35 }
 0x30e   : > { %5301 = vrot.lane.b32.xlu1 %v8524_v14, %s5603_s29  ;;  %v2639_v54 = vsel %vm2404_vm8, %v2607_v30, %v5083_v58  ;;  %v2640_v43 = vsel %vm2404_vm8, %v2608_v56, %v5084_v42  ;;  %v9889_v62 = vld [vmem:[#allocation167_spill] sm:$0xff]  ;;  %v5330_v5 = vpack.i.bf16 %v862_v13, %v860_v51  ;;  %v5320_v30 = vpack.i.bf16 %v815_v40, %v813_v22 }
 0x30f   : > { %5296 = vrot.lane.b32.xlu0 %v8425_v2, %s5605_s15  ;;  %v2805_v15 = vpack.c.bf16 %v2640_v43, %v2639_v54  ;;  %v9887_v2 = vld [vmem:[#allocation78_spill] sm:$0xff]  ;;  %v9891_v42 = vpack.c.bf16 %v9889_v62, %v9890_v4  ;;  %v822_v38 = vrot.slane %v8553_v34, 3  ;;  %v824_v35 = vrot.slane %v8556_v52, 3 }
 0x310   : > { %v5092_v63 = vpop.permute.xlu1 %5091  ;;  %3150 = vmatmul.bf16.gmra.mxu1 %v2802_v59 }
 0x311   : > { %v5087_v25 = vpop.permute.xlu0 %5086  ;;  %v5094_v37 = vunpack.i.h.bf16 %v5092_v63  ;;  %v5093_v59 = vunpack.i.l.bf16 %v5092_v63  ;;  %v823_v62 = vsel %vm649_vm2, %v821_v60, %v822_v38 }
 0x312   : > { %5291 = vrot.lane.b32.xlu2 %v9887_v2, %s5609_s8  ;;  %v5089_v43 = vunpack.i.h.bf16 %v5087_v25  ;;  %v5088_v32 = vunpack.i.l.bf16 %v5087_v25 }
 0x313   : > { %v2545_v17 = vsel %vm2305_vm5, %v8173_v55, %v5093_v59  ;;  %v2546_v27 = vsel %vm2305_vm5, %v8177_v7, %v5094_v37 }
 0x314   : > { %v8565_v1 = vpop.permute.xlu2 %5126  ;;  %v2577_v55 = vsel %vm2338_vm6, %v2545_v17, %v5098_v12  ;;  %v2578_v7 = vsel %vm2338_vm6, %v2546_v27, %v5099_v36  ;;  %v2769_v61 = vsel %vm278_vm0, %v9892_v47, %v5088_v32 }
 0x315   : > { %v5129_v36 = vunpack.i.h.bf16 %v8565_v1  ;;  %v5128_v12 = vunpack.i.l.bf16 %v8565_v1  ;;  %v825_v1 = vsel %vm649_vm2, %v822_v38, %v824_v35 }
 0x316   : > { %5316 = vrot.lane.b32.xlu1 %v8469_v0, %s5608_s26 }
 0x317   : > { %5311 = vrot.lane.b32.xlu0 %v9888_v23, %s5607_s17  ;;  %3116 = vmatmul.bf16.gmra.mxu0 %v9891_v42  ;;  %v9894_v23 = vld [vmem:[#allocation134_spill] sm:$0xff] }
 0x318   : > { %v5107_v58 = vpop.permute.xlu1 %5106  ;;  %4036 = vmatmul.msk.bf16.gmra.mxu2 %vm2239_vm3, %v2806_v41 }
 0x319   : > { %v5109_v31 = vunpack.i.h.bf16 %v5107_v58  ;;  %v5108_v20 = vunpack.i.l.bf16 %v5107_v58  ;;  %v5102_v49 = vpop.permute.xlu0 %5101 }
 0x31a   : > { %5306 = vrot.lane.b32.xlu2 %v9887_v2, %s5606_s16  ;;  %v5104_v29 = vunpack.i.h.bf16 %v5102_v49  ;;  %v5103_v53 = vunpack.i.l.bf16 %v5102_v49  ;;  %v9893_v2 = vld [vmem:[#allocation80_spill] sm:$0xff]  ;;  %v5350_v49 = vpack.i.bf16 %v825_v1, %v823_v62 }
 0x31b   : > { %v2770_v51 = vsel %vm278_vm0, %v9893_v2, %v5089_v43  ;;  %v9899_v62 = vld [vmem:[#allocation72_spill] sm:$0xff] }
 0x31c   : > { %v8591_v11 = vpop.permute.xlu2 %5141  ;;  %v2609_v56 = vsel %vm2371_vm7, %v2577_v55, %v5103_v53  ;;  %v2610_v54 = vsel %vm2371_vm7, %v2578_v7, %v5104_v29  ;;  %v2809_v39 = vpack.c.bf16 %v2770_v51, %v2769_v61 }
 0x31d   : > { %v2641_v63 = vsel %vm2404_vm8, %v2609_v56, %v5108_v20  ;;  %v2642_v24 = vsel %vm2404_vm8, %v2610_v54, %v5109_v31  ;;  %v5113_v31 = vunpack.i.l.bf16 %v8534_v10  ;;  %v5144_v22 = vunpack.i.h.bf16 %v8591_v11  ;;  %v9896_v54 = vld [vmem:[#allocation74_spill] sm:$0xff] }
 0x31e   : > { %5331 = vrot.lane.b32.xlu1 %v5330_v5, %s5603_s29  ;;  %v2808_v46 = vpack.c.bf16 %v2642_v24, %v2641_v63  ;;  %v5114_v5 = vunpack.i.h.bf16 %v8534_v10  ;;  %v5143_v40 = vunpack.i.l.bf16 %v8591_v11 }
 0x31f   : > { %5326 = vrot.lane.b32.xlu0 %v8469_v0, %s5605_s15 }
 0x320   : > { %v5122_v48 = vpop.permute.xlu1 %5121  ;;  %3155 = vmatmul.bf16.gmra.mxu1 %v2805_v15  ;;  %v2772_v43 = vsel %vm278_vm0, %v9896_v54, %v5114_v5  ;;  %v2549_v11 = vsel %vm2305_vm5, %v8082_v45, %v5143_v40  ;;  %v8683_v40 = vld [vmem:[%s9218_s2] ss:$0 sm:$0xff] }
 0x321   : > { %v5117_v26 = vpop.permute.xlu0 %5116  ;;  %v5124_v41 = vunpack.i.h.bf16 %v5122_v48  ;;  %v5123_v13 = vunpack.i.l.bf16 %v5122_v48 }
 0x322   : > { %5321 = vrot.lane.b32.xlu2 %v5320_v30, %s5609_s8  ;;  %v5119_v25 = vunpack.i.h.bf16 %v5117_v26  ;;  %v5118_v37 = vunpack.i.l.bf16 %v5117_v26 }
 0x324   : > { %v5157_v59 = vpop.permute.xlu2 %5156  ;;  %v2547_v0 = vsel %vm2305_vm5, %v8158_v9, %v5118_v37  ;;  %v2548_v15 = vsel %vm2305_vm5, %v8162_v33, %v5119_v25 }
 0x325   : > { %v2579_v33 = vsel %vm2338_vm6, %v2547_v0, %v5123_v13  ;;  %v5159_v10 = vunpack.i.h.bf16 %v5157_v59  ;;  %v5158_v32 = vunpack.i.l.bf16 %v5157_v59 }
 0x326   : > { %5346 = vrot.lane.b32.xlu1 %v8524_v14, %s5608_s26  ;;  %v2580_v14 = vsel %vm2338_vm6, %v2548_v15, %v5124_v41  ;;  %v2611_v42 = vsel %vm2371_vm7, %v2579_v33, %v5128_v12  ;;  %v9897_v12 = vld [vmem:[#allocation48_spill] sm:$0xff] }
 0x327   : > { %5341 = vrot.lane.b32.xlu0 %v9894_v23, %s5607_s17  ;;  %v2612_v58 = vsel %vm2371_vm7, %v2580_v14, %v5129_v36  ;;  %s3874_s17 = sshll.u32 %s244_s25, 4  ;;  %s3875_s17 = int_to_ptr.vmem [resolvable:$true] %s3874_s17 }
 0x328   : > { %v8620_v9 = vpop.permute.xlu1 %5136  ;;  %4037 = vmatmul.msk.bf16.gmra.mxu2 %vm2239_vm3, %v2809_v39 }
 0x329   : > { %v5132_v50 = vpop.permute.xlu0 %5131  ;;  %v5139_v0 = vunpack.i.h.bf16 %v8620_v9  ;;  %v5138_v15 = vunpack.i.l.bf16 %v8620_v9 }
 0x32a   : > { %5336 = vrot.lane.b32.xlu2 %v5320_v30, %s5606_s16  ;;  %v5134_v34 = vunpack.i.h.bf16 %v5132_v50  ;;  %v5133_v52 = vunpack.i.l.bf16 %v5132_v50  ;;  %v9895_v30 = vld [vmem:[#allocation73_spill] sm:$0xff]  ;;  %s3873_s16 = scalar_lea.hbm %s9221_s5, %s4097_s13 }
 0x32b   : > { %v2771_v56 = vsel %vm278_vm0, %v9895_v30, %v5113_v31  ;;  %v2774_v1 = vsel %vm278_vm0, %v9899_v62, %v5139_v0  ;;  %v9903_v0 = vld [vmem:[#allocation89_spill] sm:$0xff]  ;;  %s3876_s26 = sshll.u32 %s3873_s16, 4  ;;  %s3877_s26 = int_to_ptr.hbm [resolvable:$true] %s3876_s26 }
 0x32c   : > { %v5172_v4 = vpop.permute.xlu2 %5171  ;;  %v2643_v17 = vsel %vm2404_vm8, %v2611_v42, %v5133_v52  ;;  %v2644_v27 = vsel %vm2404_vm8, %v2612_v58, %v5134_v34  ;;  %v2812_v61 = vpack.c.bf16 %v2772_v43, %v2771_v56  ;;  %v9898_v34 = vld [vmem:[#allocation71_spill] sm:$0xff]  ;;  %v3043_v56 = vadd.f32 %v8683_v40, %v8317_v28  ;;  %s5546_s9 = sshra.s32 %s3877_s26, 4  ;;  %s5547_s9 = int_to_ptr.hbm [resolvable:$true] %s5546_s9 }
 0x32d   : > { %v2811_v20 = vpack.c.bf16 %v2644_v27, %v2643_v17  ;;  %v5174_v60 = vunpack.i.h.bf16 %v5172_v4  ;;  %v5173_v38 = vunpack.i.l.bf16 %v5172_v4  ;;  %v2773_v52 = vsel %vm278_vm0, %v9898_v34, %v5138_v15  ;;  %s5548_s10 = scalar_lea.hbm %s5547_s9, 32  ;;  %p5553_p0 = scmp.lt.s32.totalorder %s5547_s9, %s9221_s5 }
 0x32e   : > { %v2815_v17 = vpack.c.bf16 %v2774_v1, %v2773_v52  ;;  %p5549_p6 = scmp.ne.s32.totalorder %s5547_s9, %s5548_s10  ;;  %p5554_p1 = scmp.lt.s32.totalorder %s5552_s11, %s5548_s10 }
 0x330   : > { %v5152_v29 = vpop.permute.xlu1 %5151  ;;  %3160 = vmatmul.bf16.gmra.mxu1 %v2808_v46  ;;  %v2550_v46 = vsel %vm2305_vm5, %v8078_v3, %v5144_v22  ;;  %p5550_p9 = pnand %p5549_p6, %p5691_p11  ;;  %p5555_p3 = por %p5554_p1, %p5553_p0 }
 0x331   : > { %v5154_v53 = vunpack.i.h.bf16 %v5152_v29  ;;  %v5153_v55 = vunpack.i.l.bf16 %v5152_v29  ;;  %v5147_v7 = vpop.permute.xlu0 %5146 }
 0x332   : > { %5351 = vrot.lane.b32.xlu2 %v5350_v49, %s5609_s8  ;;  %v5149_v63 = vunpack.i.h.bf16 %v5147_v7  ;;  %v5148_v24 = vunpack.i.l.bf16 %v5147_v7  ;;  %s3862_s8 = scalar_lea.sflag [#allocation5], %s5727_s12  ;;  %p5551_p13 = pneg %p5550_p9 }
 0x334   : > { %v8645_v48 = vpop.permute.xlu2 %5186  ;;  %v2581_v26 = vsel %vm2338_vm6, %v2549_v11, %v5148_v24  ;;  %v2582_v47 = vsel %vm2338_vm6, %v2550_v46, %v5149_v63  ;;  %v9900_v24 = vld [vmem:[#allocation111_spill] sm:$0xff]  ;;  %v9901_v46 = vld [vmem:[#allocation112_spill] sm:$0xff]  ;;  %p5556_p4 = pnand %p5555_p3, %p5551_p13 }
 0x335   : > { %v2613_v2 = vsel %vm2371_vm7, %v2581_v26, %v5153_v55  ;;  %v2614_v51 = vsel %vm2371_vm7, %v2582_v47, %v5154_v53 }
 0x336   : > { %v2645_v25 = vsel %vm2404_vm8, %v2613_v2, %v5158_v32  ;;  %v2646_v37 = vsel %vm2404_vm8, %v2614_v51, %v5159_v10  ;;  %v4096_v10 = vld [vmem:[%s9219_s3 + $0x8] sm:$0xff] }
 0x337   : > { %v2814_v45 = vpack.c.bf16 %v2646_v37, %v2645_v25  ;;  %3678 = vmatpush.bf16.msra.mxu3 %v4096_v10 }
 0x338   : > { %v5167_v59 = vpop.permute.xlu1 %5166  ;;  %4038 = vmatmul.msk.bf16.gmra.mxu2 %vm2239_vm3, %v2812_v61 }
 0x339   : > { %v5162_v3 = vpop.permute.xlu0 %5161  ;;  %v5169_v13 = vunpack.i.h.bf16 %v5167_v59  ;;  %v5168_v39 = vunpack.i.l.bf16 %v5167_v59 }
 0x33a   : > { %v5164_v32 = vunpack.i.h.bf16 %v5162_v3  ;;  %v5163_v63 = vunpack.i.l.bf16 %v5162_v3 }
 0x33b   : > { %v2551_v36 = vsel %vm2305_vm5, %v8225_v16, %v5168_v39  ;;  %v2552_v23 = vsel %vm2305_vm5, %v9897_v12, %v5169_v13  ;;  %v9902_v13 = vld [vmem:[#allocation88_spill] sm:$0xff] }
 0x33c   : > { %v8654_v41 = vpop.permute.xlu2 %5201  ;;  %v2583_v58 = vsel %vm2338_vm6, %v2551_v36, %v5173_v38  ;;  %v2584_v16 = vsel %vm2338_vm6, %v2552_v23, %v5174_v60  ;;  %v2775_v39 = vsel %vm278_vm0, %v9902_v13, %v5163_v63  ;;  %v2776_v15 = vsel %vm278_vm0, %v9903_v0, %v5164_v32 }
 0x33d   : > { %v5204_v2 = vunpack.i.h.bf16 %v8654_v41  ;;  %v5203_v28 = vunpack.i.l.bf16 %v8654_v41 }
 0x340   : > { %v5182_v35 = vpop.permute.xlu1 %5181  ;;  %3165 = vmatmul.bf16.gmra.mxu1 %v2811_v20 }
 0x341   : > { %v5177_v33 = vpop.permute.xlu0 %5176  ;;  %v5184_v14 = vunpack.i.h.bf16 %v5182_v35  ;;  %v5183_v50 = vunpack.i.l.bf16 %v5182_v35  ;;  %v4095_v35 = vld [vmem:[%s9219_s3] sm:$0xff] }
 0x342   : > { %v5179_v9 = vunpack.i.h.bf16 %v5177_v33  ;;  %v5178_v42 = vunpack.i.l.bf16 %v5177_v33  ;;  %v3045_v33 = vadd.f32 %v8683_v40, %v8372_v44  ;;  %3679 = vmatpush.bf16.msra.mxu3 %v4095_v35 }
 0x344   : > { %v8666_v4 = vpop.permute.xlu2 %5216  ;;  %v2615_v27 = vsel %vm2371_vm7, %v2583_v58, %v5178_v42  ;;  %v2616_v5 = vsel %vm2371_vm7, %v2584_v16, %v5179_v9 }
 0x345   : > { %v8673_v31 = vsel %vm2404_vm8, %v2615_v27, %v5183_v50  ;;  %v8676_v20 = vsel %vm2404_vm8, %v2616_v5, %v5184_v14  ;;  %v2818_v14 = vpack.c.bf16 %v2776_v15, %v2775_v39  ;;  %v5219_v42 = vunpack.i.h.bf16 %v8666_v4 }
 0x346   : > { %v2817_v49 = vpack.c.bf16 %v8676_v20, %v8673_v31  ;;  %v5218_v58 = vunpack.i.l.bf16 %v8666_v4  ;;  %v3050_v31 = vadd.f32 %v8683_v40, %v8431_v6 }
 0x348   : > { %v5197_v22 = vpop.permute.xlu1 %5196  ;;  %4039 = vmatmul.msk.bf16.gmra.mxu2 %vm2239_vm3, %v2815_v17 }
 0x349   : > { %v5192_v29 = vpop.permute.xlu0 %5191  ;;  %v5199_v54 = vunpack.i.h.bf16 %v5197_v22  ;;  %v5198_v43 = vunpack.i.l.bf16 %v5197_v22 }
 0x34a   : > { %v5194_v53 = vunpack.i.h.bf16 %v5192_v29  ;;  %v5193_v55 = vunpack.i.l.bf16 %v5192_v29  ;;  %v8735_v29 = vpop.f32.mrf.mxu0 }
 0x34b   : > { %v3220_v7 = vpop.f32.mrf.mxu2 }
 0x34c   : > { %v8686_v30 = vpop.permute.xlu2 %5231  ;;  %v2553_v11 = vsel %vm2305_vm5, %v9900_v24, %v5193_v55  ;;  %v2554_v26 = vsel %vm2305_vm5, %v9901_v46, %v5194_v53  ;;  %v3048_v46 = vadd.f32 %v8683_v40, %v8410_v57 }
 0x34d   : > { %v3131_v47 = vpop.f32.mrf.mxu1  ;;  %v2585_v25 = vsel %vm2338_vm6, %v2553_v11, %v5198_v43  ;;  %v2586_v37 = vsel %vm2338_vm6, %v2554_v26, %v5199_v54  ;;  %v9904_v54 = vld [vmem:[#allocation101_spill] sm:$0xff]  ;;  %v9905_v43 = vld [vmem:[#allocation100_spill] sm:$0xff]  ;;  %v5234_v32 = vunpack.i.h.bf16 %v8686_v30  ;;  %v5233_v63 = vunpack.i.l.bf16 %v8686_v30 }
 0x34e   : > { %v3132_v61 = vadd.f32 %v3131_v47, %v3043_v56  ;;  %v2618_v23 = vsel %vm2371_vm7, %v2586_v37, %v5204_v2  ;;  %v2555_v4 = vsel %vm2305_vm5, %v9904_v54, %v5218_v58  ;;  %v2556_v10 = vsel %vm2305_vm5, %v9905_v43, %v5219_v42 }
 0x34f   : > { %v5188_v2 = vunpack.i.l.bf16 %v8645_v48 }
 0x350   : > { %v8699_v51 = vpop.permute.xlu1 %5211  ;;  %v8703_v59 = vadd.f32 %v3220_v7, %v3132_v61  ;;  %3170 = vmatmul.bf16.gmra.mxu1 %v2814_v45  ;;  %v2617_v45 = vsel %vm2371_vm7, %v2585_v25, %v5203_v28  ;;  %v5189_v61 = vunpack.i.h.bf16 %v8645_v48 }
 0x351   : > { %v5207_v3 = vpop.permute.xlu0 %5206 }
 0x352   : > { %v3332_v60 = vmul.f32 0.044715, %v8703_v59  ;;  %v5209_v38 = vunpack.i.h.bf16 %v5207_v3  ;;  %v5208_v41 = vunpack.i.l.bf16 %v5207_v3  ;;  %v8779_v20 = vpop.f32.mrf.mxu0  ;;  %v3300_v43 = vmul.f32 0.5, %v8703_v59 }
 0x353   : > { %v3222_v36 = vpop.f32.mrf.mxu2 }
 0x354   : > { %v8713_v12 = vpop.permute.xlu2 %5246  ;;  %v8720_v50 = vsel %vm2404_vm8, %v2617_v45, %v5208_v41  ;;  %v8723_v34 = vsel %vm2404_vm8, %v2618_v23, %v5209_v38  ;;  %v3364_v1 = vmul.f32 %v3332_v60, %v8703_v59  ;;  %v9906_v41 = vld [vmem:[#allocation86_spill] sm:$0xff] }
 0x355   : > { %v3133_v52 = vpop.f32.mrf.mxu1  ;;  %v2820_v62 = vpack.c.bf16 %v8723_v34, %v8720_v50  ;;  %v2777_v35 = vsel %vm278_vm0, %v9906_v41, %v5188_v2  ;;  %v5213_v41 = vunpack.i.l.bf16 %v8699_v51  ;;  %v3055_v34 = vadd.f32 %v8683_v40, %v8504_v18 }
 0x356   : > { %v3134_v9 = vadd.f32 %v3133_v52, %v3045_v33  ;;  %v3396_v16 = vmul.f32 %v3364_v1, %v8703_v59 }
 0x358   : > { %v5227_v44 = vpop.permute.xlu1 %5226  ;;  %v8731_v17 = vadd.f32 %v3222_v36, %v3134_v9  ;;  %4040 = vmatmul.msk.bf16.gmra.mxu2 %vm2239_vm3, %v2818_v14  ;;  %v3428_v22 = vadd.f32 %v3396_v16, %v8703_v59  ;;  %v9907_v36 = vld [vmem:[#allocation87_spill] sm:$0xff] }
 0x359   : > { %v5222_v27 = vpop.permute.xlu0 %5221  ;;  %v5229_v5 = vunpack.i.h.bf16 %v5227_v44  ;;  %v5228_v56 = vunpack.i.l.bf16 %v5227_v44  ;;  %v2778_v45 = vsel %vm278_vm0, %v9907_v36, %v5189_v61 }
 0x35a   : > { %v3333_v53 = vmul.f32 0.044715, %v8731_v17  ;;  %v5224_v55 = vunpack.i.h.bf16 %v5222_v27  ;;  %v5223_v7 = vunpack.i.l.bf16 %v5222_v27  ;;  %v3460_v37 = vmul.f32 0.7978846, %v3428_v22 }
 0x35b   : > { %v3225_v24 = vpop.f32.mrf.mxu2  ;;  %v2821_v9 = vpack.c.bf16 %v2778_v45, %v2777_v35  ;;  %v3053_v27 = vadd.f32 %v8683_v40, %v8467_v8  ;;  %v5248_v22 = vunpack.i.l.bf16 %v8713_v12 }
 0x35c   : > { %v8744_v11 = vpop.permute.xlu2 %5261  ;;  %v2587_v26 = vsel %vm2338_vm6, %v2555_v4, %v5223_v7  ;;  %v2588_v47 = vsel %vm2338_vm6, %v2556_v10, %v5224_v55  ;;  %v3365_v25 = vmul.f32 %v3333_v53, %v8731_v17  ;;  %5357 = vtanh.f32 %v3460_v37  ;;  %v9908_v55 = vld [vmem:[#allocation102_spill] sm:$0xff] }
 0x35d   : > { %v3136_v28 = vpop.f32.mrf.mxu1  ;;  %v2619_v30 = vsel %vm2371_vm7, %v2587_v26, %v5228_v56  ;;  %v2620_v13 = vsel %vm2371_vm7, %v2588_v47, %v5229_v5  ;;  %v5249_v5 = vunpack.i.h.bf16 %v8713_v12  ;;  %v9909_v56 = vld [vmem:[#allocation108_spill] sm:$0xff]  ;;  %v5264_v12 = vunpack.i.h.bf16 %v8744_v11 }
 0x35e   : > { %v3137_v3 = vadd.f32 %v3136_v28, %v3048_v46  ;;  %v3397_v57 = vmul.f32 %v3365_v25, %v8731_v17  ;;  %v8759_v0 = vsel %vm2404_vm8, %v2619_v30, %v5233_v63  ;;  %v8762_v15 = vsel %vm2404_vm8, %v2620_v13, %v5234_v32 }
 0x35f   : > { %v2823_v60 = vpack.c.bf16 %v8762_v15, %v8759_v0  ;;  %v5263_v25 = vunpack.i.l.bf16 %v8744_v11  ;;  %v3301_v13 = vmul.f32 0.5, %v8731_v17  ;;  %v8810_v11 = vpop.f32.mrf.mxu0 }
 0x360   : > { %v8755_v39 = vpop.permute.xlu1 %5241  ;;  %v8764_v48 = vadd.f32 %v3225_v24, %v3137_v3  ;;  %3175 = vmatmul.bf16.gmra.mxu1 %v2817_v49  ;;  %v3429_v23 = vadd.f32 %v3397_v57, %v8731_v17 }
 0x361   : > { %v5237_v38 = vpop.permute.xlu0 %5236  ;;  %v5244_v18 = vunpack.i.h.bf16 %v8755_v39 }
 0x362   : > { %v3334_v33 = vmul.f32 0.044715, %v8764_v48  ;;  %v3461_v52 = vmul.f32 0.7978846, %v3429_v23  ;;  %v5239_v49 = vunpack.i.h.bf16 %v5237_v38  ;;  %v5238_v1 = vunpack.i.l.bf16 %v5237_v38  ;;  %v5358_v16 = vpop.eup %5357 }
 0x363   : > { %v3227_v14 = vpop.f32.mrf.mxu2  ;;  %v3524_v47 = vadd.f32 1.0, %v5358_v16  ;;  %v5214_v38 = vunpack.i.h.bf16 %v8699_v51  ;;  %v9910_v16 = vld [vmem:[#allocation123_spill] sm:$0xff] }
 0x364   : > { %5359 = vtanh.f32 %v3461_v52  ;;  %v8781_v58 = vpop.permute.xlu2 %5276  ;;  %v3366_v6 = vmul.f32 %v3334_v33, %v8764_v48  ;;  %v2525_v7 = vsel %vm2272_vm4, %v9908_v55, %v5238_v1  ;;  %v2526_v54 = vsel %vm2272_vm4, %v9909_v56, %v5239_v49 }
 0x365   : > { %v3138_v42 = vpop.f32.mrf.mxu1  ;;  %v2557_v2 = vsel %vm2305_vm5, %v2525_v7, %v5248_v22  ;;  %v2558_v28 = vsel %vm2305_vm5, %v2526_v54, %v5249_v5  ;;  %v3556_v33 = vmul.f32 %v3524_v47, %v3300_v43  ;;  %v9911_v5 = vld [vmem:[#allocation124_spill] sm:$0xff]  ;;  %v9912_v47 = vld [vmem:[#allocation58_spill] sm:$0xff] }
 0x366   : > { %v3139_v44 = vadd.f32 %v3138_v42, %v3050_v31  ;;  %v3398_v63 = vmul.f32 %v3366_v6, %v8764_v48  ;;  %v2780_v22 = vsel %vm278_vm0, %v9911_v5, %v5214_v38 }
 0x368   : > { %v5257_v53 = vpop.permute.xlu1 %5256  ;;  %v8792_v4 = vadd.f32 %v3227_v14, %v3139_v44  ;;  %4041 = vmatmul.msk.bf16.gmra.mxu2 %vm2239_vm3, %v2821_v9  ;;  %v3430_v37 = vadd.f32 %v3398_v63, %v8764_v48  ;;  %v5279_v63 = vunpack.i.h.bf16 %v8781_v58 }
 0x369   : > { %v5252_v8 = vpop.permute.xlu0 %5251  ;;  %v5259_v10 = vunpack.i.h.bf16 %v5257_v53  ;;  %v5258_v32 = vunpack.i.l.bf16 %v5257_v53 }
 0x36a   : > { %v3335_v24 = vmul.f32 0.044715, %v8792_v4  ;;  %v5254_v46 = vunpack.i.h.bf16 %v5252_v8  ;;  %v5253_v26 = vunpack.i.l.bf16 %v5252_v8  ;;  %v5360_v61 = vpop.eup %5359  ;;  %v3462_v49 = vmul.f32 0.7978846, %v3430_v37 }
 0x36b   : > { %v3230_v59 = vpop.f32.mrf.mxu2  ;;  %v3525_v57 = vadd.f32 1.0, %v5360_v61 }
 0x36c   : > { %v2589_v3 = vsel %vm2338_vm6, %v2557_v2, %v5253_v26  ;;  %v2590_v30 = vsel %vm2338_vm6, %v2558_v28, %v5254_v46  ;;  %v3367_v52 = vmul.f32 %v3335_v24, %v8792_v4  ;;  %v8815_v17 = vpop.permute.xlu2 %5291  ;;  %5361 = vtanh.f32 %v3462_v49  ;;  %v8845_v26 = vpop.f32.mrf.mxu0  ;;  %v9913_v2 = vld [vmem:[#allocation162_spill] sm:$0xff] }
 0x36d   : > { %v2621_v35 = vsel %vm2371_vm7, %v2589_v3, %v5258_v32  ;;  %v2622_v36 = vsel %vm2371_vm7, %v2590_v30, %v5259_v10  ;;  %v3141_v45 = vpop.f32.mrf.mxu1  ;;  %v3557_v14 = vmul.f32 %v3525_v57, %v3301_v13  ;;  %v5278_v24 = vunpack.i.l.bf16 %v8781_v58 }
 0x36e   : > { %v3142_v23 = vadd.f32 %v3141_v45, %v3053_v27  ;;  %v8818_v1 = vsel %vm2404_vm8, %v2621_v35, %v5263_v25  ;;  %v8821_v51 = vsel %vm2404_vm8, %v2622_v36, %v5264_v12  ;;  %v2779_v27 = vsel %vm278_vm0, %v9910_v16, %v5213_v41 }
 0x36f   : > { %v3588_v42 = vpack.c.bf16 %v3557_v14, %v3556_v33  ;;  %v3399_v53 = vmul.f32 %v3367_v52, %v8792_v4  ;;  %v2826_v6 = vpack.c.bf16 %v8821_v51, %v8818_v1  ;;  %v2824_v54 = vpack.c.bf16 %v2780_v22, %v2779_v27 }
 0x370   : > { %v8813_v31 = vpop.permute.xlu1 %5271  ;;  %v8823_v9 = vadd.f32 %v3230_v59, %v3142_v23  ;;  %3180 = vmatmul.bf16.gmra.mxu1 %v2820_v62  ;;  %v3058_v12 = vadd.f32 %v8683_v40, %v8538_v19  ;;  %v5243_v59 = vunpack.i.l.bf16 %v8755_v39  ;;  %v5293_v35 = vunpack.i.l.bf16 %v8815_v17 }
 0x371   : > { %v5267_v44 = vpop.permute.xlu0 %5266  ;;  %4055 = vmatmul.msk.bf16.vlgmr.msra.gmra.mxu3 %vm2239_vm3, %v3588_v42  ;;  %v3431_v50 = vadd.f32 %v3399_v53, %v8792_v4  ;;  %v5294_v23 = vunpack.i.h.bf16 %v8815_v17  ;;  %v3302_v49 = vmul.f32 0.5, %v8764_v48  ;;  %v3303_v22 = vmul.f32 0.5, %v8792_v4 }
 0x372   : > { %v3336_v55 = vmul.f32 0.044715, %v8823_v9  ;;  %v5269_v62 = vunpack.i.h.bf16 %v5267_v44  ;;  %v5268_v56 = vunpack.i.l.bf16 %v5267_v44  ;;  %v5362_v19 = vpop.eup %5361  ;;  %v3065_v1 = vadd.f32 %v8683_v40, %v8779_v20 }
 0x373   : > { %v3232_v7 = vpop.f32.mrf.mxu2  ;;  %v3463_v8 = vmul.f32 0.7978846, %v3431_v50  ;;  %v3526_v42 = vadd.f32 1.0, %v5362_v19  ;;  %v3068_v20 = vadd.f32 %v8683_v40, %v8810_v11 }
 0x374   : > { %v3368_v32 = vmul.f32 %v3336_v55, %v8823_v9  ;;  %v2527_v61 = vsel %vm2272_vm4, %v9912_v47, %v5268_v56  ;;  %v2528_v28 = vsel %vm2272_vm4, %v9913_v2, %v5269_v62  ;;  %v8856_v30 = vpop.permute.xlu2 %5306  ;;  %v9914_v56 = vld [vmem:[#allocation121_spill] sm:$0xff] }
 0x375   : > { %v3143_v43 = vpop.f32.mrf.mxu1  ;;  %5363 = vtanh.f32 %v3463_v8  ;;  %v2559_v36 = vsel %vm2305_vm5, %v2527_v61, %v5278_v24  ;;  %v2560_v45 = vsel %vm2305_vm5, %v2528_v28, %v5279_v63  ;;  %v3558_v4 = vmul.f32 %v3526_v42, %v3302_v49 }
 0x376   : > { %v3144_v10 = vadd.f32 %v3143_v43, %v3055_v34  ;;  %v3400_v13 = vmul.f32 %v3368_v32, %v8823_v9 }
 0x378   : > { %v5287_v46 = vpop.permute.xlu1 %5286  ;;  %v8852_v25 = vadd.f32 %v3232_v7, %v3144_v10  ;;  %4042 = vmatmul.msk.bf16.gmra.mxu2 %vm2239_vm3, %v2824_v54  ;;  %v3432_v33 = vadd.f32 %v3400_v13, %v8823_v9  ;;  %v2782_v54 = vsel %vm278_vm0, %v9914_v56, %v5244_v18  ;;  %v9915_v10 = vld [vmem:[#allocation120_spill] sm:$0xff]  ;;  %v3063_v13 = vadd.f32 %v8683_v40, %v8735_v29 }
 0x379   : > { %v5282_v58 = vpop.permute.xlu0 %5281  ;;  %v5289_v37 = vunpack.i.h.bf16 %v5287_v46  ;;  %v5288_v3 = vunpack.i.l.bf16 %v5287_v46  ;;  %v2781_v32 = vsel %vm278_vm0, %v9915_v10, %v5243_v59  ;;  %v8893_v46 = vpop.f32.mrf.mxu0 }
 0x37a   : > { %v3337_v57 = vmul.f32 0.044715, %v8852_v25  ;;  %v5284_v38 = vunpack.i.h.bf16 %v5282_v58  ;;  %v5283_v41 = vunpack.i.l.bf16 %v5282_v58  ;;  %v3464_v7 = vmul.f32 0.7978846, %v3432_v33 }
 0x37b   : > { %v3235_v39 = vpop.f32.mrf.mxu2  ;;  %v5364_v44 = vpop.eup %5363  ;;  %v2827_v2 = vpack.c.bf16 %v2782_v54, %v2781_v32  ;;  %v3304_v33 = vmul.f32 0.5, %v8823_v9  ;;  %v3305_v54 = vmul.f32 0.5, %v8852_v25 }
 0x37c   : > { %v2591_v14 = vsel %vm2338_vm6, %v2559_v36, %v5283_v41  ;;  %v2592_v52 = vsel %vm2338_vm6, %v2560_v45, %v5284_v38  ;;  %v3369_v17 = vmul.f32 %v3337_v57, %v8852_v25  ;;  %v3527_v55 = vadd.f32 1.0, %v5364_v44  ;;  %v5322_v0 = vpop.permute.xlu2 %5321  ;;  %v9917_v45 = vld [vmem:[#allocation169_spill] sm:$0xff] }
 0x37d   : > { %v2623_v16 = vsel %vm2371_vm7, %v2591_v14, %v5288_v3  ;;  %v2624_v27 = vsel %vm2371_vm7, %v2592_v52, %v5289_v37  ;;  %v3146_v5 = vpop.f32.mrf.mxu1  ;;  %5365 = vtanh.f32 %v3464_v7  ;;  %v5274_v57 = vunpack.i.h.bf16 %v8813_v31 }
 0x37e   : > { %v3147_v53 = vadd.f32 %v3146_v5, %v3058_v12  ;;  %v8873_v50 = vsel %vm2404_vm8, %v2623_v16, %v5293_v35  ;;  %v3401_v48 = vmul.f32 %v3369_v17, %v8852_v25  ;;  %v8879_v62 = vsel %vm2404_vm8, %v2624_v27, %v5294_v23  ;;  %v9916_v35 = vld [vmem:[#allocation156_spill] sm:$0xff] }
 0x37f   : > { %v3559_v8 = vmul.f32 %v3527_v55, %v3303_v22  ;;  %v2829_v24 = vpack.c.bf16 %v8879_v62, %v8873_v50  ;;  %v5309_v38 = vunpack.i.h.bf16 %v8856_v30  ;;  %v5324_v27 = vunpack.i.h.bf16 %v5322_v0 }
 0x380   : > { %v8875_v34 = vpop.permute.xlu1 %5301  ;;  %v8883_v43 = vadd.f32 %v3235_v39, %v3147_v53  ;;  %3185 = vmatmul.bf16.gmra.mxu1 %v2823_v60  ;;  %v3433_v63 = vadd.f32 %v3401_v48, %v8852_v25  ;;  %v3060_v60 = vadd.f32 %v8683_v40, %v8573_v21  ;;  %v5308_v21 = vunpack.i.l.bf16 %v8856_v30 }
 0x381   : > { %v5297_v12 = vpop.permute.xlu0 %5296  ;;  %v3589_v47 = vpack.c.bf16 %v3559_v8, %v3558_v4  ;;  %v5323_v53 = vunpack.i.l.bf16 %v5322_v0  ;;  %v8918_v7 = vpop.f32.mrf.mxu0  ;;  %v5273_v8 = vunpack.i.l.bf16 %v8813_v31  ;;  %v3070_v62 = vadd.f32 %v8683_v40, %v8845_v26 }
 0x382   : > { %v3338_v18 = vmul.f32 0.044715, %v8883_v43  ;;  %v3465_v15 = vmul.f32 0.7978846, %v3433_v63  ;;  %v5299_v28 = vunpack.i.h.bf16 %v5297_v12  ;;  %v5298_v19 = vunpack.i.l.bf16 %v5297_v12 }
 0x383   : > { %v3237_v61 = vpop.f32.mrf.mxu2  ;;  %4056 = vmatmul.msk.bf16.gmra.mxu3 %vm2239_vm3, %v3589_v47  ;;  %v5366_v3 = vpop.eup %5365 }
 0x384   : > { %5367 = vtanh.f32 %v3465_v15  ;;  %v3370_v37 = vmul.f32 %v3338_v18, %v8883_v43  ;;  %v2529_v36 = vsel %vm2272_vm4, %v9916_v35, %v5298_v19  ;;  %v2530_v23 = vsel %vm2272_vm4, %v9917_v45, %v5299_v28  ;;  %v5337_v18 = vpop.permute.xlu2 %5336  ;;  %v9918_v19 = vld [vmem:[#allocation132_spill] sm:$0xff] }
 0x385   : > { %v3148_v59 = vpop.f32.mrf.mxu1  ;;  %v3528_v49 = vadd.f32 1.0, %v5366_v3  ;;  %v2562_v22 = vsel %vm2305_vm5, %v2530_v23, %v5309_v38  ;;  %v2561_v17 = vsel %vm2305_vm5, %v2529_v36, %v5308_v21 }
 0x386   : > { %v3149_v58 = vadd.f32 %v3148_v59, %v3060_v60  ;;  %v3402_v42 = vmul.f32 %v3370_v37, %v8883_v43  ;;  %v2784_v59 = vsel %vm278_vm0, %v9918_v19, %v5274_v57 }
 0x387   : > { %v3560_v63 = vmul.f32 %v3528_v49, %v3304_v33  ;;  %v5338_v49 = vunpack.i.l.bf16 %v5337_v18 }
 0x388   : > { %v5317_v41 = vpop.permute.xlu1 %5316  ;;  %v8909_v39 = vadd.f32 %v3237_v61, %v3149_v58  ;;  %4043 = vmatmul.msk.bf16.gmra.mxu2 %vm2239_vm3, %v2827_v2  ;;  %v3434_v9 = vadd.f32 %v3402_v42, %v8883_v43  ;;  %v9919_v58 = vld [vmem:[#allocation131_spill] sm:$0xff] }
 0x389   : > { %v5312_v29 = vpop.permute.xlu0 %5311  ;;  %v5319_v14 = vunpack.i.h.bf16 %v5317_v41  ;;  %v5318_v52 = vunpack.i.l.bf16 %v5317_v41  ;;  %v2783_v37 = vsel %vm278_vm0, %v9919_v58, %v5273_v8  ;;  %v8953_v33 = vpop.f32.mrf.mxu0 }
 0x38a   : > { %v3339_v30 = vmul.f32 0.044715, %v8909_v39  ;;  %v5314_v44 = vunpack.i.h.bf16 %v5312_v29  ;;  %v5313_v16 = vunpack.i.l.bf16 %v5312_v29  ;;  %v5368_v5 = vpop.eup %5367  ;;  %v3466_v15 = vmul.f32 0.7978846, %v3434_v9 }
 0x38b   : > { %v3240_v55 = vpop.f32.mrf.mxu2  ;;  %v3529_v4 = vadd.f32 1.0, %v5368_v5  ;;  %v2830_v41 = vpack.c.bf16 %v2784_v59, %v2783_v37  ;;  %v3307_v37 = vmul.f32 0.5, %v8909_v39 }
 0x38c   : > { %v2593_v48 = vsel %vm2338_vm6, %v2561_v17, %v5313_v16  ;;  %v2594_v56 = vsel %vm2338_vm6, %v2562_v22, %v5314_v44  ;;  %v3371_v0 = vmul.f32 %v3339_v30, %v8909_v39  ;;  %5369 = vtanh.f32 %v3466_v15  ;;  %v5352_v30 = vpop.permute.xlu2 %5351  ;;  %v9921_v22 = vld [vmem:[#allocation103_spill] sm:$0xff] }
 0x38d   : > { %v2625_v10 = vsel %vm2371_vm7, %v2593_v48, %v5318_v52  ;;  %v2626_v32 = vsel %vm2371_vm7, %v2594_v56, %v5319_v14  ;;  %v3151_v12 = vpop.f32.mrf.mxu1  ;;  %v3561_v61 = vmul.f32 %v3529_v4, %v3305_v54  ;;  %v5339_v52 = vunpack.i.h.bf16 %v5337_v18 }
 0x38e   : > { %v3152_v47 = vadd.f32 %v3151_v12, %v3063_v13  ;;  %v8930_v2 = vsel %vm2404_vm8, %v2625_v10, %v5323_v53  ;;  %v8933_v25 = vsel %vm2404_vm8, %v2626_v32, %v5324_v27  ;;  %v3403_v13 = vmul.f32 %v3371_v0, %v8909_v39  ;;  %v9920_v27 = vld [vmem:[#allocation142_spill] sm:$0xff] }
 0x38f   : > { %v3590_v28 = vpack.c.bf16 %v3561_v61, %v3560_v63  ;;  %v2832_v38 = vpack.c.bf16 %v8933_v25, %v8930_v2  ;;  %v5304_v16 = vunpack.i.h.bf16 %v8875_v34  ;;  %v5353_v10 = vunpack.i.l.bf16 %v5352_v30 }
 0x390   : > { %v8927_v60 = vpop.permute.xlu1 %5331  ;;  %v8935_v31 = vadd.f32 %v3240_v55, %v3152_v47  ;;  %3190 = vmatmul.bf16.gmra.mxu1 %v2826_v6  ;;  %v3435_v6 = vadd.f32 %v3403_v13, %v8909_v39  ;;  %v5303_v55 = vunpack.i.l.bf16 %v8875_v34  ;;  %v5354_v18 = vunpack.i.h.bf16 %v5352_v30 }
 0x391   : > { %v5327_v3 = vpop.permute.xlu0 %5326  ;;  %v3306_v0 = vmul.f32 0.5, %v8883_v43 }
 0x392   : > { %v3340_v21 = vmul.f32 0.044715, %v8935_v31  ;;  %v5329_v57 = vunpack.i.h.bf16 %v5327_v3  ;;  %v5328_v35 = vunpack.i.l.bf16 %v5327_v3  ;;  %v3467_v23 = vmul.f32 0.7978846, %v3435_v6  ;;  %v5370_v44 = vpop.eup %5369 }
 0x393   : > { %v3242_v51 = vpop.f32.mrf.mxu2  ;;  %4057 = vmatmul.msk.bf16.gmra.mxu3 %vm2239_vm3, %v3590_v28  ;;  %v3530_v47 = vadd.f32 1.0, %v5370_v44 }
 0x394   : > { %v3372_v36 = vmul.f32 %v3340_v21, %v8935_v31  ;;  %5371 = vtanh.f32 %v3467_v23  ;;  %v2531_v5 = vsel %vm2272_vm4, %v9920_v27, %v5328_v35  ;;  %v2532_v17 = vsel %vm2272_vm4, %v9921_v22, %v5329_v57 }
 0x395   : > { %v3153_v45 = vpop.f32.mrf.mxu1  ;;  %v2563_v32 = vsel %vm2305_vm5, %v2531_v5, %v5338_v49  ;;  %v2564_v12 = vsel %vm2305_vm5, %v2532_v17, %v5339_v52  ;;  %v3562_v6 = vmul.f32 %v3530_v47, %v3306_v0 }
 0x396   : > { %v3154_v29 = vadd.f32 %v3153_v45, %v3065_v1  ;;  %v3404_v14 = vmul.f32 %v3372_v36, %v8935_v31  ;;  %v8987_v36 = vpop.f32.mrf.mxu0  ;;  %v9922_v45 = vld [vmem:[#allocation130_spill] sm:$0xff] }
 0x397   : > { %v2786_v23 = vsel %vm278_vm0, %v9922_v45, %v5304_v16 }
 0x398   : > { %v5347_v42 = vpop.permute.xlu1 %5346  ;;  %v3243_v53 = vadd.f32 %v3242_v51, %v3154_v29  ;;  %4044 = vmatmul.msk.bf16.gmra.mxu2 %vm2239_vm3, %v2830_v41  ;;  %v3436_v56 = vadd.f32 %v3404_v14, %v8935_v31  ;;  %v9923_v29 = vld [vmem:[#allocation129_spill] sm:$0xff] }
 0x399   : > { %v5342_v11 = vpop.permute.xlu0 %5341  ;;  %v5349_v9 = vunpack.i.h.bf16 %v5347_v42  ;;  %v5348_v48 = vunpack.i.l.bf16 %v5347_v42  ;;  %v2785_v14 = vsel %vm278_vm0, %v9923_v29, %v5303_v55 }
 0x39a   : > { %v3341_v54 = vmul.f32 0.044715, %v3243_v53  ;;  %v5344_v4 = vunpack.i.h.bf16 %v5342_v11  ;;  %v5343_v8 = vunpack.i.l.bf16 %v5342_v11  ;;  %v5372_v28 = vpop.eup %5371  ;;  %v3468_v3 = vmul.f32 0.7978846, %v3436_v56 }
 0x39b   : > { %v3245_v63 = vpop.f32.mrf.mxu2  ;;  %v3531_v21 = vadd.f32 1.0, %v5372_v28  ;;  %v9925_v28 = vld [vmem:[#allocation165_spill] sm:$0xff] }
 0x39c   : > { %v2595_v61 = vsel %vm2338_vm6, %v2563_v32, %v5343_v8  ;;  %v2596_v34 = vsel %vm2338_vm6, %v2564_v12, %v5344_v4  ;;  %v3373_v15 = vmul.f32 %v3341_v54, %v3243_v53  ;;  %5373 = vtanh.f32 %v3468_v3 }
 0x39d   : > { %v2627_v19 = vsel %vm2371_vm7, %v2595_v61, %v5348_v48  ;;  %v2628_v59 = vsel %vm2371_vm7, %v2596_v34, %v5349_v9  ;;  %v3156_v58 = vpop.f32.mrf.mxu1  ;;  %v3563_v57 = vmul.f32 %v3531_v21, %v3307_v37  ;;  %v3309_v48 = vmul.f32 0.5, %v3243_v53 }
 0x39e   : > { %v3157_v13 = vadd.f32 %v3156_v58, %v3068_v20  ;;  %v3405_v1 = vmul.f32 %v3373_v15, %v3243_v53  ;;  %v8975_v51 = vsel %vm2404_vm8, %v2627_v19, %v5353_v10  ;;  %v8978_v41 = vsel %vm2404_vm8, %v2628_v59, %v5354_v18  ;;  %v9001_v26 = vpop.f32.mrf.mxu0 }
 0x39f   : > { %v2835_v39 = vpack.c.bf16 %v8978_v41, %v8975_v51  ;;  %v3591_v52 = vpack.c.bf16 %v3563_v57, %v3562_v6  ;;  %v3073_v54 = vadd.f32 %v8683_v40, %v8893_v46  ;;  %v3308_v4 = vmul.f32 0.5, %v8935_v31  ;;  %v9924_v31 = vld [vmem:[#allocation166_spill] sm:$0xff] }
 0x3a0   : > { %v8980_v43 = vadd.f32 %v3245_v63, %v3157_v13  ;;  %3195 = vmatmul.bf16.gmra.mxu1 %v2829_v24  ;;  %v3437_v35 = vadd.f32 %v3405_v1, %v3243_v53  ;;  %v2833_v24 = vpack.c.bf16 %v2786_v23, %v2785_v14  ;;  %v5334_v10 = vunpack.i.h.bf16 %v8927_v60 }
 0x3a1   : > { %v5333_v32 = vunpack.i.l.bf16 %v8927_v60  ;;  %v3075_v37 = vadd.f32 %v8683_v40, %v8918_v7 }
 0x3a2   : > { %v3342_v20 = vmul.f32 0.044715, %v8980_v43  ;;  %v3469_v49 = vmul.f32 0.7978846, %v3437_v35  ;;  %v5374_v27 = vpop.eup %5373  ;;  %v2788_v15 = vsel %vm278_vm0, %v9924_v31, %v5334_v10 }
 0x3a3   : > { %v3247_v50 = vpop.f32.mrf.mxu2  ;;  %4058 = vmatmul.msk.bf16.gmra.mxu3 %vm2239_vm3, %v3591_v52  ;;  %v3532_v11 = vadd.f32 1.0, %v5374_v27  ;;  %v2787_v60 = vsel %vm278_vm0, %v9925_v28, %v5333_v32  ;;  %v3310_v52 = vmul.f32 0.5, %v8980_v43 }
 0x3a4   : > { %5375 = vtanh.f32 %v3469_v49  ;;  %v3374_v42 = vmul.f32 %v3342_v20, %v8980_v43  ;;  %v2836_v3 = vpack.c.bf16 %v2788_v15, %v2787_v60  ;;  %v3078_v20 = vadd.f32 %v8683_v40, %v8953_v33 }
 0x3a5   : > { %v3158_v30 = vpop.f32.mrf.mxu1  ;;  %v3564_v61 = vmul.f32 %v3532_v11, %v3308_v4 }
 0x3a6   : > { %v3159_v44 = vadd.f32 %v3158_v30, %v3070_v62  ;;  %v3406_v16 = vmul.f32 %v3374_v42, %v8980_v43  ;;  %v9022_v25 = vpop.f32.mrf.mxu0 }
 0x3a8   : > { %v3248_v5 = vadd.f32 %v3247_v50, %v3159_v44  ;;  %4045 = vmatmul.msk.bf16.gmra.mxu2 %vm2239_vm3, %v2833_v24  ;;  %v3438_v22 = vadd.f32 %v3406_v16, %v8980_v43  ;;  %v3080_v43 = vadd.f32 %v8683_v40, %v8987_v36  ;;  %v3083_v36 = vadd.f32 %v8683_v40, %v9001_v26 }
 0x3a9   : > { %v3085_v26 = vadd.f32 %v8683_v40, %v9022_v25 }
 0x3aa   : > { %v5376_v17 = vpop.eup %5375  ;;  %v3343_v55 = vmul.f32 0.044715, %v3248_v5  ;;  %v3470_v18 = vmul.f32 0.7978846, %v3438_v22  ;;  %v3311_v29 = vmul.f32 0.5, %v3248_v5 }
 0x3ab   : > { %v3250_v9 = vpop.f32.mrf.mxu2  ;;  %v3533_v56 = vadd.f32 1.0, %v5376_v17 }
 0x3ac   : > { %v3375_v8 = vmul.f32 %v3343_v55, %v3248_v5  ;;  %5377 = vtanh.f32 %v3470_v18 }
 0x3ad   : > { %v3161_v12 = vpop.f32.mrf.mxu1  ;;  %v3565_v63 = vmul.f32 %v3533_v56, %v3309_v48 }
 0x3ae   : > { %v3162_v47 = vadd.f32 %v3161_v12, %v3073_v54  ;;  %v3407_v34 = vmul.f32 %v3375_v8, %v3248_v5  ;;  %v3087_v16 = vpop.f32.mrf.mxu0 }
 0x3af   : > { %v3592_v46 = vpack.c.bf16 %v3565_v63, %v3564_v61 }
 0x3b0   : > { %v9008_v0 = vadd.f32 %v3250_v9, %v3162_v47  ;;  %3200 = vmatmul.bf16.gmra.mxu1 %v2832_v38  ;;  %v3439_v53 = vadd.f32 %v3407_v34, %v3248_v5 }
 0x3b2   : > { %v3344_v19 = vmul.f32 0.044715, %v9008_v0  ;;  %v3471_v59 = vmul.f32 0.7978846, %v3439_v53  ;;  %v5378_v1 = vpop.eup %5377  ;;  %v3312_v18 = vmul.f32 0.5, %v9008_v0 }
 0x3b3   : > { %v3252_v58 = vpop.f32.mrf.mxu2  ;;  %4059 = vmatmul.msk.bf16.gmra.mxu3 %vm2239_vm3, %v3592_v46  ;;  %v3534_v45 = vadd.f32 1.0, %v5378_v1 }
 0x3b4   : > { %5379 = vtanh.f32 %v3471_v59  ;;  %v3376_v2 = vmul.f32 %v3344_v19, %v9008_v0 }
 0x3b5   : > { %v3163_v38 = vpop.f32.mrf.mxu1  ;;  %v3566_v30 = vmul.f32 %v3534_v45, %v3310_v52 }
 0x3b6   : > { %v3164_v13 = vadd.f32 %v3163_v38, %v3075_v37  ;;  %v3408_v21 = vmul.f32 %v3376_v2, %v9008_v0  ;;  %v3089_v51 = vpop.f32.mrf.mxu0 }
 0x3b8   : > { %v3253_v6 = vadd.f32 %v3252_v58, %v3164_v13  ;;  %4046 = vmatmul.msk.bf16.gmra.mxu2 %vm2239_vm3, %v2836_v3  ;;  %v3440_v57 = vadd.f32 %v3408_v21, %v9008_v0 }
 0x3ba   : > { %v5380_v35 = vpop.eup %5379  ;;  %v3345_v7 = vmul.f32 0.044715, %v3253_v6  ;;  %v3472_v24 = vmul.f32 0.7978846, %v3440_v57  ;;  %v3313_v12 = vmul.f32 0.5, %v3253_v6 }
 0x3bb   : > { %v3255_v23 = vpop.f32.mrf.mxu2  ;;  %v3535_v14 = vadd.f32 1.0, %v5380_v35 }
 0x3bc   : > { %v3377_v49 = vmul.f32 %v3345_v7, %v3253_v6  ;;  %5381 = vtanh.f32 %v3472_v24 }
 0x3bd   : > { %v3166_v50 = vpop.f32.mrf.mxu1  ;;  %v3567_v62 = vmul.f32 %v3535_v14, %v3311_v29  ;;  %v3088_v14 = vadd.f32 %v8683_v40, %v3087_v16  ;;  %v3090_v16 = vadd.f32 %v8683_v40, %v3089_v51  ;;  %v9054_v51 = vld [vmem:[%s9218_s2] ss:$0 sm:$0xff] }
 0x3be   : > { %v3167_v42 = vadd.f32 %v3166_v50, %v3078_v20  ;;  %v3409_v44 = vmul.f32 %v3377_v49, %v3253_v6  ;;  %v3092_v37 = vpop.f32.mrf.mxu0 }
 0x3bf   : > { %v3593_v5 = vpack.c.bf16 %v3567_v62, %v3566_v30 }
 0x3c0   : > { %v3256_v27 = vadd.f32 %v3255_v23, %v3167_v42  ;;  %3205 = vmatmul.bf16.gmra.mxu1 %v2835_v39  ;;  %v3441_v22 = vadd.f32 %v3409_v44, %v3253_v6 }
 0x3c2   : > { %v3346_v17 = vmul.f32 0.044715, %v3256_v27  ;;  %v3473_v33 = vmul.f32 0.7978846, %v3441_v22  ;;  %v5382_v54 = vpop.eup %5381  ;;  %v3314_v20 = vmul.f32 0.5, %v3256_v27 }
 0x3c3   : > { %v3257_v55 = vpop.f32.mrf.mxu2  ;;  %4060 = vmatmul.msk.bf16.gmra.mxu3 %vm2239_vm3, %v3593_v5  ;;  %v3536_v10 = vadd.f32 1.0, %v5382_v54 }
 0x3c4   : > { %5383 = vtanh.f32 %v3473_v33  ;;  %v3378_v11 = vmul.f32 %v3346_v17, %v3256_v27 }
 0x3c5   : > { %v3168_v9 = vpop.f32.mrf.mxu1  ;;  %v3568_v31 = vmul.f32 %v3536_v10, %v3312_v18 }
 0x3c6   : > { %v3169_v48 = vadd.f32 %v3168_v9, %v3080_v43  ;;  %v3410_v56 = vmul.f32 %v3378_v11, %v3256_v27  ;;  %v3094_v52 = vpop.f32.mrf.mxu0 }
 0x3c8   : > { %v3258_v4 = vadd.f32 %v3257_v55, %v3169_v48  ;;  %v3442_v41 = vadd.f32 %v3410_v56, %v3256_v27 }
 0x3ca   : > { %v5384_v39 = vpop.eup %5383  ;;  %v3347_v8 = vmul.f32 0.044715, %v3258_v4  ;;  %v3474_v46 = vmul.f32 0.7978846, %v3442_v41  ;;  %v3315_v23 = vmul.f32 0.5, %v3258_v4 }
 0x3cb   : > { %v3260_v32 = vpop.f32.mrf.mxu2  ;;  %v3537_v63 = vadd.f32 1.0, %v5384_v39 }
 0x3cc   : > { %v3379_v47 = vmul.f32 %v3347_v8, %v3258_v4  ;;  %5385 = vtanh.f32 %v3474_v46 }
 0x3cd   : > { %v3171_v61 = vpop.f32.mrf.mxu1  ;;  %v3569_v34 = vmul.f32 %v3537_v63, %v3313_v12  ;;  %v3093_v12 = vadd.f32 %v9054_v51, %v3092_v37 }
 0x3ce   : > { %v3172_v53 = vadd.f32 %v3171_v61, %v3083_v36  ;;  %v3411_v15 = vmul.f32 %v3379_v47, %v3258_v4  ;;  %v3097_v56 = vpop.f32.mrf.mxu0 }
 0x3cf   : > { %v3594_v60 = vpack.c.bf16 %v3569_v34, %v3568_v31 }
 0x3d0   : > { %v3261_v28 = vadd.f32 %v3260_v32, %v3172_v53  ;;  %v3443_v19 = vadd.f32 %v3411_v15, %v3258_v4 }
 0x3d2   : > { %v3348_v59 = vmul.f32 0.044715, %v3261_v28  ;;  %v3475_v58 = vmul.f32 0.7978846, %v3443_v19  ;;  %v5386_v21 = vpop.eup %5385  ;;  %v3316_v63 = vmul.f32 0.5, %v3261_v28 }
 0x3d3   : > { %v3262_v3 = vpop.f32.mrf.mxu2  ;;  %4061 = vmatmul.msk.bf16.gmra.mxu3 %vm2239_vm3, %v3594_v60  ;;  %v3538_v7 = vadd.f32 1.0, %v5386_v21 }
 0x3d4   : > { %5387 = vtanh.f32 %v3475_v58  ;;  %v3380_v0 = vmul.f32 %v3348_v59, %v3261_v28  ;;  %v9063_v58 = vld [vmem:[%s9220_s4] ss:$0 sm:$0xff] }
 0x3d5   : > { %v3173_v2 = vpop.f32.mrf.mxu1  ;;  %v3570_v42 = vmul.f32 %v3538_v7, %v3314_v20 }
 0x3d6   : > { %v3174_v38 = vadd.f32 %v3173_v2, %v3085_v26  ;;  %v3412_v13 = vmul.f32 %v3380_v0, %v3261_v28  ;;  %v3099_v19 = vpop.f32.mrf.mxu0 }
 0x3d8   : > { %v3263_v1 = vadd.f32 %v3262_v3, %v3174_v38  ;;  %v3444_v6 = vadd.f32 %v3412_v13, %v3261_v28  ;;  %v3095_v3 = vadd.f32 %v9054_v51, %v3094_v52 }
 0x3da   : > { %v5388_v57 = vpop.eup %5387  ;;  %v3349_v35 = vmul.f32 0.044715, %v3263_v1  ;;  %v3476_v62 = vmul.f32 0.7978846, %v3444_v6  ;;  %v3317_v32 = vmul.f32 0.5, %v3263_v1  ;;  %v9926_v6 = vld [vmem:[#allocation10_spill] sm:$0xff] }
 0x3db   : > { %v3265_v45 = vpop.f32.mrf.mxu2  ;;  %v3539_v29 = vadd.f32 1.0, %v5388_v57 }
 0x3dc   : > { %v3381_v25 = vmul.f32 %v3349_v35, %v3263_v1  ;;  %5389 = vtanh.f32 %v3476_v62 }
 0x3dd   : > { %v3176_v49 = vpop.f32.mrf.mxu1  ;;  %v3571_v50 = vmul.f32 %v3539_v29, %v3315_v23 }
 0x3de   : > { %v3177_v24 = vadd.f32 %v3176_v49, %v3088_v14  ;;  %v3413_v30 = vmul.f32 %v3381_v25, %v3263_v1  ;;  %v3102_v14 = vpop.f32.mrf.mxu0  ;;  %v3098_v49 = vadd.f32 %v9054_v51, %v3097_v56 }
 0x3df   : > { %v3595_v5 = vpack.c.bf16 %v3571_v50, %v3570_v42 }
 0x3e0   : > { %v9043_v44 = vadd.f32 %v3265_v45, %v3177_v24  ;;  %v3445_v22 = vadd.f32 %v3413_v30, %v3263_v1 }
 0x3e2   : > { %v3350_v17 = vmul.f32 0.044715, %v9043_v44  ;;  %v3477_v33 = vmul.f32 0.7978846, %v3445_v22  ;;  %v5390_v48 = vpop.eup %5389  ;;  %v3318_v50 = vmul.f32 0.5, %v9043_v44 }
 0x3e3   : > { %v3267_v55 = vpop.f32.mrf.mxu2  ;;  %4062 = vmatmul.msk.bf16.gmra.mxu3 %vm2239_vm3, %v3595_v5  ;;  %v3540_v8 = vadd.f32 1.0, %v5390_v48 }
 0x3e4   : > { %5391 = vtanh.f32 %v3477_v33  ;;  %v3382_v27 = vmul.f32 %v3350_v17, %v9043_v44 }
 0x3e5   : > { %v3178_v43 = vpop.f32.mrf.mxu1  ;;  %v3572_v46 = vmul.f32 %v3540_v8, %v3316_v63 }
 0x3e6   : > { %v3179_v11 = vadd.f32 %v3178_v43, %v3090_v16  ;;  %v3414_v9 = vmul.f32 %v3382_v27, %v9043_v44  ;;  %v9927_v16 = vld [vmem:[#allocation11_spill] sm:$0xff] }
 0x3e8   : > { %v3268_v54 = vadd.f32 %v3267_v55, %v3179_v11  ;;  %v3446_v4 = vadd.f32 %v3414_v9, %v9043_v44 }
 0x3ea   : > { %v5392_v41 = vpop.eup %5391  ;;  %v3351_v39 = vmul.f32 0.044715, %v3268_v54  ;;  %v3478_v61 = vmul.f32 0.7978846, %v3446_v4  ;;  %v3319_v25 = vmul.f32 0.5, %v3268_v54 }
 0x3eb   : > { %v3270_v10 = vpop.f32.mrf.mxu2  ;;  %v3541_v40 = vadd.f32 1.0, %v5392_v41  ;;  %v3104_v41 = vpop.f32.mrf.mxu0 }
 0x3ec   : > { %v3383_v36 = vmul.f32 %v3351_v39, %v3268_v54  ;;  %5393 = vtanh.f32 %v3478_v61 }
 0x3ed   : > { %v3181_v18 = vpop.f32.mrf.mxu1  ;;  %v3573_v47 = vmul.f32 %v3541_v40, %v3317_v32 }
 0x3ee   : > { %v3182_v34 = vadd.f32 %v3181_v18, %v3093_v12  ;;  %v3415_v53 = vmul.f32 %v3383_v36, %v3268_v54 }
 0x3ef   : > { %v3596_v15 = vpack.c.bf16 %v3573_v47, %v3572_v46  ;;  %v9928_v47 = vld [vmem:[#allocation12_spill] sm:$0xff] }
 0x3f0   : > { %v9057_v31 = vadd.f32 %v3270_v10, %v3182_v34  ;;  %v3447_v60 = vadd.f32 %v3415_v53, %v3268_v54  ;;  %v3100_v54 = vadd.f32 %v9054_v51, %v3099_v19  ;;  %v3103_v19 = vadd.f32 %v9054_v51, %v3102_v14 }
 0x3f1   : > { %v3105_v14 = vadd.f32 %v9054_v51, %v3104_v41 }
 0x3f2   : > { %v3352_v59 = vmul.f32 0.044715, %v9057_v31  ;;  %v3479_v28 = vmul.f32 0.7978846, %v3447_v60  ;;  %v5394_v1 = vpop.eup %5393 }
 0x3f3   : > { %v3272_v37 = vpop.f32.mrf.mxu2  ;;  %4063 = vmatmul.msk.bf16.gmra.mxu3 %vm2239_vm3, %v3596_v15  ;;  %v3542_v29 = vadd.f32 1.0, %v5394_v1 }
 0x3f4   : > { %5395 = vtanh.f32 %v3479_v28  ;;  %v3384_v26 = vmul.f32 %v3352_v59, %v9057_v31  ;;  %v3681_v0 = vpop.f32.mrf.mxu3  ;;  %v3320_v59 = vmul.f32 0.5, %v9057_v31 }
 0x3f5   : > { %v3183_v2 = vpop.f32.mrf.mxu1  ;;  %v3682_v38 = vadd.f32 %v9063_v58, %v3681_v0  ;;  %v3574_v33 = vmul.f32 %v3542_v29, %v3318_v50 }
 0x3f6   : > { %v3184_v13 = vadd.f32 %v3183_v2, %v3095_v3  ;;  %v3416_v21 = vmul.f32 %v3384_v26, %v9057_v31 }
 0x3f7   : > { %v3761_v57 = vadd.f32 %v3682_v38, %v9926_v6 }
 0x3f8   : > { %v3273_v35 = vadd.f32 %v3272_v37, %v3184_v13  ;;  %v3448_v7 = vadd.f32 %v3416_v21, %v9057_v31  ;;  %v3107_v13 = vpop.f32.mrf.mxu0 }
 0x3f9   : > { %3793 = vxpose.xlu0.b32.start [1/16] (narrow) %v3761_v57, 16 }
 0x3fa   : > { %v5396_v45 = vpop.eup %5395  ;;  %v3353_v23 = vmul.f32 0.044715, %v3273_v35  ;;  %v3480_v5 = vmul.f32 0.7978846, %v3448_v7  ;;  %v3321_v15 = vmul.f32 0.5, %v3273_v35  ;;  %v9929_v7 = vld [vmem:[#allocation13_spill] sm:$0xff] }
 0x3fb   : > { %v3275_v20 = vpop.f32.mrf.mxu2  ;;  %v3543_v52 = vadd.f32 1.0, %v5396_v45 }
 0x3fc   : > { %v3385_v62 = vmul.f32 %v3353_v23, %v3273_v35  ;;  %v3683_v24 = vpop.f32.mrf.mxu3  ;;  %5397 = vtanh.f32 %v3480_v5 }
 0x3fd   : > { %v3186_v42 = vpop.f32.mrf.mxu1  ;;  %v3575_v30 = vmul.f32 %v3543_v52, %v3319_v25  ;;  %v3684_v22 = vadd.f32 %v9063_v58, %v3683_v24 }
 0x3fe   : > { %v3187_v17 = vadd.f32 %v3186_v42, %v3098_v49  ;;  %v3417_v55 = vmul.f32 %v3385_v62, %v3273_v35 }
 0x3ff   : > { %v3762_v27 = vadd.f32 %v3684_v22, %v9927_v16  ;;  %v3597_v11 = vpack.c.bf16 %v3575_v30, %v3574_v33 }
 0x400   : > { %v9076_v43 = vadd.f32 %v3275_v20, %v3187_v17  ;;  %v3449_v9 = vadd.f32 %v3417_v55, %v3273_v35  ;;  %v3109_v30 = vpop.f32.mrf.mxu0  ;;  %v9930_v17 = vld [vmem:[#allocation16_spill] sm:$0xff] }
 0x401   : > { %3794 = vxpose.xlu0.b32.cont [2/16] (narrow) %v3762_v27, 16 }
 0x402   : > { %v3354_v48 = vmul.f32 0.044715, %v9076_v43  ;;  %v3481_v44 = vmul.f32 0.7978846, %v3449_v9  ;;  %v5398_v32 = vpop.eup %5397 }
 0x403   : > { %v3277_v56 = vpop.f32.mrf.mxu2  ;;  %4064 = vmatmul.msk.bf16.gmra.mxu3 %vm2239_vm3, %v3597_v11  ;;  %v3544_v46 = vadd.f32 1.0, %v5398_v32 }
 0x404   : > { %5399 = vtanh.f32 %v3481_v44  ;;  %v3386_v4 = vmul.f32 %v3354_v48, %v9076_v43  ;;  %v3108_v48 = vadd.f32 %v9054_v51, %v3107_v13 }
 0x405   : > { %v3188_v39 = vpop.f32.mrf.mxu1  ;;  %v3576_v2 = vmul.f32 %v3544_v46, %v3320_v59 }
 0x406   : > { %v3189_v8 = vadd.f32 %v3188_v39, %v3100_v54  ;;  %v3418_v10 = vmul.f32 %v3386_v4, %v9076_v43  ;;  %v3686_v40 = vpop.f32.mrf.mxu3 }
 0x407   : > { %v3687_v12 = vadd.f32 %v9063_v58, %v3686_v40 }
 0x408   : > { %v3278_v63 = vadd.f32 %v3277_v56, %v3189_v8  ;;  %v3450_v36 = vadd.f32 %v3418_v10, %v9076_v43  ;;  %v3322_v56 = vmul.f32 0.5, %v9076_v43  ;;  %v3112_v43 = vpop.f32.mrf.mxu0 }
 0x409   : > { %v3763_v61 = vadd.f32 %v3687_v12, %v9928_v47 }
 0x40a   : > { %v5400_v18 = vpop.eup %5399  ;;  %v3355_v34 = vmul.f32 0.044715, %v3278_v63  ;;  %v3482_v26 = vmul.f32 0.7978846, %v3450_v36  ;;  %v3323_v11 = vmul.f32 0.5, %v3278_v63 }
 0x40b   : > { %v3280_v53 = vpop.f32.mrf.mxu2  ;;  %v3545_v60 = vadd.f32 1.0, %v5400_v18  ;;  %3795 = vxpose.xlu0.b32.cont [3/16] (narrow) %v3763_v61, 16  ;;  %v9931_v18 = vld [vmem:[#allocation17_spill] sm:$0xff] }
 0x40c   : > { %v3387_v28 = vmul.f32 %v3355_v34, %v3278_v63  ;;  %5401 = vtanh.f32 %v3482_v26 }
 0x40d   : > { %v3191_v37 = vpop.f32.mrf.mxu1  ;;  %v3577_v3 = vmul.f32 %v3545_v60, %v3321_v15 }
 0x40e   : > { %v3192_v0 = vadd.f32 %v3191_v37, %v3103_v19  ;;  %v3419_v38 = vmul.f32 %v3387_v28, %v3278_v63  ;;  %v3688_v21 = vpop.f32.mrf.mxu3 }
 0x40f   : > { %v3689_v1 = vadd.f32 %v9063_v58, %v3688_v21  ;;  %v3598_v57 = vpack.c.bf16 %v3577_v3, %v3576_v2 }
 0x410   : > { %v9089_v6 = vadd.f32 %v3280_v53, %v3192_v0  ;;  %v3451_v35 = vadd.f32 %v3419_v38, %v3278_v63  ;;  %v3110_v53 = vadd.f32 %v9054_v51, %v3109_v30  ;;  %v9932_v38 = vld [vmem:[#allocation14_spill] sm:$0xff] }
 0x411   : > { %v3764_v45 = vadd.f32 %v3689_v1, %v9929_v7 }
 0x412   : > { %v3356_v31 = vmul.f32 0.044715, %v9089_v6  ;;  %v3483_v23 = vmul.f32 0.7978846, %v3451_v35  ;;  %v5402_v50 = vpop.eup %5401 }
 0x413   : > { %v3282_v29 = vpop.f32.mrf.mxu2  ;;  %3796 = vxpose.xlu0.b32.cont [4/16] (narrow) %v3764_v45, 16  ;;  %4065 = vmatmul.msk.bf16.gmra.mxu3 %vm2239_vm3, %v3598_v57  ;;  %v3546_v16 = vadd.f32 1.0, %v5402_v50  ;;  %v3113_v45 = vadd.f32 %v9054_v51, %v3112_v43 }
 0x414   : > { %v3388_v20 = vmul.f32 %v3356_v31, %v9089_v6  ;;  %5403 = vtanh.f32 %v3483_v23  ;;  %v3324_v23 = vmul.f32 0.5, %v9089_v6 }
 0x415   : > { %v3193_v25 = vpop.f32.mrf.mxu1  ;;  %v3578_v10 = vmul.f32 %v3546_v16, %v3322_v56 }
 0x416   : > { %v3420_v52 = vmul.f32 %v3388_v20, %v9089_v6  ;;  %v3194_v49 = vadd.f32 %v3193_v25, %v3105_v14  ;;  %v3691_v62 = vpop.f32.mrf.mxu3 }
 0x417   : > { %v3692_v24 = vadd.f32 %v9063_v58, %v3691_v62 }
 0x418   : > { %v3283_v42 = vadd.f32 %v3282_v29, %v3194_v49  ;;  %v3452_v5 = vadd.f32 %v3420_v52, %v9089_v6  ;;  %v3114_v29 = vpop.f32.mrf.mxu0 }
 0x419   : > { %v3765_v33 = vadd.f32 %v3692_v24, %v9930_v17  ;;  %v3115_v16 = vadd.f32 %v9054_v51, %v3114_v29 }
 0x41a   : > { %v5404_v22 = vpop.eup %5403  ;;  %v3357_v55 = vmul.f32 0.044715, %v3283_v42  ;;  %v3484_v41 = vmul.f32 0.7978846, %v3452_v5  ;;  %v3325_v35 = vmul.f32 0.5, %v3283_v42 }
 0x41b   : > { %v3285_v27 = vpop.f32.mrf.mxu2  ;;  %v3547_v9 = vadd.f32 1.0, %v5404_v22  ;;  %3797 = vxpose.xlu0.b32.cont [5/16] (narrow) %v3765_v33, 16  ;;  %v9933_v22 = vld [vmem:[#allocation15_spill] sm:$0xff] }
 0x41c   : > { %v3389_v44 = vmul.f32 %v3357_v55, %v3283_v42  ;;  %5405 = vtanh.f32 %v3484_v41 }
 0x41d   : > { %v3196_v54 = vpop.f32.mrf.mxu1  ;;  %v3579_v4 = vmul.f32 %v3547_v9, %v3323_v11 }
 0x41e   : > { %v3421_v39 = vmul.f32 %v3389_v44, %v3283_v42  ;;  %v3197_v8 = vadd.f32 %v3196_v54, %v3108_v48  ;;  %v3693_v32 = vpop.f32.mrf.mxu3 }
 0x41f   : > { %v3694_v40 = vadd.f32 %v9063_v58, %v3693_v32  ;;  %v3599_v36 = vpack.c.bf16 %v3579_v4, %v3578_v10  ;;  %v9934_v10 = vld [vmem:[#allocation18_spill] sm:$0xff] }
 0x420   : > { %v9103_v12 = vadd.f32 %v3285_v27, %v3197_v8  ;;  %v3453_v63 = vadd.f32 %v3421_v39, %v3283_v42  ;;  %v3117_v56 = vpop.f32.mrf.mxu0 }
 0x421   : > { %v3766_v47 = vadd.f32 %v3694_v40, %v9931_v18 }
 0x422   : > { %v3358_v61 = vmul.f32 0.044715, %v9103_v12  ;;  %v3485_v34 = vmul.f32 0.7978846, %v3453_v63  ;;  %v5406_v28 = vpop.eup %5405 }
 0x423   : > { %v3287_v46 = vpop.f32.mrf.mxu2  ;;  %3798 = vxpose.xlu0.b32.cont [6/16] (narrow) %v3766_v47, 16  ;;  %4066 = vmatmul.msk.bf16.gmra.mxu3 %vm2239_vm3, %v3599_v36  ;;  %v3548_v1 = vadd.f32 1.0, %v5406_v28  ;;  %v3118_v47 = vadd.f32 %v9054_v51, %v3117_v56 }
 0x424   : > { %v3390_v15 = vmul.f32 %v3358_v61, %v9103_v12  ;;  %5407 = vtanh.f32 %v3485_v34  ;;  %v3326_v34 = vmul.f32 0.5, %v9103_v12 }
 0x425   : > { %v3198_v60 = vpop.f32.mrf.mxu1  ;;  %v3580_v50 = vmul.f32 %v3548_v1, %v3324_v23 }
 0x426   : > { %v3422_v19 = vmul.f32 %v3390_v15, %v9103_v12  ;;  %v3199_v59 = vadd.f32 %v3198_v60, %v3110_v53  ;;  %v3696_v37 = vpop.f32.mrf.mxu3 }
 0x427   : > { %v3697_v3 = vadd.f32 %v9063_v58, %v3696_v37 }
 0x428   : > { %v3288_v26 = vadd.f32 %v3287_v46, %v3199_v59  ;;  %v3454_v0 = vadd.f32 %v3422_v19, %v9103_v12 }
 0x429   : > { %v3767_v13 = vadd.f32 %v3697_v3, %v9932_v38  ;;  %v9935_v38 = vld [vmem:[#allocation19_spill] sm:$0xff] }
 0x42a   : > { %v5408_v2 = vpop.eup %5407  ;;  %v3359_v21 = vmul.f32 0.044715, %v3288_v26  ;;  %v3486_v25 = vmul.f32 0.7978846, %v3454_v0  ;;  %v3327_v63 = vmul.f32 0.5, %v3288_v26 }
 0x42b   : > { %v3290_v57 = vpop.f32.mrf.mxu2  ;;  %v3549_v7 = vadd.f32 1.0, %v5408_v2  ;;  %3799 = vxpose.xlu0.b32.cont [7/16] (narrow) %v3767_v13, 16  ;;  %v3119_v2 = vpop.f32.mrf.mxu0 }
 0x42c   : > { %v3391_v31 = vmul.f32 %v3359_v21, %v3288_v26  ;;  %5409 = vtanh.f32 %v3486_v25  ;;  %v3120_v12 = vadd.f32 %v9054_v51, %v3119_v2  ;;  %v9942_v2 = vld [vmem:[#allocation34_spill] sm:$0xff] }
 0x42d   : > { %v3201_v14 = vpop.f32.mrf.mxu1  ;;  %v3581_v20 = vmul.f32 %v3549_v7, %v3325_v35 }
 0x42e   : > { %v3423_v52 = vmul.f32 %v3391_v31, %v3288_v26  ;;  %v3202_v49 = vadd.f32 %v3201_v14, %v3113_v45  ;;  %v3698_v62 = vpop.f32.mrf.mxu3 }
 0x42f   : > { %v3699_v24 = vadd.f32 %v9063_v58, %v3698_v62  ;;  %v3600_v42 = vpack.c.bf16 %v3581_v20, %v3580_v50 }
 0x430   : > { %v9117_v30 = vadd.f32 %v3290_v57, %v3202_v49  ;;  %v3455_v5 = vadd.f32 %v3423_v52, %v3288_v26  ;;  %v9936_v49 = vld [vmem:[#allocation22_spill] sm:$0xff] }
 0x431   : > { %v3768_v17 = vadd.f32 %v3699_v24, %v9933_v22 }
 0x432   : > { %v3360_v33 = vmul.f32 0.044715, %v9117_v30  ;;  %v3487_v6 = vmul.f32 0.7978846, %v3455_v5  ;;  %v5410_v44 = vpop.eup %5409  ;;  %v3328_v22 = vmul.f32 0.5, %v9117_v30 }
 0x433   : > { %v3292_v55 = vpop.f32.mrf.mxu2  ;;  %3800 = vxpose.xlu0.b32.cont [8/16] (narrow) %v3768_v17, 16  ;;  %4067 = vmatmul.msk.bf16.gmra.mxu3 %vm2239_vm3, %v3600_v42  ;;  %v3550_v36 = vadd.f32 1.0, %v5410_v44 }
 0x434   : > { %v3392_v27 = vmul.f32 %v3360_v33, %v9117_v30  ;;  %5411 = vtanh.f32 %v3487_v6 }
 0x435   : > { %v3203_v11 = vpop.f32.mrf.mxu1  ;;  %v3582_v59 = vmul.f32 %v3550_v36, %v3326_v34 }
 0x436   : > { %v3424_v9 = vmul.f32 %v3392_v27, %v9117_v30  ;;  %v3204_v48 = vadd.f32 %v3203_v11, %v3115_v16  ;;  %v3701_v54 = vpop.f32.mrf.mxu3 }
 0x437   : > { %v3702_v4 = vadd.f32 %v9063_v58, %v3701_v54 }
 0x438   : > { %v3293_v41 = vadd.f32 %v3292_v55, %v3204_v48  ;;  %v3456_v39 = vadd.f32 %v3424_v9, %v9117_v30  ;;  %v9937_v48 = vld [vmem:[#allocation23_spill] sm:$0xff] }
 0x439   : > { %v3769_v32 = vadd.f32 %v3702_v4, %v9934_v10 }
 0x43a   : > { %v5412_v8 = vpop.eup %5411  ;;  %v3361_v40 = vmul.f32 0.044715, %v3293_v41  ;;  %v3488_v15 = vmul.f32 0.7978846, %v3456_v39  ;;  %v3329_v24 = vmul.f32 0.5, %v3293_v41  ;;  %v9938_v39 = vld [vmem:[#allocation20_spill] sm:$0xff] }
 0x43b   : > { %v3551_v18 = vadd.f32 1.0, %v5412_v8  ;;  %3801 = vxpose.xlu0.b32.cont [9/16] (narrow) %v3769_v32, 16  ;;  %v3295_v43 = vpop.f32.mrf.mxu2 }
 0x43c   : > { %v3393_v61 = vmul.f32 %v3361_v40, %v3293_v41  ;;  %5413 = vtanh.f32 %v3488_v15 }
 0x43d   : > { %v3206_v46 = vpop.f32.mrf.mxu1  ;;  %v3583_v53 = vmul.f32 %v3551_v18, %v3327_v63 }
 0x43e   : > { %v3425_v60 = vmul.f32 %v3393_v61, %v3293_v41  ;;  %v3207_v19 = vadd.f32 %v3206_v46, %v3118_v47  ;;  %v3703_v28 = vpop.f32.mrf.mxu3 }
 0x43f   : > { %v3704_v37 = vadd.f32 %v9063_v58, %v3703_v28  ;;  %v3601_v0 = vpack.c.bf16 %v3583_v53, %v3582_v59 }
 0x440   : > { %v3296_v3 = vadd.f32 %v3295_v43, %v3207_v19  ;;  %v3457_v26 = vadd.f32 %v3425_v60, %v3293_v41  ;;  %v9939_v43 = vld [vmem:[#allocation21_spill] sm:$0xff]  ;;  %v9940_v60 = vld [vmem:[#allocation24_spill] sm:$0xff] }
 0x441   : > { %v3770_v13 = vadd.f32 %v3704_v37, %v9935_v38  ;;  %v9941_v37 = vld [vmem:[#allocation26_spill] sm:$0xff] }
 0x442   : > { %v3362_v21 = vmul.f32 0.044715, %v3296_v3  ;;  %v3489_v1 = vmul.f32 0.7978846, %v3457_v26  ;;  %v5414_v31 = vpop.eup %5413  ;;  %v3330_v36 = vmul.f32 0.5, %v3296_v3 }
 0x443   : > { %4068 = vmatmul.msk.bf16.gmra.mxu3 %vm2239_vm3, %v3601_v0  ;;  %3802 = vxpose.xlu0.b32.cont [10/16] (narrow) %v3770_v13, 16  ;;  %v3297_v23 = vpop.f32.mrf.mxu2  ;;  %v3552_v51 = vadd.f32 1.0, %v5414_v31 }
 0x444   : > { %v3394_v57 = vmul.f32 %v3362_v21, %v3296_v3  ;;  %5415 = vtanh.f32 %v3489_v1  ;;  %v9943_v1 = vld [vmem:[#allocation38_spill] sm:$0xff] }
 0x445   : > { %v3208_v35 = vpop.f32.mrf.mxu1  ;;  %v3584_v55 = vmul.f32 %v3552_v51, %v3328_v22  ;;  %v9947_v51 = vld [vmem:[#allocation44_spill] sm:$0xff]  ;;  %v9948_v22 = vld [vmem:[#allocation49_spill] sm:$0xff] }
 0x446   : > { %v3426_v7 = vmul.f32 %v3394_v57, %v3296_v3  ;;  %v3209_v45 = vadd.f32 %v3208_v35, %v3120_v12  ;;  %v3706_v29 = vpop.f32.mrf.mxu3 }
 0x447   : > { %v3707_v14 = vadd.f32 %v9063_v58, %v3706_v29  ;;  %v9945_v29 = vld [vmem:[#allocation30_spill] sm:$0xff] }
 0x448   : > { %v3298_v20 = vadd.f32 %v3297_v23, %v3209_v45  ;;  %v3458_v25 = vadd.f32 %v3426_v7, %v3296_v3  ;;  %v9944_v7 = vld [vmem:[#allocation27_spill] sm:$0xff] }
 0x449   : > { %v3771_v50 = vadd.f32 %v3707_v14, %v9936_v49 }
 0x44a   : > { %v5416_v52 = vpop.eup %5415  ;;  %v3363_v62 = vmul.f32 0.044715, %v3298_v20  ;;  %v3490_v33 = vmul.f32 0.7978846, %v3458_v25  ;;  %v3331_v32 = vmul.f32 0.5, %v3298_v20 }
 0x44b   : > { %v3553_v42 = vadd.f32 1.0, %v5416_v52  ;;  %3803 = vxpose.xlu0.b32.cont [11/16] (narrow) %v3771_v50, 16  ;;  %v9946_v52 = vld [vmem:[#allocation43_spill] sm:$0xff] }
 0x44c   : > { %v3395_v5 = vmul.f32 %v3363_v62, %v3298_v20  ;;  %5417 = vtanh.f32 %v3490_v33 }
 0x44d   : > { %v3585_v17 = vmul.f32 %v3553_v42, %v3329_v24 }
 0x44e   : > { %v3427_v6 = vmul.f32 %v3395_v5, %v3298_v20  ;;  %v3708_v16 = vpop.f32.mrf.mxu3 }
 0x44f   : > { %v3709_v27 = vadd.f32 %v9063_v58, %v3708_v16  ;;  %v3602_v11 = vpack.c.bf16 %v3585_v17, %v3584_v55  ;;  %v9949_v55 = vld [vmem:[#allocation52_spill] sm:$0xff] }
 0x450   : > { %v3459_v9 = vadd.f32 %v3427_v6, %v3298_v20 }
 0x451   : > { %v3772_v44 = vadd.f32 %v3709_v27, %v9937_v48 }
 0x452   : > { %v3491_v56 = vmul.f32 0.7978846, %v3459_v9  ;;  %v5418_v54 = vpop.eup %5417  ;;  %v9950_v9 = vld [vmem:[#allocation92_spill] sm:$0xff] }
 0x453   : > { %4069 = vmatmul.msk.bf16.gmra.mxu3 %vm2239_vm3, %v3602_v11  ;;  %3804 = vxpose.xlu0.b32.cont [12/16] (narrow) %v3772_v44, 16  ;;  %v3554_v10 = vadd.f32 1.0, %v5418_v54  ;;  %v9951_v54 = vld [vmem:[#allocation93_spill] sm:$0xff] }
 0x454   : > { %5419 = vtanh.f32 %v3491_v56 }
 0x455   : > { %v3586_v18 = vmul.f32 %v3554_v10, %v3330_v36 }
 0x456   : > { %v3711_v4 = vpop.f32.mrf.mxu3 }
 0x457   : > { %v3712_v30 = vadd.f32 %v9063_v58, %v3711_v4 }
 0x459   : > { %v3773_v8 = vadd.f32 %v3712_v30, %v9938_v39  ;;  %v9952_v39 = vld [vmem:[#allocation96_spill] sm:$0xff] }
 0x45a   : > { %v5420_v41 = vpop.eup %5419 }
 0x45b   : > { %v3555_v40 = vadd.f32 1.0, %v5420_v41  ;;  %3805 = vxpose.xlu0.b32.cont [13/16] (narrow) %v3773_v8, 16 }
 0x45d   : > { %v3587_v63 = vmul.f32 %v3555_v40, %v3331_v32  ;;  %v9953_v40 = vld [vmem:[#allocation97_spill] sm:$0xff] }
 0x45e   : > { %v3713_v47 = vpop.f32.mrf.mxu3 }
 0x45f   : > { %v3714_v61 = vadd.f32 %v9063_v58, %v3713_v47  ;;  %v3603_v34 = vpack.c.bf16 %v3587_v63, %v3586_v18  ;;  %v9954_v47 = vld [vmem:[#allocation94_spill] sm:$0xff] }
 0x461   : > { %v3774_v46 = vadd.f32 %v3714_v61, %v9939_v43 }
 0x463   : > { %4070 = vmatmul.msk.bf16.gmra.mxu3 %vm2239_vm3, %v3603_v34  ;;  %3806 = vxpose.xlu0.b32.cont [14/16] (narrow) %v3774_v46, 16  ;;  %v9955_v46 = vld [vmem:[#allocation95_spill] sm:$0xff] }
 0x466   : > { %v3716_v53 = vpop.f32.mrf.mxu3 }
 0x467   : > { %v3717_v15 = vadd.f32 %v9063_v58, %v3716_v53 }
 0x469   : > { %v3775_v19 = vadd.f32 %v3717_v15, %v9940_v60 }
 0x46b   : > { %3807 = vxpose.xlu0.b32.cont [15/16] (narrow) %v3775_v19, 16  ;;  %v9956_v19 = vld [vmem:[#allocation98_spill] sm:$0xff] }
 0x46e   : > { %v3718_v59 = vpop.f32.mrf.mxu3 }
 0x46f   : > { %v3719_v28 = vadd.f32 %v9063_v58, %v3718_v59 }
 0x471   : > { %v3776_v3 = vadd.f32 %v3719_v28, %v9941_v37 }
 0x473   : > { %3808 = vxpose.xlu0.b32.end [16/16] (narrow) %v3776_v3, 16  ;;  %v9957_v3 = vld [vmem:[#allocation99_spill] sm:$0xff] }
 0x476   : > { %v3721_v0 = vpop.f32.mrf.mxu3 }
 0x477   : > { %v3722_v26 = vadd.f32 %v9063_v58, %v3721_v0 }
 0x479   : > { %v3777_v38 = vadd.f32 %v3722_v26, %v9942_v2 }
 0x47b   : > { %3825 = vxpose.xlu1.b32.start [1/16] (narrow) %v3777_v38, 16 }
 0x47e   : > { %v3723_v13 = vpop.f32.mrf.mxu3 }
 0x47f   : > { %v3724_v21 = vadd.f32 %v9063_v58, %v3723_v13 }
 0x481   : > { %v3778_v12 = vadd.f32 %v3724_v21, %v9943_v1 }
 0x483   : > { %3826 = vxpose.xlu1.b32.cont [2/16] (narrow) %v3778_v12, 16 }
 0x486   : > { %v3726_v57 = vpop.f32.mrf.mxu3 }
 0x487   : > { %v3727_v35 = vadd.f32 %v9063_v58, %v3726_v57 }
 0x489   : > { %v3779_v45 = vadd.f32 %v3727_v35, %v9944_v7 }
 0x48b   : > { %3827 = vxpose.xlu1.b32.cont [3/16] (narrow) %v3779_v45, 16 }
 0x48e   : > { %v3728_v31 = vpop.f32.mrf.mxu3 }
 0x48f   : > { %v3729_v23 = vadd.f32 %v9063_v58, %v3728_v31 }
 0x491   : > { %v3780_v14 = vadd.f32 %v3729_v23, %v9945_v29 }
 0x493   : > { %3828 = vxpose.xlu1.b32.cont [4/16] (narrow) %v3780_v14, 16 }
 0x496   : > { %v3731_v20 = vpop.f32.mrf.mxu3 }
 0x497   : > { %v3732_v25 = vadd.f32 %v9063_v58, %v3731_v20 }
 0x499   : > { %v3781_v49 = vadd.f32 %v3732_v25, %v9946_v52 }
 0x49b   : > { %3829 = vxpose.xlu1.b32.cont [5/16] (narrow) %v3781_v49, 16 }
 0x49e   : > { %v3733_v50 = vpop.f32.mrf.mxu3 }
 0x49f   : > { %v3734_v62 = vadd.f32 %v9063_v58, %v3733_v50  ;;  %v3809_v26 = vpop.trf.xlu0 }
 0x4a0   : > { %3857 = vst [vmem:[%s244_s25] sm:$0xff] %v3809_v26 }
 0x4a1   : > { %v3782_v24 = vadd.f32 %v3734_v62, %v9947_v51 }
 0x4a3   : > { %3830 = vxpose.xlu1.b32.cont [6/16] (narrow) %v3782_v24, 16 }
 0x4a6   : > { %v3736_v42 = vpop.f32.mrf.mxu3 }
 0x4a7   : > { %v3737_v5 = vadd.f32 %v9063_v58, %v3736_v42  ;;  %v3810_v2 = vpop.trf.xlu0 }
 0x4a8   : > { %3859 = vst [vmem:[%s244_s25 + $0x10] sm:$0xff] %v3810_v2 }
 0x4a9   : > { %v3783_v17 = vadd.f32 %v3737_v5, %v9948_v22 }
 0x4ab   : > { %3831 = vxpose.xlu1.b32.cont [7/16] (narrow) %v3783_v17, 16 }
 0x4ae   : > { %v3738_v33 = vpop.f32.mrf.mxu3 }
 0x4af   : > { %v3739_v6 = vadd.f32 %v9063_v58, %v3738_v33 }
 0x4b1   : > { %v3784_v16 = vadd.f32 %v3739_v6, %v9949_v55 }
 0x4b3   : > { %3832 = vxpose.xlu1.b32.cont [8/16] (narrow) %v3784_v16, 16 }
 0x4b6   : > { %v3741_v27 = vpop.f32.mrf.mxu3 }
 0x4b7   : > { %v3742_v11 = vadd.f32 %v9063_v58, %v3741_v27 }
 0x4b9   : > { %v3785_v48 = vadd.f32 %v3742_v11, %v9950_v9 }
 0x4bb   : > { %3833 = vxpose.xlu1.b32.cont [9/16] (narrow) %v3785_v48, 16 }
 0x4be   : > { %v3743_v44 = vpop.f32.mrf.mxu3 }
 0x4bf   : > { %v3744_v56 = vadd.f32 %v9063_v58, %v3743_v44 }
 0x4c1   : > { %v3786_v4 = vadd.f32 %v3744_v56, %v9951_v54 }
 0x4c3   : > { %3834 = vxpose.xlu1.b32.cont [10/16] (narrow) %v3786_v4, 16 }
 0x4c6   : > { %v3746_v30 = vpop.f32.mrf.mxu3 }
 0x4c7   : > { %v3747_v41 = vadd.f32 %v9063_v58, %v3746_v30 }
 0x4c9   : > { %v3787_v8 = vadd.f32 %v3747_v41, %v9952_v39 }
 0x4cb   : > { %3835 = vxpose.xlu1.b32.cont [11/16] (narrow) %v3787_v8, 16 }
 0x4ce   : > { %v3748_v10 = vpop.f32.mrf.mxu3 }
 0x4cf   : > { %v3749_v32 = vadd.f32 %v9063_v58, %v3748_v10 }
 0x4d1   : > { %v3788_v36 = vadd.f32 %v3749_v32, %v9953_v40 }
 0x4d3   : > { %3836 = vxpose.xlu1.b32.cont [12/16] (narrow) %v3788_v36, 16 }
 0x4d6   : > { %v3751_v63 = vpop.f32.mrf.mxu3 }
 0x4d7   : > { %v3752_v18 = vadd.f32 %v9063_v58, %v3751_v63 }
 0x4d9   : > { %v3789_v61 = vadd.f32 %v3752_v18, %v9954_v47 }
 0x4db   : > { %3837 = vxpose.xlu1.b32.cont [13/16] (narrow) %v3789_v61, 16 }
 0x4de   : > { %v3753_v34 = vpop.f32.mrf.mxu3 }
 0x4df   : > { %v3754_v43 = vadd.f32 %v9063_v58, %v3753_v34 }
 0x4e1   : > { %v3790_v53 = vadd.f32 %v3754_v43, %v9955_v46 }
 0x4e3   : > { %3838 = vxpose.xlu1.b32.cont [14/16] (narrow) %v3790_v53, 16 }
 0x4e6   : > { %v3756_v15 = vpop.f32.mrf.mxu3 }
 0x4e7   : > { %v3757_v60 = vadd.f32 %v9063_v58, %v3756_v15 }
 0x4e9   : > { %v3791_v59 = vadd.f32 %v3757_v60, %v9956_v19 }
 0x4eb   : > { %3839 = vxpose.xlu1.b32.cont [15/16] (narrow) %v3791_v59, 16 }
 0x4ee   : > { %v3758_v28 = vpop.f32.mrf.mxu3 }
 0x4ef   : > { %v3759_v37 = vadd.f32 %v9063_v58, %v3758_v28 }
 0x4f1   : > { %v3792_v0 = vadd.f32 %v3759_v37, %v9957_v3 }
 0x4f3   : > { %3840 = vxpose.xlu1.b32.end [16/16] (narrow) %v3792_v0, 16 }
 0x51f   : > { %v3841_v38 = vpop.trf.xlu1 }
 0x520   : > { %3858 = vst [vmem:[%s244_s25 + $0x8] sm:$0xff] %v3841_v38 }
 0x527   : > { %v3842_v58 = vpop.trf.xlu1 }
 0x528   : > { %3860 = vst [vmem:[%s244_s25 + $0x18] sm:$0xff] %v3842_v58 }
 0x529   : > { %5559 = shalt.err (!%p5556_p4)
}
 0x52a   : > { %s5610_s12 = smov 256  }
 0x52b   : > { %4100 = dma.vmem_to_hbm [thread:$0]  (%p5691_p11), %s3875_s17, 512, %s3877_s26, %s3862_s8, %s5610_s12, %s5610_s12, %s5603_s29  }
 0x52c PF: > { %s3891_s25 = sand.u32 1, %s5586_s18   ;;  %p9958_p7 = scmp.ge.s32.totalorder %s5598_s21, 2 }
 0x52d   : > { %s3892_s13 = scalar_lea.sflag [#allocation5], %s3891_s25 }
 0x52e   : > { %p4107_p5 = pnand %p9958_p7, %p5695_p12 }
 0x530   : > { %p4108_p8 = pneg %p4107_p5 }
 0x532   : > { %5581 = dma.done.wait (%p4108_p8), %s3892_s13, 512  }
 0x533   : > { %5583 = vsyncadd (%p4108_p8), %s3892_s13, 4294966784  ;;  %p18_p10 = scmp.ge.s32.totalorder %s5666_s24, 4   ;;  %s9959_s18 = smov %s5590_s19 }
 0x534   : > { %s9960_s19 = smov %s5594_s20  ;;  %s9961_s20 = smov %s5678_s27 }
 0x535   : > { %s9962_s21 = smov %s5666_s24  ;;  %20 = sbr.rel (!%p18_p10) target bundleno = 5 (0x5), region = 86 }
 0x53a   :  { %3898 = vsyncpa [#allocation4], 1 }
 0x53b   :  { %3900 = vsyncpa [#allocation4 + $0x1], 1 }
 0x53c   :  { %3901 = vsyncpa [#allocation5], 1 }
 0x53d   :  { %3903 = vsyncpa [#allocation5 + $0x1], 1 }

</bundles_post_ra>
